<compile_context>
chip_gen: v6e
topology: v6e:2x2x1
jax: 0.10.0
libtpu: 0.0.40
codegen_flags: <defaults>
</compile_context>

<pallas_src>
import jax
import jax.numpy as jnp
from jax.experimental import pallas as pl
from jax.experimental.pallas import tpu as pltpu

EPS = 1e-5        # nn.BatchNorm2d default eps
_NEG = -1e30      # bias for padded softmax rows -> exp() == 0


# -----------------------------------------------------------------------------
# Fused HMU kernel (one lane-chunk of whole images per grid step)
# -----------------------------------------------------------------------------
def make_hmu_kernel(num_groups, hp, H, W, imgs):
    HW = H * W
    L = imgs * HW
    E = num_groups * hp
    OFFS = [(kh - 1, kw - 1) for kh in range(3) for kw in range(3)]

    def kernel(*refs):
        it = iter(refs)
        x_ref = next(it)
        mask_ref = next(it)
        we_ref = next(it)
        be_ref = next(it)
        wi_refs, bi_refs = [], []
        for _ in range(num_groups):
            wi_refs.append(next(it))
            bi_refs.append(next(it))
        wg1_ref = next(it)
        bg1_ref = next(it)
        wg2_ref = next(it)
        bg2_ref = next(it)
        wf_ref = next(it)
        bf_ref = next(it)
        if imgs > 1:
            avg_ref = next(it)    # (L, imgs)  per-image averaging matrix
            bc_ref = next(it)     # (imgs, L)  per-image broadcast matrix
        o_ref = next(it)
        stack_ref = next(it)      # (9*E, L)   tap-stack staging
        pair_ref = next(it)       # (2*hp, L)  2-input sublane stack
        first_ref = next(it)      # (E, L)     outs_first chunks
        last_ref = next(it)       # (E, L)     outs_last chunks (gate input)

        m_all = mask_ref[...]     # (9, 1, L) border masks (tiled per image)
        x = x_ref[...]            # (C, L), lane-dense

        def shifted(v, t, dh, dw):
            """Shift a (Cin, L) block by (dh, dw) inside each image: one lane
            roll + precomputed border mask (zeros outside each image)."""
            if dh == 0 and dw == 0:
                return v
            s = dh * W + dw
            return pltpu.roll(v, shift=(-s) % L, axis=1) * m_all[t]

        def conv3x3(v, w_ref, b_ref):
            """3x3 conv (pad 1) as ONE matmul: build the (9*Cin, L) shifted
            tap stack in VMEM, then a single (Cout, 9*Cin) @ (9*Cin, L) dot."""
            cin = v.shape[0]
            for t, (dh, dw) in enumerate(OFFS):
                stack_ref[t * cin:(t + 1) * cin, :] = shifted(v, t, dh, dw)
            return jnp.dot(w_ref[...], stack_ref[0:9 * cin, :],
                           preferred_element_type=jnp.float32) + b_ref[...]

        # ---- expand: 1x1 conv + folded BN + ReLU ---------------------------
        xs_all = jnp.maximum(
            jnp.dot(we_ref[...], x, preferred_element_type=jnp.float32)
            + be_ref[...], 0.0)                                   # (E, L)

        # ---- interact branches (sequential group dependency) ---------------
        prev_mid = None
        for g in range(num_groups):
            xg = xs_all[g * hp:(g + 1) * hp, :]
            if g == 0:
                v = xg
            else:
                # stack the two inputs along sublanes BEFORE shifting
                pair_ref[0:hp, :] = xg
                pair_ref[hp:2 * hp, :] = prev_mid
                v = pair_ref[...]
            y = jnp.maximum(conv3x3(v, wi_refs[g], bi_refs[g]), 0.0)
            first_ref[g * hp:(g + 1) * hp, :] = y[0:hp, :]
            if g < num_groups - 1:
                prev_mid = y[hp:2 * hp, :]
                last_ref[g * hp:(g + 1) * hp, :] = y[2 * hp:3 * hp, :]
            else:
                last_ref[g * hp:(g + 1) * hp, :] = y[hp:2 * hp, :]

        # ---- gate: fused GAP -> 1x1 -> ReLU -> 1x1 -> softmax ---------------
        last = last_ref[...]                                      # (E, L)
        if imgs == 1:
            gap = jnp.mean(last, axis=1, keepdims=True)           # (E, 1)
        else:
            gap = jnp.dot(last, avg_ref[...],
                          preferred_element_type=jnp.float32)     # (E, imgs)
        g1 = jnp.maximum(
            jnp.dot(wg1_ref[...], gap, preferred_element_type=jnp.float32)
            + bg1_ref[...], 0.0)                                  # (hp, imgs)
        g2 = jnp.dot(wg2_ref[...], g1,
                     preferred_element_type=jnp.float32) + bg2_ref[...]
        g2 = g2 - jnp.max(g2, axis=0, keepdims=True)
        e = jnp.exp(g2)                                           # pad rows -> 0
        gate = e / jnp.sum(e, axis=0, keepdims=True)              # (E, imgs)
        if imgs == 1:
            gate_full = gate                                      # broadcast
        else:
            gate_full = jnp.dot(gate, bc_ref[...],
                                preferred_element_type=jnp.float32)  # (E, L)

        gated = first_ref[...] * gate_full                        # (E, L)

        # ---- fuse: 3x3 conv (+folded BN/bias), residual add, ReLU ----------
        fused = conv3x3(gated, wf_ref, bf_ref)                    # (C, L)
        o_ref[...] = jnp.maximum(fused + x, 0.0).astype(o_ref.dtype)

    return kernel


# -----------------------------------------------------------------------------
# Wrapper helpers: BN folding, 8-row chunk padding, tap stacking, masks
# -----------------------------------------------------------------------------
def _round_up(v, m):
    return -(-v // m) * m


def _fold_bn(bn, bias=None):
    scale = bn["gamma"] / jnp.sqrt(bn["var"] + EPS)
    b = 0.0 if bias is None else bias
    shift = bn["beta"] + (b - bn["mean"]) * scale
    return scale, shift


def _pad_chunks(a, axis, real, padded, n_chunks, pad_value=0.0):
    """Channel axis = n_chunks blocks of `real`; zero-pad each to `padded`."""
    if real == padded:
        return a
    a = jnp.moveaxis(a, axis, 0)
    rest = a.shape[1:]
    a = a.reshape((n_chunks, real) + rest)
    pad = jnp.full((n_chunks, padded - real) + rest, pad_value, a.dtype)
    a = jnp.concatenate([a, pad], axis=1).reshape((n_chunks * padded,) + rest)
    return jnp.moveaxis(a, 0, axis)


def _stack_taps(w4d):
    """(Cout, Cin, 3, 3) -> (Cout, 9*Cin), tap index t = kh*3 + kw."""
    co, ci = w4d.shape[0], w4d.shape[1]
    return jnp.transpose(w4d, (0, 2, 3, 1)).reshape(co, 9 * ci)


def _tap_masks(H, W, imgs):
    y = jnp.arange(H)[:, None]
    x = jnp.arange(W)[None, :]
    ms = []
    for dh in (-1, 0, 1):
        for dw in (-1, 0, 1):
            valid = (y + dh >= 0) & (y + dh < H) & (x + dw >= 0) & (x + dw < W)
            m = valid.reshape(1, H * W).astype(jnp.float32)
            ms.append(jnp.tile(m, (1, imgs)))
    return jnp.stack(ms, axis=0)  # (9, 1, imgs*H*W)


def _pick_imgs_per_block(N, HW, max_lanes=2048):
    """Largest divisor of N that keeps >=2 grid steps (v7x: 2 TCs) and a
    bounded lane-chunk (VMEM)."""
    best = 1
    for d in range(1, N + 1):
        if N % d == 0 and d * HW <= max_lanes and (N // d) >= 2:
            best = max(best, d)
    return best


# -----------------------------------------------------------------------------
# Wrapper: parameter prepacking + pallas_call plumbing
# -----------------------------------------------------------------------------
def hmu_pallas(x_nchw, params, num_groups=4, imgs_per_block=None):
    N, C, H, W = x_nchw.shape
    hd = params["hidden"]
    HW = H * W
    hp = _round_up(hd, 8)            # hd chunks padded to 8-sublane boundary
    E = num_groups * hp

    if imgs_per_block is None:
        imgs_per_block = _pick_imgs_per_block(N, HW)
    assert N % imgs_per_block == 0
    BL = imgs_per_block * HW
    n_blocks = N // imgs_per_block

    # ---- fold BN, pad chunks, tap-stack weights (all wrapper-side, free) ----
    scale_e, shift_e = _fold_bn(params["expand"]["bn"])
    we = params["expand"]["w"][:, :, 0, 0] * scale_e[:, None]
    we = _pad_chunks(we, 0, hd, hp, num_groups)                       # (E, C)
    be = _pad_chunks(shift_e, 0, hd, hp, num_groups)[:, None]         # (E, 1)

    wi_list, bi_list = [], []
    for g in range(num_groups):
        p = params["interact"][g]
        s, sh = _fold_bn(p["bn"])
        w = p["w"] * s[:, None, None, None]
        n_out = 3 if g < num_groups - 1 else 2
        n_in = 1 if g == 0 else 2
        w = _pad_chunks(w, 0, hd, hp, n_out)
        w = _pad_chunks(w, 1, hd, hp, n_in)
        wi_list.append(_stack_taps(w))                 # (n_out*hp, 9*n_in*hp)
        bi_list.append(_pad_chunks(sh, 0, hd, hp, n_out)[:, None])

    w1 = params["gate"]["w1"][:, :, 0, 0]
    w1 = _pad_chunks(_pad_chunks(w1, 0, hd, hp, 1), 1, hd, hp, num_groups)
    b1 = _pad_chunks(params["gate"]["b1"], 0, hd, hp, 1)[:, None]     # (hp, 1)
    w2 = params["gate"]["w2"][:, :, 0, 0]
    w2 = _pad_chunks(_pad_chunks(w2, 0, hd, hp, num_groups), 1, hd, hp, 1)
    b2 = _pad_chunks(params["gate"]["b2"], 0, hd, hp, num_groups,
                     pad_value=_NEG)[:, None]                         # (E, 1)

    scale_f, shift_f = _fold_bn(params["fuse"]["bn"], bias=params["fuse"]["b"])
    wf4 = params["fuse"]["w"] * scale_f[:, None, None, None]
    wf = _stack_taps(_pad_chunks(wf4, 1, hd, hp, num_groups))         # (C, 9E)
    bf = shift_f[:, None]                                             # (C, 1)

    masks = _tap_masks(H, W, imgs_per_block)                          # (9,1,BL)

    # ---- fold the batch into the lane axis: NCHW -> (C, N*HW) --------------
    x2d = jnp.transpose(x_nchw.reshape(N, C, HW), (1, 0, 2)).reshape(C, N * HW)

    operands = [x2d, masks, we, be]
    for g in range(num_groups):
        operands += [wi_list[g], bi_list[g]]
    operands += [w1, b1, w2, b2, wf, bf]
    if imgs_per_block > 1:
        seg = jnp.repeat(jnp.arange(imgs_per_block), HW)
        onehot = (seg[:, None] ==
                  jnp.arange(imgs_per_block)[None, :]).astype(jnp.float32)
        operands += [onehot / float(HW), onehot.T]   # avg (BL,imgs), bcast (imgs,BL)

    in_specs = [pl.BlockSpec((C, BL), lambda i: (0, i))]
    in_specs += [pl.BlockSpec(a.shape, lambda i, nd=a.ndim: (0,) * nd)
                 for a in operands[1:]]
    # TODO(synk): constants are still double-buffered (negligible VMEM here);
    # pl.Buffered(1) could single-buffer them if channel counts grow on v7x.

    scratch = [pltpu.VMEM((9 * E, BL), jnp.float32),   # tap stack
               pltpu.VMEM((2 * hp, BL), jnp.float32),  # 2-input sublane stack
               pltpu.VMEM((E, BL), jnp.float32),       # outs_first
               pltpu.VMEM((E, BL), jnp.float32)]       # outs_last

    # advisory cost estimate for the XLA scheduler
    conv_flops = 2 * HW * (E * C + C * 9 * E)
    for g in range(num_groups):
        n_out = 3 if g < num_groups - 1 else 2
        n_in = 1 if g == 0 else 2
        conv_flops += 2 * HW * (n_out * hp) * (9 * n_in * hp)
    cost = pl.CostEstimate(
        flops=int(N * conv_flops),
        transcendentals=int(N * E),
        bytes_accessed=int(4 * (2 * x2d.size
                                + sum(int(a.size) for a in operands[1:]))))

    kernel = make_hmu_kernel(num_groups, hp, H, W, imgs_per_block)

    out2d = pl.pallas_call(
        kernel,
        out_shape=jax.ShapeDtypeStruct((C, N * HW), jnp.float32),
        grid_spec=pltpu.PrefetchScalarGridSpec(
            num_scalar_prefetch=0,
            grid=(n_blocks,),
            in_specs=in_specs,
            out_specs=pl.BlockSpec((C, BL), lambda i: (0, i)),
            scratch_shapes=scratch),
        compiler_params=pltpu.CompilerParams(
            dimension_semantics=("parallel",)),
        cost_estimate=cost,
    )(*operands)

    return jnp.transpose(out2d.reshape(C, N, HW), (1, 0, 2)).reshape(N, C, H, W)


# -----------------------------------------------------------------------------
# Deterministic synthetic parameters (mirrors the PyTorch module's layers)
# -----------------------------------------------------------------------------
def make_params(key, in_c, num_groups=4):
    hd = in_c // 2
    exp = hd * num_groups

    def bn_p(k, c):
        kg, kb, km, kv = jax.random.split(k, 4)
        return {"gamma": 0.5 + jax.random.uniform(kg, (c,), jnp.float32),
                "beta": 0.1 * jax.random.normal(kb, (c,), jnp.float32),
                "mean": 0.1 * jax.random.normal(km, (c,), jnp.float32),
                "var": 0.5 + jax.random.uniform(kv, (c,), jnp.float32)}

    def conv_w(k, cout, cin, ksize):
        return 0.1 * jax.random.normal(k, (cout, cin, ksize, ksize), jnp.float32)

    ks = iter(jax.random.split(key, 2 + 2 * num_groups + 4 + 3))

    params = {"hidden": hd}
    params["expand"] = {"w": conv_w(next(ks), exp, in_c, 1),
                        "bn": bn_p(next(ks), exp)}
    inter = []
    for g in range(num_groups):
        cin = hd if g == 0 else 2 * hd
        cout = 2 * hd if g == num_groups - 1 else 3 * hd
        inter.append({"w": conv_w(next(ks), cout, cin, 3),
                      "bn": bn_p(next(ks), cout)})
    params["interact"] = inter
    params["gate"] = {
        "w1": conv_w(next(ks), hd, exp, 1),
        "b1": 0.1 * jax.random.normal(next(ks), (hd,), jnp.float32),
        "w2": conv_w(next(ks), exp, hd, 1),
        "b2": 0.1 * jax.random.normal(next(ks), (exp,), jnp.float32),
    }
    params["fuse"] = {
        "w": conv_w(next(ks), in_c, exp, 3),
        "b": 0.1 * jax.random.normal(next(ks), (in_c,), jnp.float32),
        "bn": bn_p(next(ks), in_c),
    }
    return params


# -----------------------------------------------------------------------------
# Pure-JAX reference (independent formulation: lax convs + explicit BN)
# -----------------------------------------------------------------------------
def hmu_ref(x, params, num_groups=4):
    def conv2d(z, w, bias=None, padding=0):
        y = jax.lax.conv_general_dilated(
            z, w, window_strides=(1, 1),
            padding=((padding, padding), (padding, padding)),
            dimension_numbers=("NCHW", "OIHW", "NCHW"),
            precision=jax.lax.Precision.HIGHEST)
        if bias is not None:
            y = y + bias.reshape(1, -1, 1, 1)
        return y

    def bn(y, p):
        scale = p["gamma"] / jnp.sqrt(p["var"] + EPS)
        shift = p["beta"] - p["mean"] * scale
        return y * scale.reshape(1, -1, 1, 1) + shift.reshape(1, -1, 1, 1)

    def cbr(z, p, padding):
        return jnp.maximum(bn(conv2d(z, p["w"], None, padding), p["bn"]), 0.0)

    hd = params["hidden"]
    xs_all = cbr(x, params["expand"], 0)
    xs = [xs_all[:, g * hd:(g + 1) * hd] for g in range(num_groups)]

    outs = []
    y = cbr(xs[0], params["interact"][0], 1)
    outs.append((y[:, :hd], y[:, hd:2 * hd], y[:, 2 * hd:]))
    for g in range(1, num_groups - 1):
        y = cbr(jnp.concatenate([xs[g], outs[g - 1][1]], axis=1),
                params["interact"][g], 1)
        outs.append((y[:, :hd], y[:, hd:2 * hd], y[:, 2 * hd:]))
    g = num_groups - 1
    y = cbr(jnp.concatenate([xs[g], outs[g - 1][1]], axis=1),
            params["interact"][g], 1)
    outs.append((y[:, :hd], y[:, hd:]))

    out = jnp.concatenate([o[0] for o in outs], axis=1)
    gate_in = jnp.concatenate([o[-1] for o in outs], axis=1)
    gap = jnp.mean(gate_in, axis=(2, 3), keepdims=True)
    g1 = jnp.maximum(conv2d(gap, params["gate"]["w1"], params["gate"]["b1"]), 0.0)
    g2 = conv2d(g1, params["gate"]["w2"], params["gate"]["b2"])
    gate = jax.nn.softmax(g2, axis=1)

    fused = bn(conv2d(out * gate, params["fuse"]["w"], params["fuse"]["b"], 1),
               params["fuse"]["bn"])
    return jnp.maximum(fused + x, 0.0)


# -----------------------------------------------------------------------------
if __name__ == "__main__":
    N, IN_C, H, W = 2, 8, 16, 16
    NUM_GROUPS = 4

    key = jax.random.PRNGKey(0)
    kx, kp, kx4 = jax.random.split(key, 3)
    x = jax.random.normal(kx, (N, IN_C, H, W), jnp.float32)   # NCHW, like PyTorch
    params = make_params(kp, IN_C, NUM_GROUPS)

    # 1 image per lane chunk (grid=(2,), both v7x TensorCores busy)
    out = jax.block_until_ready(hmu_pallas(x, params, NUM_GROUPS))
    assert out.shape == (N, IN_C, H, W), out.shape
    ref = jax.block_until_ready(hmu_ref(x, params, NUM_GROUPS))
    err = float(jnp.max(jnp.abs(out - ref)))
    assert err < 1e-3, f"max abs err {err}"

    # lane-batched path: 2 images per lane chunk (grid=(2,), chunk = 2*HW lanes)
    x4 = jax.random.normal(kx4, (4, IN_C, H, W), jnp.float32)
    out4 = jax.block_until_ready(hmu_pallas(x4, params, NUM_GROUPS))
    ref4 = jax.block_until_ready(hmu_ref(x4, params, NUM_GROUPS))
    err4 = float(jnp.max(jnp.abs(out4 - ref4)))
    assert err4 < 1e-3, f"max abs err {err4}"

    print("KERNEL_OK")
</pallas_src>

<mosaic_0001>
module attributes {stable_mosaic.version = 11 : i64} {
  func.func @kernel(%arg0: i32, %arg1: memref<8x256xf32, #tpu.memory_space<vmem>>, %arg2: memref<9x1x256xf32, #tpu.memory_space<vmem>>, %arg3: memref<32x8xf32, #tpu.memory_space<vmem>>, %arg4: memref<32x1xf32, #tpu.memory_space<vmem>>, %arg5: memref<24x72xf32, #tpu.memory_space<vmem>>, %arg6: memref<24x1xf32, #tpu.memory_space<vmem>>, %arg7: memref<24x144xf32, #tpu.memory_space<vmem>>, %arg8: memref<24x1xf32, #tpu.memory_space<vmem>>, %arg9: memref<24x144xf32, #tpu.memory_space<vmem>>, %arg10: memref<24x1xf32, #tpu.memory_space<vmem>>, %arg11: memref<16x144xf32, #tpu.memory_space<vmem>>, %arg12: memref<16x1xf32, #tpu.memory_space<vmem>>, %arg13: memref<8x32xf32, #tpu.memory_space<vmem>>, %arg14: memref<8x1xf32, #tpu.memory_space<vmem>>, %arg15: memref<32x8xf32, #tpu.memory_space<vmem>>, %arg16: memref<32x1xf32, #tpu.memory_space<vmem>>, %arg17: memref<8x288xf32, #tpu.memory_space<vmem>>, %arg18: memref<8x1xf32, #tpu.memory_space<vmem>>, %arg19: memref<8x256xf32, #tpu.memory_space<vmem>>, %arg20: memref<288x256xf32, #tpu.memory_space<vmem>>, %arg21: memref<16x256xf32, #tpu.memory_space<vmem>>, %arg22: memref<32x256xf32, #tpu.memory_space<vmem>>, %arg23: memref<32x256xf32, #tpu.memory_space<vmem>>) attributes {dimension_semantics = [#tpu.dimension_semantics<parallel>], iteration_bounds = array<i64: 2>, scalar_prefetch = 0 : i64, scratch_operands = 4 : i64, tpu.core_type = #tpu.core_type<tc>, window_params = [{transform_indices = @transform_0, window_bounds = array<i64: 8, 256>}, {pipeline_mode = #tpu.pipeline_mode<synchronous>, transform_indices = @transform_1, window_bounds = array<i64: 9, 1, 256>}, {pipeline_mode = #tpu.pipeline_mode<synchronous>, transform_indices = @transform_2, window_bounds = array<i64: 32, 8>}, {pipeline_mode = #tpu.pipeline_mode<synchronous>, transform_indices = @transform_3, window_bounds = array<i64: 32, 1>}, {pipeline_mode = #tpu.pipeline_mode<synchronous>, transform_indices = @transform_4, window_bounds = array<i64: 24, 72>}, {pipeline_mode = #tpu.pipeline_mode<synchronous>, transform_indices = @transform_5, window_bounds = array<i64: 24, 1>}, {pipeline_mode = #tpu.pipeline_mode<synchronous>, transform_indices = @transform_6, window_bounds = array<i64: 24, 144>}, {pipeline_mode = #tpu.pipeline_mode<synchronous>, transform_indices = @transform_7, window_bounds = array<i64: 24, 1>}, {pipeline_mode = #tpu.pipeline_mode<synchronous>, transform_indices = @transform_8, window_bounds = array<i64: 24, 144>}, {pipeline_mode = #tpu.pipeline_mode<synchronous>, transform_indices = @transform_9, window_bounds = array<i64: 24, 1>}, {pipeline_mode = #tpu.pipeline_mode<synchronous>, transform_indices = @transform_10, window_bounds = array<i64: 16, 144>}, {pipeline_mode = #tpu.pipeline_mode<synchronous>, transform_indices = @transform_11, window_bounds = array<i64: 16, 1>}, {pipeline_mode = #tpu.pipeline_mode<synchronous>, transform_indices = @transform_12, window_bounds = array<i64: 8, 32>}, {pipeline_mode = #tpu.pipeline_mode<synchronous>, transform_indices = @transform_13, window_bounds = array<i64: 8, 1>}, {pipeline_mode = #tpu.pipeline_mode<synchronous>, transform_indices = @transform_14, window_bounds = array<i64: 32, 8>}, {pipeline_mode = #tpu.pipeline_mode<synchronous>, transform_indices = @transform_15, window_bounds = array<i64: 32, 1>}, {pipeline_mode = #tpu.pipeline_mode<synchronous>, transform_indices = @transform_16, window_bounds = array<i64: 8, 288>}, {pipeline_mode = #tpu.pipeline_mode<synchronous>, transform_indices = @transform_17, window_bounds = array<i64: 8, 1>}, {transform_indices = @transform_18, window_bounds = array<i64: 8, 256>}]} {
    %c0 = arith.constant 0 : index
    %c0_0 = arith.constant 0 : index
    %c0_1 = arith.constant 0 : index
    %0 = vector.load %arg2[%c0, %c0_0, %c0_1] : memref<9x1x256xf32, #tpu.memory_space<vmem>>, vector<9x1x256xf32>
    %c0_2 = arith.constant 0 : index
    %c0_3 = arith.constant 0 : index
    %1 = vector.load %arg1[%c0_2, %c0_3] : memref<8x256xf32, #tpu.memory_space<vmem>>, vector<8x256xf32>
    %c0_4 = arith.constant 0 : index
    %c0_5 = arith.constant 0 : index
    %2 = vector.load %arg3[%c0_4, %c0_5] : memref<32x8xf32, #tpu.memory_space<vmem>>, vector<32x8xf32>
    %cst = arith.constant dense<0.000000e+00> : vector<32x256xf32>
    %3 = tpu.matmul %2, %1, %cst {dimension_numbers = #tpu.dot_dimension_numbers<[1], [0], [0], [1], [0, 0, 1, 1], [], []>} : vector<32x8xf32>, vector<8x256xf32>, vector<32x256xf32> -> vector<32x256xf32>
    %c0_6 = arith.constant 0 : index
    %c0_7 = arith.constant 0 : index
    %4 = vector.load %arg4[%c0_6, %c0_7] : memref<32x1xf32, #tpu.memory_space<vmem>>, vector<32x1xf32>
    %5 = vector.broadcast %4 : vector<32x1xf32> to vector<32x256xf32>
    %6 = arith.addf %3, %5 : vector<32x256xf32>
    %cst_8 = arith.constant 0.000000e+00 : f32
    %7 = vector.broadcast %cst_8 : f32 to vector<32x256xf32>
    %8 = arith.maximumf %6, %7 : vector<32x256xf32>
    %9 = vector.extract_strided_slice %8 {offsets = [0, 0], sizes = [8, 256], strides = [1, 1]} : vector<32x256xf32> to vector<8x256xf32>
    %c17_i32 = arith.constant 17 : i32
    %10 = tpu.dynamic_rotate %9 by %c17_i32 dim 1 : vector<8x256xf32>, i32 -> vector<8x256xf32>
    %11 = vector.extract_strided_slice %0 {offsets = [0, 0, 0], sizes = [1, 1, 256], strides = [1, 1, 1]} : vector<9x1x256xf32> to vector<1x1x256xf32>
    %12 = vector.shape_cast %11 : vector<1x1x256xf32> to vector<1x256xf32>
    %13 = vector.broadcast %12 : vector<1x256xf32> to vector<8x256xf32>
    %14 = arith.mulf %10, %13 : vector<8x256xf32>
    %c0_9 = arith.constant 0 : index
    %c0_10 = arith.constant 0 : index
    %15 = vector.load %arg20[%c0_9, %c0_10] : memref<288x256xf32, #tpu.memory_space<vmem>>, vector<8x256xf32>
    tpu.vector_store %arg20[%c0_9, %c0_10], %14 {strides = array<i32>} : memref<288x256xf32, #tpu.memory_space<vmem>>, vector<8x256xf32>,
    %c16_i32 = arith.constant 16 : i32
    %16 = tpu.dynamic_rotate %9 by %c16_i32 dim 1 : vector<8x256xf32>, i32 -> vector<8x256xf32>
    %17 = vector.extract_strided_slice %0 {offsets = [1, 0, 0], sizes = [1, 1, 256], strides = [1, 1, 1]} : vector<9x1x256xf32> to vector<1x1x256xf32>
    %18 = vector.shape_cast %17 : vector<1x1x256xf32> to vector<1x256xf32>
    %19 = vector.broadcast %18 : vector<1x256xf32> to vector<8x256xf32>
    %20 = arith.mulf %16, %19 : vector<8x256xf32>
    %c8 = arith.constant 8 : index
    %c0_11 = arith.constant 0 : index
    %21 = vector.load %arg20[%c8, %c0_11] : memref<288x256xf32, #tpu.memory_space<vmem>>, vector<8x256xf32>
    tpu.vector_store %arg20[%c8, %c0_11], %20 {strides = array<i32>} : memref<288x256xf32, #tpu.memory_space<vmem>>, vector<8x256xf32>,
    %c15_i32 = arith.constant 15 : i32
    %22 = tpu.dynamic_rotate %9 by %c15_i32 dim 1 : vector<8x256xf32>, i32 -> vector<8x256xf32>
    %23 = vector.extract_strided_slice %0 {offsets = [2, 0, 0], sizes = [1, 1, 256], strides = [1, 1, 1]} : vector<9x1x256xf32> to vector<1x1x256xf32>
    %24 = vector.shape_cast %23 : vector<1x1x256xf32> to vector<1x256xf32>
    %25 = vector.broadcast %24 : vector<1x256xf32> to vector<8x256xf32>
    %26 = arith.mulf %22, %25 : vector<8x256xf32>
    %c16 = arith.constant 16 : index
    %c0_12 = arith.constant 0 : index
    %27 = vector.load %arg20[%c16, %c0_12] : memref<288x256xf32, #tpu.memory_space<vmem>>, vector<8x256xf32>
    tpu.vector_store %arg20[%c16, %c0_12], %26 {strides = array<i32>} : memref<288x256xf32, #tpu.memory_space<vmem>>, vector<8x256xf32>,
    %c1_i32 = arith.constant 1 : i32
    %28 = tpu.dynamic_rotate %9 by %c1_i32 dim 1 : vector<8x256xf32>, i32 -> vector<8x256xf32>
    %29 = vector.extract_strided_slice %0 {offsets = [3, 0, 0], sizes = [1, 1, 256], strides = [1, 1, 1]} : vector<9x1x256xf32> to vector<1x1x256xf32>
    %30 = vector.shape_cast %29 : vector<1x1x256xf32> to vector<1x256xf32>
    %31 = vector.broadcast %30 : vector<1x256xf32> to vector<8x256xf32>
    %32 = arith.mulf %28, %31 : vector<8x256xf32>
    %c24 = arith.constant 24 : index
    %c0_13 = arith.constant 0 : index
    %33 = vector.load %arg20[%c24, %c0_13] : memref<288x256xf32, #tpu.memory_space<vmem>>, vector<8x256xf32>
    tpu.vector_store %arg20[%c24, %c0_13], %32 {strides = array<i32>} : memref<288x256xf32, #tpu.memory_space<vmem>>, vector<8x256xf32>,
    %c32 = arith.constant 32 : index
    %c0_14 = arith.constant 0 : index
    %34 = vector.load %arg20[%c32, %c0_14] : memref<288x256xf32, #tpu.memory_space<vmem>>, vector<8x256xf32>
    tpu.vector_store %arg20[%c32, %c0_14], %9 {strides = array<i32>} : memref<288x256xf32, #tpu.memory_space<vmem>>, vector<8x256xf32>,
    %c255_i32 = arith.constant 255 : i32
    %35 = tpu.dynamic_rotate %9 by %c255_i32 dim 1 : vector<8x256xf32>, i32 -> vector<8x256xf32>
    %36 = vector.extract_strided_slice %0 {offsets = [5, 0, 0], sizes = [1, 1, 256], strides = [1, 1, 1]} : vector<9x1x256xf32> to vector<1x1x256xf32>
    %37 = vector.shape_cast %36 : vector<1x1x256xf32> to vector<1x256xf32>
    %38 = vector.broadcast %37 : vector<1x256xf32> to vector<8x256xf32>
    %39 = arith.mulf %35, %38 : vector<8x256xf32>
    %c40 = arith.constant 40 : index
    %c0_15 = arith.constant 0 : index
    %40 = vector.load %arg20[%c40, %c0_15] : memref<288x256xf32, #tpu.memory_space<vmem>>, vector<8x256xf32>
    tpu.vector_store %arg20[%c40, %c0_15], %39 {strides = array<i32>} : memref<288x256xf32, #tpu.memory_space<vmem>>, vector<8x256xf32>,
    %c241_i32 = arith.constant 241 : i32
    %41 = tpu.dynamic_rotate %9 by %c241_i32 dim 1 : vector<8x256xf32>, i32 -> vector<8x256xf32>
    %42 = vector.extract_strided_slice %0 {offsets = [6, 0, 0], sizes = [1, 1, 256], strides = [1, 1, 1]} : vector<9x1x256xf32> to vector<1x1x256xf32>
    %43 = vector.shape_cast %42 : vector<1x1x256xf32> to vector<1x256xf32>
    %44 = vector.broadcast %43 : vector<1x256xf32> to vector<8x256xf32>
    %45 = arith.mulf %41, %44 : vector<8x256xf32>
    %c48 = arith.constant 48 : index
    %c0_16 = arith.constant 0 : index
    %46 = vector.load %arg20[%c48, %c0_16] : memref<288x256xf32, #tpu.memory_space<vmem>>, vector<8x256xf32>
    tpu.vector_store %arg20[%c48, %c0_16], %45 {strides = array<i32>} : memref<288x256xf32, #tpu.memory_space<vmem>>, vector<8x256xf32>,
    %c240_i32 = arith.constant 240 : i32
    %47 = tpu.dynamic_rotate %9 by %c240_i32 dim 1 : vector<8x256xf32>, i32 -> vector<8x256xf32>
    %48 = vector.extract_strided_slice %0 {offsets = [7, 0, 0], sizes = [1, 1, 256], strides = [1, 1, 1]} : vector<9x1x256xf32> to vector<1x1x256xf32>
    %49 = vector.shape_cast %48 : vector<1x1x256xf32> to vector<1x256xf32>
    %50 = vector.broadcast %49 : vector<1x256xf32> to vector<8x256xf32>
    %51 = arith.mulf %47, %50 : vector<8x256xf32>
    %c56 = arith.constant 56 : index
    %c0_17 = arith.constant 0 : index
    %52 = vector.load %arg20[%c56, %c0_17] : memref<288x256xf32, #tpu.memory_space<vmem>>, vector<8x256xf32>
    tpu.vector_store %arg20[%c56, %c0_17], %51 {strides = array<i32>} : memref<288x256xf32, #tpu.memory_space<vmem>>, vector<8x256xf32>,
    %c239_i32 = arith.constant 239 : i32
    %53 = tpu.dynamic_rotate %9 by %c239_i32 dim 1 : vector<8x256xf32>, i32 -> vector<8x256xf32>
    %54 = vector.extract_strided_slice %0 {offsets = [8, 0, 0], sizes = [1, 1, 256], strides = [1, 1, 1]} : vector<9x1x256xf32> to vector<1x1x256xf32>
    %55 = vector.shape_cast %54 : vector<1x1x256xf32> to vector<1x256xf32>
    %56 = vector.broadcast %55 : vector<1x256xf32> to vector<8x256xf32>
    %57 = arith.mulf %53, %56 : vector<8x256xf32>
    %c64 = arith.constant 64 : index
    %c0_18 = arith.constant 0 : index
    %58 = vector.load %arg20[%c64, %c0_18] : memref<288x256xf32, #tpu.memory_space<vmem>>, vector<8x256xf32>
    tpu.vector_store %arg20[%c64, %c0_18], %57 {strides = array<i32>} : memref<288x256xf32, #tpu.memory_space<vmem>>, vector<8x256xf32>,
    %c0_19 = arith.constant 0 : index
    %c0_20 = arith.constant 0 : index
    %59 = vector.load %arg5[%c0_19, %c0_20] : memref<24x72xf32, #tpu.memory_space<vmem>>, vector<24x72xf32>
    %c0_21 = arith.constant 0 : index
    %c0_22 = arith.constant 0 : index
    %60 = vector.load %arg20[%c0_21, %c0_22] : memref<288x256xf32, #tpu.memory_space<vmem>>, vector<72x256xf32>
    %cst_23 = arith.constant dense<0.000000e+00> : vector<24x256xf32>
    %61 = tpu.matmul %59, %60, %cst_23 {dimension_numbers = #tpu.dot_dimension_numbers<[1], [0], [0], [1], [0, 0, 1, 1], [], []>} : vector<24x72xf32>, vector<72x256xf32>, vector<24x256xf32> -> vector<24x256xf32>
    %c0_24 = arith.constant 0 : index
    %c0_25 = arith.constant 0 : index
    %62 = vector.load %arg6[%c0_24, %c0_25] : memref<24x1xf32, #tpu.memory_space<vmem>>, vector<24x1xf32>
    %63 = vector.broadcast %62 : vector<24x1xf32> to vector<24x256xf32>
    %64 = arith.addf %61, %63 : vector<24x256xf32>
    %cst_26 = arith.constant 0.000000e+00 : f32
    %65 = vector.broadcast %cst_26 : f32 to vector<24x256xf32>
    %66 = arith.maximumf %64, %65 : vector<24x256xf32>
    %67 = vector.extract_strided_slice %66 {offsets = [0, 0], sizes = [8, 256], strides = [1, 1]} : vector<24x256xf32> to vector<8x256xf32>
    %c0_27 = arith.constant 0 : index
    %c0_28 = arith.constant 0 : index
    %68 = vector.load %arg22[%c0_27, %c0_28] : memref<32x256xf32, #tpu.memory_space<vmem>>, vector<8x256xf32>
    tpu.vector_store %arg22[%c0_27, %c0_28], %67 {strides = array<i32>} : memref<32x256xf32, #tpu.memory_space<vmem>>, vector<8x256xf32>,
    %69 = vector.extract_strided_slice %66 {offsets = [8, 0], sizes = [8, 256], strides = [1, 1]} : vector<24x256xf32> to vector<8x256xf32>
    %70 = vector.extract_strided_slice %66 {offsets = [16, 0], sizes = [8, 256], strides = [1, 1]} : vector<24x256xf32> to vector<8x256xf32>
    %c0_29 = arith.constant 0 : index
    %c0_30 = arith.constant 0 : index
    %71 = vector.load %arg23[%c0_29, %c0_30] : memref<32x256xf32, #tpu.memory_space<vmem>>, vector<8x256xf32>
    tpu.vector_store %arg23[%c0_29, %c0_30], %70 {strides = array<i32>} : memref<32x256xf32, #tpu.memory_space<vmem>>, vector<8x256xf32>,
    %72 = vector.extract_strided_slice %8 {offsets = [8, 0], sizes = [8, 256], strides = [1, 1]} : vector<32x256xf32> to vector<8x256xf32>
    %c0_31 = arith.constant 0 : index
    %c0_32 = arith.constant 0 : index
    %73 = vector.load %arg21[%c0_31, %c0_32] : memref<16x256xf32, #tpu.memory_space<vmem>>, vector<8x256xf32>
    tpu.vector_store %arg21[%c0_31, %c0_32], %72 {strides = array<i32>} : memref<16x256xf32, #tpu.memory_space<vmem>>, vector<8x256xf32>,
    %c8_33 = arith.constant 8 : index
    %c0_34 = arith.constant 0 : index
    %74 = vector.load %arg21[%c8_33, %c0_34] : memref<16x256xf32, #tpu.memory_space<vmem>>, vector<8x256xf32>
    tpu.vector_store %arg21[%c8_33, %c0_34], %69 {strides = array<i32>} : memref<16x256xf32, #tpu.memory_space<vmem>>, vector<8x256xf32>,
    %c0_35 = arith.constant 0 : index
    %c0_36 = arith.constant 0 : index
    %75 = vector.load %arg21[%c0_35, %c0_36] : memref<16x256xf32, #tpu.memory_space<vmem>>, vector<16x256xf32>
    %c17_i32_37 = arith.constant 17 : i32
    %76 = tpu.dynamic_rotate %75 by %c17_i32_37 dim 1 : vector<16x256xf32>, i32 -> vector<16x256xf32>
    %77 = vector.extract_strided_slice %0 {offsets = [0, 0, 0], sizes = [1, 1, 256], strides = [1, 1, 1]} : vector<9x1x256xf32> to vector<1x1x256xf32>
    %78 = vector.shape_cast %77 : vector<1x1x256xf32> to vector<1x256xf32>
    %79 = vector.broadcast %78 : vector<1x256xf32> to vector<16x256xf32>
    %80 = arith.mulf %76, %79 : vector<16x256xf32>
    %c0_38 = arith.constant 0 : index
    %c0_39 = arith.constant 0 : index
    %81 = vector.load %arg20[%c0_38, %c0_39] : memref<288x256xf32, #tpu.memory_space<vmem>>, vector<16x256xf32>
    tpu.vector_store %arg20[%c0_38, %c0_39], %80 {strides = array<i32>} : memref<288x256xf32, #tpu.memory_space<vmem>>, vector<16x256xf32>,
    %c16_i32_40 = arith.constant 16 : i32
    %82 = tpu.dynamic_rotate %75 by %c16_i32_40 dim 1 : vector<16x256xf32>, i32 -> vector<16x256xf32>
    %83 = vector.extract_strided_slice %0 {offsets = [1, 0, 0], sizes = [1, 1, 256], strides = [1, 1, 1]} : vector<9x1x256xf32> to vector<1x1x256xf32>
    %84 = vector.shape_cast %83 : vector<1x1x256xf32> to vector<1x256xf32>
    %85 = vector.broadcast %84 : vector<1x256xf32> to vector<16x256xf32>
    %86 = arith.mulf %82, %85 : vector<16x256xf32>
    %c16_41 = arith.constant 16 : index
    %c0_42 = arith.constant 0 : index
    %87 = vector.load %arg20[%c16_41, %c0_42] : memref<288x256xf32, #tpu.memory_space<vmem>>, vector<16x256xf32>
    tpu.vector_store %arg20[%c16_41, %c0_42], %86 {strides = array<i32>} : memref<288x256xf32, #tpu.memory_space<vmem>>, vector<16x256xf32>,
    %c15_i32_43 = arith.constant 15 : i32
    %88 = tpu.dynamic_rotate %75 by %c15_i32_43 dim 1 : vector<16x256xf32>, i32 -> vector<16x256xf32>
    %89 = vector.extract_strided_slice %0 {offsets = [2, 0, 0], sizes = [1, 1, 256], strides = [1, 1, 1]} : vector<9x1x256xf32> to vector<1x1x256xf32>
    %90 = vector.shape_cast %89 : vector<1x1x256xf32> to vector<1x256xf32>
    %91 = vector.broadcast %90 : vector<1x256xf32> to vector<16x256xf32>
    %92 = arith.mulf %88, %91 : vector<16x256xf32>
    %c32_44 = arith.constant 32 : index
    %c0_45 = arith.constant 0 : index
    %93 = vector.load %arg20[%c32_44, %c0_45] : memref<288x256xf32, #tpu.memory_space<vmem>>, vector<16x256xf32>
    tpu.vector_store %arg20[%c32_44, %c0_45], %92 {strides = array<i32>} : memref<288x256xf32, #tpu.memory_space<vmem>>, vector<16x256xf32>,
    %c1_i32_46 = arith.constant 1 : i32
    %94 = tpu.dynamic_rotate %75 by %c1_i32_46 dim 1 : vector<16x256xf32>, i32 -> vector<16x256xf32>
    %95 = vector.extract_strided_slice %0 {offsets = [3, 0, 0], sizes = [1, 1, 256], strides = [1, 1, 1]} : vector<9x1x256xf32> to vector<1x1x256xf32>
    %96 = vector.shape_cast %95 : vector<1x1x256xf32> to vector<1x256xf32>
    %97 = vector.broadcast %96 : vector<1x256xf32> to vector<16x256xf32>
    %98 = arith.mulf %94, %97 : vector<16x256xf32>
    %c48_47 = arith.constant 48 : index
    %c0_48 = arith.constant 0 : index
    %99 = vector.load %arg20[%c48_47, %c0_48] : memref<288x256xf32, #tpu.memory_space<vmem>>, vector<16x256xf32>
    tpu.vector_store %arg20[%c48_47, %c0_48], %98 {strides = array<i32>} : memref<288x256xf32, #tpu.memory_space<vmem>>, vector<16x256xf32>,
    %c64_49 = arith.constant 64 : index
    %c0_50 = arith.constant 0 : index
    %100 = vector.load %arg20[%c64_49, %c0_50] : memref<288x256xf32, #tpu.memory_space<vmem>>, vector<16x256xf32>
    tpu.vector_store %arg20[%c64_49, %c0_50], %75 {strides = array<i32>} : memref<288x256xf32, #tpu.memory_space<vmem>>, vector<16x256xf32>,
    %c255_i32_51 = arith.constant 255 : i32
    %101 = tpu.dynamic_rotate %75 by %c255_i32_51 dim 1 : vector<16x256xf32>, i32 -> vector<16x256xf32>
    %102 = vector.extract_strided_slice %0 {offsets = [5, 0, 0], sizes = [1, 1, 256], strides = [1, 1, 1]} : vector<9x1x256xf32> to vector<1x1x256xf32>
    %103 = vector.shape_cast %102 : vector<1x1x256xf32> to vector<1x256xf32>
    %104 = vector.broadcast %103 : vector<1x256xf32> to vector<16x256xf32>
    %105 = arith.mulf %101, %104 : vector<16x256xf32>
    %c80 = arith.constant 80 : index
    %c0_52 = arith.constant 0 : index
    %106 = vector.load %arg20[%c80, %c0_52] : memref<288x256xf32, #tpu.memory_space<vmem>>, vector<16x256xf32>
    tpu.vector_store %arg20[%c80, %c0_52], %105 {strides = array<i32>} : memref<288x256xf32, #tpu.memory_space<vmem>>, vector<16x256xf32>,
    %c241_i32_53 = arith.constant 241 : i32
    %107 = tpu.dynamic_rotate %75 by %c241_i32_53 dim 1 : vector<16x256xf32>, i32 -> vector<16x256xf32>
    %108 = vector.extract_strided_slice %0 {offsets = [6, 0, 0], sizes = [1, 1, 256], strides = [1, 1, 1]} : vector<9x1x256xf32> to vector<1x1x256xf32>
    %109 = vector.shape_cast %108 : vector<1x1x256xf32> to vector<1x256xf32>
    %110 = vector.broadcast %109 : vector<1x256xf32> to vector<16x256xf32>
    %111 = arith.mulf %107, %110 : vector<16x256xf32>
    %c96 = arith.constant 96 : index
    %c0_54 = arith.constant 0 : index
    %112 = vector.load %arg20[%c96, %c0_54] : memref<288x256xf32, #tpu.memory_space<vmem>>, vector<16x256xf32>
    tpu.vector_store %arg20[%c96, %c0_54], %111 {strides = array<i32>} : memref<288x256xf32, #tpu.memory_space<vmem>>, vector<16x256xf32>,
    %c240_i32_55 = arith.constant 240 : i32
    %113 = tpu.dynamic_rotate %75 by %c240_i32_55 dim 1 : vector<16x256xf32>, i32 -> vector<16x256xf32>
    %114 = vector.extract_strided_slice %0 {offsets = [7, 0, 0], sizes = [1, 1, 256], strides = [1, 1, 1]} : vector<9x1x256xf32> to vector<1x1x256xf32>
    %115 = vector.shape_cast %114 : vector<1x1x256xf32> to vector<1x256xf32>
    %116 = vector.broadcast %115 : vector<1x256xf32> to vector<16x256xf32>
    %117 = arith.mulf %113, %116 : vector<16x256xf32>
    %c112 = arith.constant 112 : index
    %c0_56 = arith.constant 0 : index
    %118 = vector.load %arg20[%c112, %c0_56] : memref<288x256xf32, #tpu.memory_space<vmem>>, vector<16x256xf32>
    tpu.vector_store %arg20[%c112, %c0_56], %117 {strides = array<i32>} : memref<288x256xf32, #tpu.memory_space<vmem>>, vector<16x256xf32>,
    %c239_i32_57 = arith.constant 239 : i32
    %119 = tpu.dynamic_rotate %75 by %c239_i32_57 dim 1 : vector<16x256xf32>, i32 -> vector<16x256xf32>
    %120 = vector.extract_strided_slice %0 {offsets = [8, 0, 0], sizes = [1, 1, 256], strides = [1, 1, 1]} : vector<9x1x256xf32> to vector<1x1x256xf32>
    %121 = vector.shape_cast %120 : vector<1x1x256xf32> to vector<1x256xf32>
    %122 = vector.broadcast %121 : vector<1x256xf32> to vector<16x256xf32>
    %123 = arith.mulf %119, %122 : vector<16x256xf32>
    %c128 = arith.constant 128 : index
    %c0_58 = arith.constant 0 : index
    %124 = vector.load %arg20[%c128, %c0_58] : memref<288x256xf32, #tpu.memory_space<vmem>>, vector<16x256xf32>
    tpu.vector_store %arg20[%c128, %c0_58], %123 {strides = array<i32>} : memref<288x256xf32, #tpu.memory_space<vmem>>, vector<16x256xf32>,
    %c0_59 = arith.constant 0 : index
    %c0_60 = arith.constant 0 : index
    %125 = vector.load %arg7[%c0_59, %c0_60] : memref<24x144xf32, #tpu.memory_space<vmem>>, vector<24x144xf32>
    %c0_61 = arith.constant 0 : index
    %c0_62 = arith.constant 0 : index
    %126 = vector.load %arg20[%c0_61, %c0_62] : memref<288x256xf32, #tpu.memory_space<vmem>>, vector<144x256xf32>
    %cst_63 = arith.constant dense<0.000000e+00> : vector<24x256xf32>
    %127 = tpu.matmul %125, %126, %cst_63 {dimension_numbers = #tpu.dot_dimension_numbers<[1], [0], [0], [1], [0, 0, 1, 1], [], []>} : vector<24x144xf32>, vector<144x256xf32>, vector<24x256xf32> -> vector<24x256xf32>
    %c0_64 = arith.constant 0 : index
    %c0_65 = arith.constant 0 : index
    %128 = vector.load %arg8[%c0_64, %c0_65] : memref<24x1xf32, #tpu.memory_space<vmem>>, vector<24x1xf32>
    %129 = vector.broadcast %128 : vector<24x1xf32> to vector<24x256xf32>
    %130 = arith.addf %127, %129 : vector<24x256xf32>
    %cst_66 = arith.constant 0.000000e+00 : f32
    %131 = vector.broadcast %cst_66 : f32 to vector<24x256xf32>
    %132 = arith.maximumf %130, %131 : vector<24x256xf32>
    %133 = vector.extract_strided_slice %132 {offsets = [0, 0], sizes = [8, 256], strides = [1, 1]} : vector<24x256xf32> to vector<8x256xf32>
    %c8_67 = arith.constant 8 : index
    %c0_68 = arith.constant 0 : index
    %134 = vector.load %arg22[%c8_67, %c0_68] : memref<32x256xf32, #tpu.memory_space<vmem>>, vector<8x256xf32>
    tpu.vector_store %arg22[%c8_67, %c0_68], %133 {strides = array<i32>} : memref<32x256xf32, #tpu.memory_space<vmem>>, vector<8x256xf32>,
    %135 = vector.extract_strided_slice %132 {offsets = [8, 0], sizes = [8, 256], strides = [1, 1]} : vector<24x256xf32> to vector<8x256xf32>
    %136 = vector.extract_strided_slice %132 {offsets = [16, 0], sizes = [8, 256], strides = [1, 1]} : vector<24x256xf32> to vector<8x256xf32>
    %c8_69 = arith.constant 8 : index
    %c0_70 = arith.constant 0 : index
    %137 = vector.load %arg23[%c8_69, %c0_70] : memref<32x256xf32, #tpu.memory_space<vmem>>, vector<8x256xf32>
    tpu.vector_store %arg23[%c8_69, %c0_70], %136 {strides = array<i32>} : memref<32x256xf32, #tpu.memory_space<vmem>>, vector<8x256xf32>,
    %138 = vector.extract_strided_slice %8 {offsets = [16, 0], sizes = [8, 256], strides = [1, 1]} : vector<32x256xf32> to vector<8x256xf32>
    %c0_71 = arith.constant 0 : index
    %c0_72 = arith.constant 0 : index
    %139 = vector.load %arg21[%c0_71, %c0_72] : memref<16x256xf32, #tpu.memory_space<vmem>>, vector<8x256xf32>
    tpu.vector_store %arg21[%c0_71, %c0_72], %138 {strides = array<i32>} : memref<16x256xf32, #tpu.memory_space<vmem>>, vector<8x256xf32>,
    %c8_73 = arith.constant 8 : index
    %c0_74 = arith.constant 0 : index
    %140 = vector.load %arg21[%c8_73, %c0_74] : memref<16x256xf32, #tpu.memory_space<vmem>>, vector<8x256xf32>
    tpu.vector_store %arg21[%c8_73, %c0_74], %135 {strides = array<i32>} : memref<16x256xf32, #tpu.memory_space<vmem>>, vector<8x256xf32>,
    %c0_75 = arith.constant 0 : index
    %c0_76 = arith.constant 0 : index
    %141 = vector.load %arg21[%c0_75, %c0_76] : memref<16x256xf32, #tpu.memory_space<vmem>>, vector<16x256xf32>
    %c17_i32_77 = arith.constant 17 : i32
    %142 = tpu.dynamic_rotate %141 by %c17_i32_77 dim 1 : vector<16x256xf32>, i32 -> vector<16x256xf32>
    %143 = vector.extract_strided_slice %0 {offsets = [0, 0, 0], sizes = [1, 1, 256], strides = [1, 1, 1]} : vector<9x1x256xf32> to vector<1x1x256xf32>
    %144 = vector.shape_cast %143 : vector<1x1x256xf32> to vector<1x256xf32>
    %145 = vector.broadcast %144 : vector<1x256xf32> to vector<16x256xf32>
    %146 = arith.mulf %142, %145 : vector<16x256xf32>
    %c0_78 = arith.constant 0 : index
    %c0_79 = arith.constant 0 : index
    %147 = vector.load %arg20[%c0_78, %c0_79] : memref<288x256xf32, #tpu.memory_space<vmem>>, vector<16x256xf32>
    tpu.vector_store %arg20[%c0_78, %c0_79], %146 {strides = array<i32>} : memref<288x256xf32, #tpu.memory_space<vmem>>, vector<16x256xf32>,
    %c16_i32_80 = arith.constant 16 : i32
    %148 = tpu.dynamic_rotate %141 by %c16_i32_80 dim 1 : vector<16x256xf32>, i32 -> vector<16x256xf32>
    %149 = vector.extract_strided_slice %0 {offsets = [1, 0, 0], sizes = [1, 1, 256], strides = [1, 1, 1]} : vector<9x1x256xf32> to vector<1x1x256xf32>
    %150 = vector.shape_cast %149 : vector<1x1x256xf32> to vector<1x256xf32>
    %151 = vector.broadcast %150 : vector<1x256xf32> to vector<16x256xf32>
    %152 = arith.mulf %148, %151 : vector<16x256xf32>
    %c16_81 = arith.constant 16 : index
    %c0_82 = arith.constant 0 : index
    %153 = vector.load %arg20[%c16_81, %c0_82] : memref<288x256xf32, #tpu.memory_space<vmem>>, vector<16x256xf32>
    tpu.vector_store %arg20[%c16_81, %c0_82], %152 {strides = array<i32>} : memref<288x256xf32, #tpu.memory_space<vmem>>, vector<16x256xf32>,
    %c15_i32_83 = arith.constant 15 : i32
    %154 = tpu.dynamic_rotate %141 by %c15_i32_83 dim 1 : vector<16x256xf32>, i32 -> vector<16x256xf32>
    %155 = vector.extract_strided_slice %0 {offsets = [2, 0, 0], sizes = [1, 1, 256], strides = [1, 1, 1]} : vector<9x1x256xf32> to vector<1x1x256xf32>
    %156 = vector.shape_cast %155 : vector<1x1x256xf32> to vector<1x256xf32>
    %157 = vector.broadcast %156 : vector<1x256xf32> to vector<16x256xf32>
    %158 = arith.mulf %154, %157 : vector<16x256xf32>
    %c32_84 = arith.constant 32 : index
    %c0_85 = arith.constant 0 : index
    %159 = vector.load %arg20[%c32_84, %c0_85] : memref<288x256xf32, #tpu.memory_space<vmem>>, vector<16x256xf32>
    tpu.vector_store %arg20[%c32_84, %c0_85], %158 {strides = array<i32>} : memref<288x256xf32, #tpu.memory_space<vmem>>, vector<16x256xf32>,
    %c1_i32_86 = arith.constant 1 : i32
    %160 = tpu.dynamic_rotate %141 by %c1_i32_86 dim 1 : vector<16x256xf32>, i32 -> vector<16x256xf32>
    %161 = vector.extract_strided_slice %0 {offsets = [3, 0, 0], sizes = [1, 1, 256], strides = [1, 1, 1]} : vector<9x1x256xf32> to vector<1x1x256xf32>
    %162 = vector.shape_cast %161 : vector<1x1x256xf32> to vector<1x256xf32>
    %163 = vector.broadcast %162 : vector<1x256xf32> to vector<16x256xf32>
    %164 = arith.mulf %160, %163 : vector<16x256xf32>
    %c48_87 = arith.constant 48 : index
    %c0_88 = arith.constant 0 : index
    %165 = vector.load %arg20[%c48_87, %c0_88] : memref<288x256xf32, #tpu.memory_space<vmem>>, vector<16x256xf32>
    tpu.vector_store %arg20[%c48_87, %c0_88], %164 {strides = array<i32>} : memref<288x256xf32, #tpu.memory_space<vmem>>, vector<16x256xf32>,
    %c64_89 = arith.constant 64 : index
    %c0_90 = arith.constant 0 : index
    %166 = vector.load %arg20[%c64_89, %c0_90] : memref<288x256xf32, #tpu.memory_space<vmem>>, vector<16x256xf32>
    tpu.vector_store %arg20[%c64_89, %c0_90], %141 {strides = array<i32>} : memref<288x256xf32, #tpu.memory_space<vmem>>, vector<16x256xf32>,
    %c255_i32_91 = arith.constant 255 : i32
    %167 = tpu.dynamic_rotate %141 by %c255_i32_91 dim 1 : vector<16x256xf32>, i32 -> vector<16x256xf32>
    %168 = vector.extract_strided_slice %0 {offsets = [5, 0, 0], sizes = [1, 1, 256], strides = [1, 1, 1]} : vector<9x1x256xf32> to vector<1x1x256xf32>
    %169 = vector.shape_cast %168 : vector<1x1x256xf32> to vector<1x256xf32>
    %170 = vector.broadcast %169 : vector<1x256xf32> to vector<16x256xf32>
    %171 = arith.mulf %167, %170 : vector<16x256xf32>
    %c80_92 = arith.constant 80 : index
    %c0_93 = arith.constant 0 : index
    %172 = vector.load %arg20[%c80_92, %c0_93] : memref<288x256xf32, #tpu.memory_space<vmem>>, vector<16x256xf32>
    tpu.vector_store %arg20[%c80_92, %c0_93], %171 {strides = array<i32>} : memref<288x256xf32, #tpu.memory_space<vmem>>, vector<16x256xf32>,
    %c241_i32_94 = arith.constant 241 : i32
    %173 = tpu.dynamic_rotate %141 by %c241_i32_94 dim 1 : vector<16x256xf32>, i32 -> vector<16x256xf32>
    %174 = vector.extract_strided_slice %0 {offsets = [6, 0, 0], sizes = [1, 1, 256], strides = [1, 1, 1]} : vector<9x1x256xf32> to vector<1x1x256xf32>
    %175 = vector.shape_cast %174 : vector<1x1x256xf32> to vector<1x256xf32>
    %176 = vector.broadcast %175 : vector<1x256xf32> to vector<16x256xf32>
    %177 = arith.mulf %173, %176 : vector<16x256xf32>
    %c96_95 = arith.constant 96 : index
    %c0_96 = arith.constant 0 : index
    %178 = vector.load %arg20[%c96_95, %c0_96] : memref<288x256xf32, #tpu.memory_space<vmem>>, vector<16x256xf32>
    tpu.vector_store %arg20[%c96_95, %c0_96], %177 {strides = array<i32>} : memref<288x256xf32, #tpu.memory_space<vmem>>, vector<16x256xf32>,
    %c240_i32_97 = arith.constant 240 : i32
    %179 = tpu.dynamic_rotate %141 by %c240_i32_97 dim 1 : vector<16x256xf32>, i32 -> vector<16x256xf32>
    %180 = vector.extract_strided_slice %0 {offsets = [7, 0, 0], sizes = [1, 1, 256], strides = [1, 1, 1]} : vector<9x1x256xf32> to vector<1x1x256xf32>
    %181 = vector.shape_cast %180 : vector<1x1x256xf32> to vector<1x256xf32>
    %182 = vector.broadcast %181 : vector<1x256xf32> to vector<16x256xf32>
    %183 = arith.mulf %179, %182 : vector<16x256xf32>
    %c112_98 = arith.constant 112 : index
    %c0_99 = arith.constant 0 : index
    %184 = vector.load %arg20[%c112_98, %c0_99] : memref<288x256xf32, #tpu.memory_space<vmem>>, vector<16x256xf32>
    tpu.vector_store %arg20[%c112_98, %c0_99], %183 {strides = array<i32>} : memref<288x256xf32, #tpu.memory_space<vmem>>, vector<16x256xf32>,
    %c239_i32_100 = arith.constant 239 : i32
    %185 = tpu.dynamic_rotate %141 by %c239_i32_100 dim 1 : vector<16x256xf32>, i32 -> vector<16x256xf32>
    %186 = vector.extract_strided_slice %0 {offsets = [8, 0, 0], sizes = [1, 1, 256], strides = [1, 1, 1]} : vector<9x1x256xf32> to vector<1x1x256xf32>
    %187 = vector.shape_cast %186 : vector<1x1x256xf32> to vector<1x256xf32>
    %188 = vector.broadcast %187 : vector<1x256xf32> to vector<16x256xf32>
    %189 = arith.mulf %185, %188 : vector<16x256xf32>
    %c128_101 = arith.constant 128 : index
    %c0_102 = arith.constant 0 : index
    %190 = vector.load %arg20[%c128_101, %c0_102] : memref<288x256xf32, #tpu.memory_space<vmem>>, vector<16x256xf32>
    tpu.vector_store %arg20[%c128_101, %c0_102], %189 {strides = array<i32>} : memref<288x256xf32, #tpu.memory_space<vmem>>, vector<16x256xf32>,
    %c0_103 = arith.constant 0 : index
    %c0_104 = arith.constant 0 : index
    %191 = vector.load %arg9[%c0_103, %c0_104] : memref<24x144xf32, #tpu.memory_space<vmem>>, vector<24x144xf32>
    %c0_105 = arith.constant 0 : index
    %c0_106 = arith.constant 0 : index
    %192 = vector.load %arg20[%c0_105, %c0_106] : memref<288x256xf32, #tpu.memory_space<vmem>>, vector<144x256xf32>
    %cst_107 = arith.constant dense<0.000000e+00> : vector<24x256xf32>
    %193 = tpu.matmul %191, %192, %cst_107 {dimension_numbers = #tpu.dot_dimension_numbers<[1], [0], [0], [1], [0, 0, 1, 1], [], []>} : vector<24x144xf32>, vector<144x256xf32>, vector<24x256xf32> -> vector<24x256xf32>
    %c0_108 = arith.constant 0 : index
    %c0_109 = arith.constant 0 : index
    %194 = vector.load %arg10[%c0_108, %c0_109] : memref<24x1xf32, #tpu.memory_space<vmem>>, vector<24x1xf32>
    %195 = vector.broadcast %194 : vector<24x1xf32> to vector<24x256xf32>
    %196 = arith.addf %193, %195 : vector<24x256xf32>
    %cst_110 = arith.constant 0.000000e+00 : f32
    %197 = vector.broadcast %cst_110 : f32 to vector<24x256xf32>
    %198 = arith.maximumf %196, %197 : vector<24x256xf32>
    %199 = vector.extract_strided_slice %198 {offsets = [0, 0], sizes = [8, 256], strides = [1, 1]} : vector<24x256xf32> to vector<8x256xf32>
    %c16_111 = arith.constant 16 : index
    %c0_112 = arith.constant 0 : index
    %200 = vector.load %arg22[%c16_111, %c0_112] : memref<32x256xf32, #tpu.memory_space<vmem>>, vector<8x256xf32>
    tpu.vector_store %arg22[%c16_111, %c0_112], %199 {strides = array<i32>} : memref<32x256xf32, #tpu.memory_space<vmem>>, vector<8x256xf32>,
    %201 = vector.extract_strided_slice %198 {offsets = [8, 0], sizes = [8, 256], strides = [1, 1]} : vector<24x256xf32> to vector<8x256xf32>
    %202 = vector.extract_strided_slice %198 {offsets = [16, 0], sizes = [8, 256], strides = [1, 1]} : vector<24x256xf32> to vector<8x256xf32>
    %c16_113 = arith.constant 16 : index
    %c0_114 = arith.constant 0 : index
    %203 = vector.load %arg23[%c16_113, %c0_114] : memref<32x256xf32, #tpu.memory_space<vmem>>, vector<8x256xf32>
    tpu.vector_store %arg23[%c16_113, %c0_114], %202 {strides = array<i32>} : memref<32x256xf32, #tpu.memory_space<vmem>>, vector<8x256xf32>,
    %204 = vector.extract_strided_slice %8 {offsets = [24, 0], sizes = [8, 256], strides = [1, 1]} : vector<32x256xf32> to vector<8x256xf32>
    %c0_115 = arith.constant 0 : index
    %c0_116 = arith.constant 0 : index
    %205 = vector.load %arg21[%c0_115, %c0_116] : memref<16x256xf32, #tpu.memory_space<vmem>>, vector<8x256xf32>
    tpu.vector_store %arg21[%c0_115, %c0_116], %204 {strides = array<i32>} : memref<16x256xf32, #tpu.memory_space<vmem>>, vector<8x256xf32>,
    %c8_117 = arith.constant 8 : index
    %c0_118 = arith.constant 0 : index
    %206 = vector.load %arg21[%c8_117, %c0_118] : memref<16x256xf32, #tpu.memory_space<vmem>>, vector<8x256xf32>
    tpu.vector_store %arg21[%c8_117, %c0_118], %201 {strides = array<i32>} : memref<16x256xf32, #tpu.memory_space<vmem>>, vector<8x256xf32>,
    %c0_119 = arith.constant 0 : index
    %c0_120 = arith.constant 0 : index
    %207 = vector.load %arg21[%c0_119, %c0_120] : memref<16x256xf32, #tpu.memory_space<vmem>>, vector<16x256xf32>
    %c17_i32_121 = arith.constant 17 : i32
    %208 = tpu.dynamic_rotate %207 by %c17_i32_121 dim 1 : vector<16x256xf32>, i32 -> vector<16x256xf32>
    %209 = vector.extract_strided_slice %0 {offsets = [0, 0, 0], sizes = [1, 1, 256], strides = [1, 1, 1]} : vector<9x1x256xf32> to vector<1x1x256xf32>
    %210 = vector.shape_cast %209 : vector<1x1x256xf32> to vector<1x256xf32>
    %211 = vector.broadcast %210 : vector<1x256xf32> to vector<16x256xf32>
    %212 = arith.mulf %208, %211 : vector<16x256xf32>
    %c0_122 = arith.constant 0 : index
    %c0_123 = arith.constant 0 : index
    %213 = vector.load %arg20[%c0_122, %c0_123] : memref<288x256xf32, #tpu.memory_space<vmem>>, vector<16x256xf32>
    tpu.vector_store %arg20[%c0_122, %c0_123], %212 {strides = array<i32>} : memref<288x256xf32, #tpu.memory_space<vmem>>, vector<16x256xf32>,
    %c16_i32_124 = arith.constant 16 : i32
    %214 = tpu.dynamic_rotate %207 by %c16_i32_124 dim 1 : vector<16x256xf32>, i32 -> vector<16x256xf32>
    %215 = vector.extract_strided_slice %0 {offsets = [1, 0, 0], sizes = [1, 1, 256], strides = [1, 1, 1]} : vector<9x1x256xf32> to vector<1x1x256xf32>
    %216 = vector.shape_cast %215 : vector<1x1x256xf32> to vector<1x256xf32>
    %217 = vector.broadcast %216 : vector<1x256xf32> to vector<16x256xf32>
    %218 = arith.mulf %214, %217 : vector<16x256xf32>
    %c16_125 = arith.constant 16 : index
    %c0_126 = arith.constant 0 : index
    %219 = vector.load %arg20[%c16_125, %c0_126] : memref<288x256xf32, #tpu.memory_space<vmem>>, vector<16x256xf32>
    tpu.vector_store %arg20[%c16_125, %c0_126], %218 {strides = array<i32>} : memref<288x256xf32, #tpu.memory_space<vmem>>, vector<16x256xf32>,
    %c15_i32_127 = arith.constant 15 : i32
    %220 = tpu.dynamic_rotate %207 by %c15_i32_127 dim 1 : vector<16x256xf32>, i32 -> vector<16x256xf32>
    %221 = vector.extract_strided_slice %0 {offsets = [2, 0, 0], sizes = [1, 1, 256], strides = [1, 1, 1]} : vector<9x1x256xf32> to vector<1x1x256xf32>
    %222 = vector.shape_cast %221 : vector<1x1x256xf32> to vector<1x256xf32>
    %223 = vector.broadcast %222 : vector<1x256xf32> to vector<16x256xf32>
    %224 = arith.mulf %220, %223 : vector<16x256xf32>
    %c32_128 = arith.constant 32 : index
    %c0_129 = arith.constant 0 : index
    %225 = vector.load %arg20[%c32_128, %c0_129] : memref<288x256xf32, #tpu.memory_space<vmem>>, vector<16x256xf32>
    tpu.vector_store %arg20[%c32_128, %c0_129], %224 {strides = array<i32>} : memref<288x256xf32, #tpu.memory_space<vmem>>, vector<16x256xf32>,
    %c1_i32_130 = arith.constant 1 : i32
    %226 = tpu.dynamic_rotate %207 by %c1_i32_130 dim 1 : vector<16x256xf32>, i32 -> vector<16x256xf32>
    %227 = vector.extract_strided_slice %0 {offsets = [3, 0, 0], sizes = [1, 1, 256], strides = [1, 1, 1]} : vector<9x1x256xf32> to vector<1x1x256xf32>
    %228 = vector.shape_cast %227 : vector<1x1x256xf32> to vector<1x256xf32>
    %229 = vector.broadcast %228 : vector<1x256xf32> to vector<16x256xf32>
    %230 = arith.mulf %226, %229 : vector<16x256xf32>
    %c48_131 = arith.constant 48 : index
    %c0_132 = arith.constant 0 : index
    %231 = vector.load %arg20[%c48_131, %c0_132] : memref<288x256xf32, #tpu.memory_space<vmem>>, vector<16x256xf32>
    tpu.vector_store %arg20[%c48_131, %c0_132], %230 {strides = array<i32>} : memref<288x256xf32, #tpu.memory_space<vmem>>, vector<16x256xf32>,
    %c64_133 = arith.constant 64 : index
    %c0_134 = arith.constant 0 : index
    %232 = vector.load %arg20[%c64_133, %c0_134] : memref<288x256xf32, #tpu.memory_space<vmem>>, vector<16x256xf32>
    tpu.vector_store %arg20[%c64_133, %c0_134], %207 {strides = array<i32>} : memref<288x256xf32, #tpu.memory_space<vmem>>, vector<16x256xf32>,
    %c255_i32_135 = arith.constant 255 : i32
    %233 = tpu.dynamic_rotate %207 by %c255_i32_135 dim 1 : vector<16x256xf32>, i32 -> vector<16x256xf32>
    %234 = vector.extract_strided_slice %0 {offsets = [5, 0, 0], sizes = [1, 1, 256], strides = [1, 1, 1]} : vector<9x1x256xf32> to vector<1x1x256xf32>
    %235 = vector.shape_cast %234 : vector<1x1x256xf32> to vector<1x256xf32>
    %236 = vector.broadcast %235 : vector<1x256xf32> to vector<16x256xf32>
    %237 = arith.mulf %233, %236 : vector<16x256xf32>
    %c80_136 = arith.constant 80 : index
    %c0_137 = arith.constant 0 : index
    %238 = vector.load %arg20[%c80_136, %c0_137] : memref<288x256xf32, #tpu.memory_space<vmem>>, vector<16x256xf32>
    tpu.vector_store %arg20[%c80_136, %c0_137], %237 {strides = array<i32>} : memref<288x256xf32, #tpu.memory_space<vmem>>, vector<16x256xf32>,
    %c241_i32_138 = arith.constant 241 : i32
    %239 = tpu.dynamic_rotate %207 by %c241_i32_138 dim 1 : vector<16x256xf32>, i32 -> vector<16x256xf32>
    %240 = vector.extract_strided_slice %0 {offsets = [6, 0, 0], sizes = [1, 1, 256], strides = [1, 1, 1]} : vector<9x1x256xf32> to vector<1x1x256xf32>
    %241 = vector.shape_cast %240 : vector<1x1x256xf32> to vector<1x256xf32>
    %242 = vector.broadcast %241 : vector<1x256xf32> to vector<16x256xf32>
    %243 = arith.mulf %239, %242 : vector<16x256xf32>
    %c96_139 = arith.constant 96 : index
    %c0_140 = arith.constant 0 : index
    %244 = vector.load %arg20[%c96_139, %c0_140] : memref<288x256xf32, #tpu.memory_space<vmem>>, vector<16x256xf32>
    tpu.vector_store %arg20[%c96_139, %c0_140], %243 {strides = array<i32>} : memref<288x256xf32, #tpu.memory_space<vmem>>, vector<16x256xf32>,
    %c240_i32_141 = arith.constant 240 : i32
    %245 = tpu.dynamic_rotate %207 by %c240_i32_141 dim 1 : vector<16x256xf32>, i32 -> vector<16x256xf32>
    %246 = vector.extract_strided_slice %0 {offsets = [7, 0, 0], sizes = [1, 1, 256], strides = [1, 1, 1]} : vector<9x1x256xf32> to vector<1x1x256xf32>
    %247 = vector.shape_cast %246 : vector<1x1x256xf32> to vector<1x256xf32>
    %248 = vector.broadcast %247 : vector<1x256xf32> to vector<16x256xf32>
    %249 = arith.mulf %245, %248 : vector<16x256xf32>
    %c112_142 = arith.constant 112 : index
    %c0_143 = arith.constant 0 : index
    %250 = vector.load %arg20[%c112_142, %c0_143] : memref<288x256xf32, #tpu.memory_space<vmem>>, vector<16x256xf32>
    tpu.vector_store %arg20[%c112_142, %c0_143], %249 {strides = array<i32>} : memref<288x256xf32, #tpu.memory_space<vmem>>, vector<16x256xf32>,
    %c239_i32_144 = arith.constant 239 : i32
    %251 = tpu.dynamic_rotate %207 by %c239_i32_144 dim 1 : vector<16x256xf32>, i32 -> vector<16x256xf32>
    %252 = vector.extract_strided_slice %0 {offsets = [8, 0, 0], sizes = [1, 1, 256], strides = [1, 1, 1]} : vector<9x1x256xf32> to vector<1x1x256xf32>
    %253 = vector.shape_cast %252 : vector<1x1x256xf32> to vector<1x256xf32>
    %254 = vector.broadcast %253 : vector<1x256xf32> to vector<16x256xf32>
    %255 = arith.mulf %251, %254 : vector<16x256xf32>
    %c128_145 = arith.constant 128 : index
    %c0_146 = arith.constant 0 : index
    %256 = vector.load %arg20[%c128_145, %c0_146] : memref<288x256xf32, #tpu.memory_space<vmem>>, vector<16x256xf32>
    tpu.vector_store %arg20[%c128_145, %c0_146], %255 {strides = array<i32>} : memref<288x256xf32, #tpu.memory_space<vmem>>, vector<16x256xf32>,
    %c0_147 = arith.constant 0 : index
    %c0_148 = arith.constant 0 : index
    %257 = vector.load %arg11[%c0_147, %c0_148] : memref<16x144xf32, #tpu.memory_space<vmem>>, vector<16x144xf32>
    %c0_149 = arith.constant 0 : index
    %c0_150 = arith.constant 0 : index
    %258 = vector.load %arg20[%c0_149, %c0_150] : memref<288x256xf32, #tpu.memory_space<vmem>>, vector<144x256xf32>
    %cst_151 = arith.constant dense<0.000000e+00> : vector<16x256xf32>
    %259 = tpu.matmul %257, %258, %cst_151 {dimension_numbers = #tpu.dot_dimension_numbers<[1], [0], [0], [1], [0, 0, 1, 1], [], []>} : vector<16x144xf32>, vector<144x256xf32>, vector<16x256xf32> -> vector<16x256xf32>
    %c0_152 = arith.constant 0 : index
    %c0_153 = arith.constant 0 : index
    %260 = vector.load %arg12[%c0_152, %c0_153] : memref<16x1xf32, #tpu.memory_space<vmem>>, vector<16x1xf32>
    %261 = vector.broadcast %260 : vector<16x1xf32> to vector<16x256xf32>
    %262 = arith.addf %259, %261 : vector<16x256xf32>
    %cst_154 = arith.constant 0.000000e+00 : f32
    %263 = vector.broadcast %cst_154 : f32 to vector<16x256xf32>
    %264 = arith.maximumf %262, %263 : vector<16x256xf32>
    %265 = vector.extract_strided_slice %264 {offsets = [0, 0], sizes = [8, 256], strides = [1, 1]} : vector<16x256xf32> to vector<8x256xf32>
    %c24_155 = arith.constant 24 : index
    %c0_156 = arith.constant 0 : index
    %266 = vector.load %arg22[%c24_155, %c0_156] : memref<32x256xf32, #tpu.memory_space<vmem>>, vector<8x256xf32>
    tpu.vector_store %arg22[%c24_155, %c0_156], %265 {strides = array<i32>} : memref<32x256xf32, #tpu.memory_space<vmem>>, vector<8x256xf32>,
    %267 = vector.extract_strided_slice %264 {offsets = [8, 0], sizes = [8, 256], strides = [1, 1]} : vector<16x256xf32> to vector<8x256xf32>
    %c24_157 = arith.constant 24 : index
    %c0_158 = arith.constant 0 : index
    %268 = vector.load %arg23[%c24_157, %c0_158] : memref<32x256xf32, #tpu.memory_space<vmem>>, vector<8x256xf32>
    tpu.vector_store %arg23[%c24_157, %c0_158], %267 {strides = array<i32>} : memref<32x256xf32, #tpu.memory_space<vmem>>, vector<8x256xf32>,
    %c0_159 = arith.constant 0 : index
    %c0_160 = arith.constant 0 : index
    %269 = vector.load %arg23[%c0_159, %c0_160] : memref<32x256xf32, #tpu.memory_space<vmem>>, vector<32x256xf32>
    %cst_161 = arith.constant dense<0.000000e+00> : vector<32xf32>
    %270 = vector.multi_reduction <add>, %269, %cst_161 [1] : vector<32x256xf32> to vector<32xf32>
    %271 = vector.shape_cast %270 : vector<32xf32> to vector<32x1xf32>
    %cst_162 = arith.constant 2.560000e+02 : f32
    %272 = vector.broadcast %cst_162 : f32 to vector<32x1xf32>
    %273 = arith.divf %271, %272 : vector<32x1xf32>
    %c0_163 = arith.constant 0 : index
    %c0_164 = arith.constant 0 : index
    %274 = vector.load %arg13[%c0_163, %c0_164] : memref<8x32xf32, #tpu.memory_space<vmem>>, vector<8x32xf32>
    %cst_165 = arith.constant dense<0.000000e+00> : vector<8x1xf32>
    %275 = tpu.matmul %274, %273, %cst_165 {dimension_numbers = #tpu.dot_dimension_numbers<[1], [0], [0], [1], [0, 0, 1, 1], [], []>} : vector<8x32xf32>, vector<32x1xf32>, vector<8x1xf32> -> vector<8x1xf32>
    %c0_166 = arith.constant 0 : index
    %c0_167 = arith.constant 0 : index
    %276 = vector.load %arg14[%c0_166, %c0_167] : memref<8x1xf32, #tpu.memory_space<vmem>>, vector<8x1xf32>
    %277 = arith.addf %275, %276 : vector<8x1xf32>
    %cst_168 = arith.constant 0.000000e+00 : f32
    %278 = vector.broadcast %cst_168 : f32 to vector<8x1xf32>
    %279 = arith.maximumf %277, %278 : vector<8x1xf32>
    %c0_169 = arith.constant 0 : index
    %c0_170 = arith.constant 0 : index
    %280 = vector.load %arg15[%c0_169, %c0_170] : memref<32x8xf32, #tpu.memory_space<vmem>>, vector<32x8xf32>
    %cst_171 = arith.constant dense<0.000000e+00> : vector<32x1xf32>
    %281 = tpu.matmul %280, %279, %cst_171 {dimension_numbers = #tpu.dot_dimension_numbers<[1], [0], [0], [1], [0, 0, 1, 1], [], []>} : vector<32x8xf32>, vector<8x1xf32>, vector<32x1xf32> -> vector<32x1xf32>
    %c0_172 = arith.constant 0 : index
    %c0_173 = arith.constant 0 : index
    %282 = vector.load %arg16[%c0_172, %c0_173] : memref<32x1xf32, #tpu.memory_space<vmem>>, vector<32x1xf32>
    %283 = arith.addf %281, %282 : vector<32x1xf32>
    %cst_174 = arith.constant dense<0xFF800000> : vector<1xf32>
    %284 = vector.multi_reduction <maximumf>, %283, %cst_174 [0] : vector<32x1xf32> to vector<1xf32>
    %285 = vector.shape_cast %284 : vector<1xf32> to vector<1x1xf32>
    %286 = vector.broadcast %285 : vector<1x1xf32> to vector<32x1xf32>
    %287 = arith.subf %283, %286 : vector<32x1xf32>
    %288 = math.exp %287 : vector<32x1xf32>
    %cst_175 = arith.constant dense<0.000000e+00> : vector<1xf32>
    %289 = vector.multi_reduction <add>, %288, %cst_175 [0] : vector<32x1xf32> to vector<1xf32>
    %290 = vector.shape_cast %289 : vector<1xf32> to vector<1x1xf32>
    %291 = vector.broadcast %290 : vector<1x1xf32> to vector<32x1xf32>
    %292 = arith.divf %288, %291 : vector<32x1xf32>
    %c0_176 = arith.constant 0 : index
    %c0_177 = arith.constant 0 : index
    %293 = vector.load %arg22[%c0_176, %c0_177] : memref<32x256xf32, #tpu.memory_space<vmem>>, vector<32x256xf32>
    %294 = vector.broadcast %292 : vector<32x1xf32> to vector<32x256xf32>
    %295 = arith.mulf %293, %294 : vector<32x256xf32>
    %c17_i32_178 = arith.constant 17 : i32
    %296 = tpu.dynamic_rotate %295 by %c17_i32_178 dim 1 : vector<32x256xf32>, i32 -> vector<32x256xf32>
    %297 = vector.extract_strided_slice %0 {offsets = [0, 0, 0], sizes = [1, 1, 256], strides = [1, 1, 1]} : vector<9x1x256xf32> to vector<1x1x256xf32>
    %298 = vector.shape_cast %297 : vector<1x1x256xf32> to vector<1x256xf32>
    %299 = vector.broadcast %298 : vector<1x256xf32> to vector<32x256xf32>
    %300 = arith.mulf %296, %299 : vector<32x256xf32>
    %c0_179 = arith.constant 0 : index
    %c0_180 = arith.constant 0 : index
    %301 = vector.load %arg20[%c0_179, %c0_180] : memref<288x256xf32, #tpu.memory_space<vmem>>, vector<32x256xf32>
    tpu.vector_store %arg20[%c0_179, %c0_180], %300 {strides = array<i32>} : memref<288x256xf32, #tpu.memory_space<vmem>>, vector<32x256xf32>,
    %c16_i32_181 = arith.constant 16 : i32
    %302 = tpu.dynamic_rotate %295 by %c16_i32_181 dim 1 : vector<32x256xf32>, i32 -> vector<32x256xf32>
    %303 = vector.extract_strided_slice %0 {offsets = [1, 0, 0], sizes = [1, 1, 256], strides = [1, 1, 1]} : vector<9x1x256xf32> to vector<1x1x256xf32>
    %304 = vector.shape_cast %303 : vector<1x1x256xf32> to vector<1x256xf32>
    %305 = vector.broadcast %304 : vector<1x256xf32> to vector<32x256xf32>
    %306 = arith.mulf %302, %305 : vector<32x256xf32>
    %c32_182 = arith.constant 32 : index
    %c0_183 = arith.constant 0 : index
    %307 = vector.load %arg20[%c32_182, %c0_183] : memref<288x256xf32, #tpu.memory_space<vmem>>, vector<32x256xf32>
    tpu.vector_store %arg20[%c32_182, %c0_183], %306 {strides = array<i32>} : memref<288x256xf32, #tpu.memory_space<vmem>>, vector<32x256xf32>,
    %c15_i32_184 = arith.constant 15 : i32
    %308 = tpu.dynamic_rotate %295 by %c15_i32_184 dim 1 : vector<32x256xf32>, i32 -> vector<32x256xf32>
    %309 = vector.extract_strided_slice %0 {offsets = [2, 0, 0], sizes = [1, 1, 256], strides = [1, 1, 1]} : vector<9x1x256xf32> to vector<1x1x256xf32>
    %310 = vector.shape_cast %309 : vector<1x1x256xf32> to vector<1x256xf32>
    %311 = vector.broadcast %310 : vector<1x256xf32> to vector<32x256xf32>
    %312 = arith.mulf %308, %311 : vector<32x256xf32>
    %c64_185 = arith.constant 64 : index
    %c0_186 = arith.constant 0 : index
    %313 = vector.load %arg20[%c64_185, %c0_186] : memref<288x256xf32, #tpu.memory_space<vmem>>, vector<32x256xf32>
    tpu.vector_store %arg20[%c64_185, %c0_186], %312 {strides = array<i32>} : memref<288x256xf32, #tpu.memory_space<vmem>>, vector<32x256xf32>,
    %c1_i32_187 = arith.constant 1 : i32
    %314 = tpu.dynamic_rotate %295 by %c1_i32_187 dim 1 : vector<32x256xf32>, i32 -> vector<32x256xf32>
    %315 = vector.extract_strided_slice %0 {offsets = [3, 0, 0], sizes = [1, 1, 256], strides = [1, 1, 1]} : vector<9x1x256xf32> to vector<1x1x256xf32>
    %316 = vector.shape_cast %315 : vector<1x1x256xf32> to vector<1x256xf32>
    %317 = vector.broadcast %316 : vector<1x256xf32> to vector<32x256xf32>
    %318 = arith.mulf %314, %317 : vector<32x256xf32>
    %c96_188 = arith.constant 96 : index
    %c0_189 = arith.constant 0 : index
    %319 = vector.load %arg20[%c96_188, %c0_189] : memref<288x256xf32, #tpu.memory_space<vmem>>, vector<32x256xf32>
    tpu.vector_store %arg20[%c96_188, %c0_189], %318 {strides = array<i32>} : memref<288x256xf32, #tpu.memory_space<vmem>>, vector<32x256xf32>,
    %c128_190 = arith.constant 128 : index
    %c0_191 = arith.constant 0 : index
    %320 = vector.load %arg20[%c128_190, %c0_191] : memref<288x256xf32, #tpu.memory_space<vmem>>, vector<32x256xf32>
    tpu.vector_store %arg20[%c128_190, %c0_191], %295 {strides = array<i32>} : memref<288x256xf32, #tpu.memory_space<vmem>>, vector<32x256xf32>,
    %c255_i32_192 = arith.constant 255 : i32
    %321 = tpu.dynamic_rotate %295 by %c255_i32_192 dim 1 : vector<32x256xf32>, i32 -> vector<32x256xf32>
    %322 = vector.extract_strided_slice %0 {offsets = [5, 0, 0], sizes = [1, 1, 256], strides = [1, 1, 1]} : vector<9x1x256xf32> to vector<1x1x256xf32>
    %323 = vector.shape_cast %322 : vector<1x1x256xf32> to vector<1x256xf32>
    %324 = vector.broadcast %323 : vector<1x256xf32> to vector<32x256xf32>
    %325 = arith.mulf %321, %324 : vector<32x256xf32>
    %c160 = arith.constant 160 : index
    %c0_193 = arith.constant 0 : index
    %326 = vector.load %arg20[%c160, %c0_193] : memref<288x256xf32, #tpu.memory_space<vmem>>, vector<32x256xf32>
    tpu.vector_store %arg20[%c160, %c0_193], %325 {strides = array<i32>} : memref<288x256xf32, #tpu.memory_space<vmem>>, vector<32x256xf32>,
    %c241_i32_194 = arith.constant 241 : i32
    %327 = tpu.dynamic_rotate %295 by %c241_i32_194 dim 1 : vector<32x256xf32>, i32 -> vector<32x256xf32>
    %328 = vector.extract_strided_slice %0 {offsets = [6, 0, 0], sizes = [1, 1, 256], strides = [1, 1, 1]} : vector<9x1x256xf32> to vector<1x1x256xf32>
    %329 = vector.shape_cast %328 : vector<1x1x256xf32> to vector<1x256xf32>
    %330 = vector.broadcast %329 : vector<1x256xf32> to vector<32x256xf32>
    %331 = arith.mulf %327, %330 : vector<32x256xf32>
    %c192 = arith.constant 192 : index
    %c0_195 = arith.constant 0 : index
    %332 = vector.load %arg20[%c192, %c0_195] : memref<288x256xf32, #tpu.memory_space<vmem>>, vector<32x256xf32>
    tpu.vector_store %arg20[%c192, %c0_195], %331 {strides = array<i32>} : memref<288x256xf32, #tpu.memory_space<vmem>>, vector<32x256xf32>,
    %c240_i32_196 = arith.constant 240 : i32
    %333 = tpu.dynamic_rotate %295 by %c240_i32_196 dim 1 : vector<32x256xf32>, i32 -> vector<32x256xf32>
    %334 = vector.extract_strided_slice %0 {offsets = [7, 0, 0], sizes = [1, 1, 256], strides = [1, 1, 1]} : vector<9x1x256xf32> to vector<1x1x256xf32>
    %335 = vector.shape_cast %334 : vector<1x1x256xf32> to vector<1x256xf32>
    %336 = vector.broadcast %335 : vector<1x256xf32> to vector<32x256xf32>
    %337 = arith.mulf %333, %336 : vector<32x256xf32>
    %c224 = arith.constant 224 : index
    %c0_197 = arith.constant 0 : index
    %338 = vector.load %arg20[%c224, %c0_197] : memref<288x256xf32, #tpu.memory_space<vmem>>, vector<32x256xf32>
    tpu.vector_store %arg20[%c224, %c0_197], %337 {strides = array<i32>} : memref<288x256xf32, #tpu.memory_space<vmem>>, vector<32x256xf32>,
    %c239_i32_198 = arith.constant 239 : i32
    %339 = tpu.dynamic_rotate %295 by %c239_i32_198 dim 1 : vector<32x256xf32>, i32 -> vector<32x256xf32>
    %340 = vector.extract_strided_slice %0 {offsets = [8, 0, 0], sizes = [1, 1, 256], strides = [1, 1, 1]} : vector<9x1x256xf32> to vector<1x1x256xf32>
    %341 = vector.shape_cast %340 : vector<1x1x256xf32> to vector<1x256xf32>
    %342 = vector.broadcast %341 : vector<1x256xf32> to vector<32x256xf32>
    %343 = arith.mulf %339, %342 : vector<32x256xf32>
    %c256 = arith.constant 256 : index
    %c0_199 = arith.constant 0 : index
    %344 = vector.load %arg20[%c256, %c0_199] : memref<288x256xf32, #tpu.memory_space<vmem>>, vector<32x256xf32>
    tpu.vector_store %arg20[%c256, %c0_199], %343 {strides = array<i32>} : memref<288x256xf32, #tpu.memory_space<vmem>>, vector<32x256xf32>,
    %c0_200 = arith.constant 0 : index
    %c0_201 = arith.constant 0 : index
    %345 = vector.load %arg17[%c0_200, %c0_201] : memref<8x288xf32, #tpu.memory_space<vmem>>, vector<8x288xf32>
    %c0_202 = arith.constant 0 : index
    %c0_203 = arith.constant 0 : index
    %346 = vector.load %arg20[%c0_202, %c0_203] : memref<288x256xf32, #tpu.memory_space<vmem>>, vector<288x256xf32>
    %cst_204 = arith.constant dense<0.000000e+00> : vector<8x256xf32>
    %347 = tpu.matmul %345, %346, %cst_204 {dimension_numbers = #tpu.dot_dimension_numbers<[1], [0], [0], [1], [0, 0, 1, 1], [], []>} : vector<8x288xf32>, vector<288x256xf32>, vector<8x256xf32> -> vector<8x256xf32>
    %c0_205 = arith.constant 0 : index
    %c0_206 = arith.constant 0 : index
    %348 = vector.load %arg18[%c0_205, %c0_206] : memref<8x1xf32, #tpu.memory_space<vmem>>, vector<8x1xf32>
    %349 = vector.broadcast %348 : vector<8x1xf32> to vector<8x256xf32>
    %350 = arith.addf %347, %349 : vector<8x256xf32>
    %351 = arith.addf %350, %1 : vector<8x256xf32>
    %cst_207 = arith.constant 0.000000e+00 : f32
    %352 = vector.broadcast %cst_207 : f32 to vector<8x256xf32>
    %353 = arith.maximumf %351, %352 : vector<8x256xf32>
    %c0_208 = arith.constant 0 : index
    %c0_209 = arith.constant 0 : index
    %354 = vector.load %arg19[%c0_208, %c0_209] : memref<8x256xf32, #tpu.memory_space<vmem>>, vector<8x256xf32>
    tpu.vector_store %arg19[%c0_208, %c0_209], %353 {strides = array<i32>} : memref<8x256xf32, #tpu.memory_space<vmem>>, vector<8x256xf32>,
    return
  }
  func.func @transform_0(%arg0: i32) -> (i32, i32) {
    %c0_i32 = arith.constant 0 : i32
    %c0_i32_0 = arith.constant 0 : i32
    return %c0_i32, %arg0 : i32, i32
  }
  func.func @transform_1(%arg0: i32) -> (i32, i32, i32) {
    %c0_i32 = arith.constant 0 : i32
    %c0_i32_0 = arith.constant 0 : i32
    %c0_i32_1 = arith.constant 0 : i32
    %c0_i32_2 = arith.constant 0 : i32
    return %c0_i32, %c0_i32_0, %c0_i32_1 : i32, i32, i32
  }
  func.func @transform_2(%arg0: i32) -> (i32, i32) {
    %c0_i32 = arith.constant 0 : i32
    %c0_i32_0 = arith.constant 0 : i32
    %c0_i32_1 = arith.constant 0 : i32
    return %c0_i32, %c0_i32_0 : i32, i32
  }
  func.func @transform_3(%arg0: i32) -> (i32, i32) {
    %c0_i32 = arith.constant 0 : i32
    %c0_i32_0 = arith.constant 0 : i32
    %c0_i32_1 = arith.constant 0 : i32
    return %c0_i32, %c0_i32_0 : i32, i32
  }
  func.func @transform_4(%arg0: i32) -> (i32, i32) {
    %c0_i32 = arith.constant 0 : i32
    %c0_i32_0 = arith.constant 0 : i32
    %c0_i32_1 = arith.constant 0 : i32
    return %c0_i32, %c0_i32_0 : i32, i32
  }
  func.func @transform_5(%arg0: i32) -> (i32, i32) {
    %c0_i32 = arith.constant 0 : i32
    %c0_i32_0 = arith.constant 0 : i32
    %c0_i32_1 = arith.constant 0 : i32
    return %c0_i32, %c0_i32_0 : i32, i32
  }
  func.func @transform_6(%arg0: i32) -> (i32, i32) {
    %c0_i32 = arith.constant 0 : i32
    %c0_i32_0 = arith.constant 0 : i32
    %c0_i32_1 = arith.constant 0 : i32
    return %c0_i32, %c0_i32_0 : i32, i32
  }
  func.func @transform_7(%arg0: i32) -> (i32, i32) {
    %c0_i32 = arith.constant 0 : i32
    %c0_i32_0 = arith.constant 0 : i32
    %c0_i32_1 = arith.constant 0 : i32
    return %c0_i32, %c0_i32_0 : i32, i32
  }
  func.func @transform_8(%arg0: i32) -> (i32, i32) {
    %c0_i32 = arith.constant 0 : i32
    %c0_i32_0 = arith.constant 0 : i32
    %c0_i32_1 = arith.constant 0 : i32
    return %c0_i32, %c0_i32_0 : i32, i32
  }
  func.func @transform_9(%arg0: i32) -> (i32, i32) {
    %c0_i32 = arith.constant 0 : i32
    %c0_i32_0 = arith.constant 0 : i32
    %c0_i32_1 = arith.constant 0 : i32
    return %c0_i32, %c0_i32_0 : i32, i32
  }
  func.func @transform_10(%arg0: i32) -> (i32, i32) {
    %c0_i32 = arith.constant 0 : i32
    %c0_i32_0 = arith.constant 0 : i32
    %c0_i32_1 = arith.constant 0 : i32
    return %c0_i32, %c0_i32_0 : i32, i32
  }
  func.func @transform_11(%arg0: i32) -> (i32, i32) {
    %c0_i32 = arith.constant 0 : i32
    %c0_i32_0 = arith.constant 0 : i32
    %c0_i32_1 = arith.constant 0 : i32
    return %c0_i32, %c0_i32_0 : i32, i32
  }
  func.func @transform_12(%arg0: i32) -> (i32, i32) {
    %c0_i32 = arith.constant 0 : i32
    %c0_i32_0 = arith.constant 0 : i32
    %c0_i32_1 = arith.constant 0 : i32
    return %c0_i32, %c0_i32_0 : i32, i32
  }
  func.func @transform_13(%arg0: i32) -> (i32, i32) {
    %c0_i32 = arith.constant 0 : i32
    %c0_i32_0 = arith.constant 0 : i32
    %c0_i32_1 = arith.constant 0 : i32
    return %c0_i32, %c0_i32_0 : i32, i32
  }
  func.func @transform_14(%arg0: i32) -> (i32, i32) {
    %c0_i32 = arith.constant 0 : i32
    %c0_i32_0 = arith.constant 0 : i32
    %c0_i32_1 = arith.constant 0 : i32
    return %c0_i32, %c0_i32_0 : i32, i32
  }
  func.func @transform_15(%arg0: i32) -> (i32, i32) {
    %c0_i32 = arith.constant 0 : i32
    %c0_i32_0 = arith.constant 0 : i32
    %c0_i32_1 = arith.constant 0 : i32
    return %c0_i32, %c0_i32_0 : i32, i32
  }
  func.func @transform_16(%arg0: i32) -> (i32, i32) {
    %c0_i32 = arith.constant 0 : i32
    %c0_i32_0 = arith.constant 0 : i32
    %c0_i32_1 = arith.constant 0 : i32
    return %c0_i32, %c0_i32_0 : i32, i32
  }
  func.func @transform_17(%arg0: i32) -> (i32, i32) {
    %c0_i32 = arith.constant 0 : i32
    %c0_i32_0 = arith.constant 0 : i32
    %c0_i32_1 = arith.constant 0 : i32
    return %c0_i32, %c0_i32_0 : i32, i32
  }
  func.func @transform_18(%arg0: i32) -> (i32, i32) {
    %c0_i32 = arith.constant 0 : i32
    %c0_i32_0 = arith.constant 0 : i32
    return %c0_i32, %arg0 : i32, i32
  }
}

</mosaic_0001>

<bundles_post_ra>
// kernel: tpu_custom_call.1
= control target key start
LH: loop header
LB: loop body
LE: loop exit
PB: predicated region body
PF: predicated region fallthrough
CT: control target
= control target key end

     0   :  { %s4660_s0 = inlined_call_operand.vmem [shape: f32[8,512], index: 0, kind: input, shape index: {}]   ;;  %s4661_s1 = inlined_call_operand.vmem [shape: f32[9,1,256], index: 1, kind: input, shape index: {}]   ;;  %s4662_s2 = inlined_call_operand.vmem [shape: f32[32,8], index: 2, kind: input, shape index: {}]   ;;  %s4663_s3 = inlined_call_operand.vmem [shape: f32[32,1], index: 3, kind: input, shape index: {}]   ;;  %s4664_s4 = inlined_call_operand.vmem [shape: f32[24,72], index: 4, kind: input, shape index: {}]   ;;  %s4665_s5 = inlined_call_operand.vmem [shape: f32[24,1], index: 5, kind: input, shape index: {}]   ;;  %s4666_s6 = inlined_call_operand.vmem [shape: f32[24,144], index: 6, kind: input, shape index: {}]   ;;  %s4667_s7 = inlined_call_operand.vmem [shape: f32[24,1], index: 7, kind: input, shape index: {}]   ;;  %s4668_s8 = inlined_call_operand.vmem [shape: f32[24,144], index: 8, kind: input, shape index: {}]   ;;  %s4669_s9 = inlined_call_operand.vmem [shape: f32[24,1], index: 9, kind: input, shape index: {}]   ;;  %s4670_s10 = inlined_call_operand.vmem [shape: f32[16,144], index: 10, kind: input, shape index: {}]   ;;  %s4671_s11 = inlined_call_operand.vmem [shape: f32[16,1], index: 11, kind: input, shape index: {}]   ;;  %s4672_s12 = inlined_call_operand.vmem [shape: f32[8,32], index: 12, kind: input, shape index: {}]   ;;  %s4673_s13 = inlined_call_operand.vmem [shape: f32[8,1], index: 13, kind: input, shape index: {}]   ;;  %s4674_s14 = inlined_call_operand.vmem [shape: f32[32,8], index: 14, kind: input, shape index: {}]   ;;  %s4675_s15 = inlined_call_operand.vmem [shape: f32[32,1], index: 15, kind: input, shape index: {}]   ;;  %s4676_s16 = inlined_call_operand.vmem [shape: f32[8,288], index: 16, kind: input, shape index: {}]   ;;  %s4677_s17 = inlined_call_operand.vmem [shape: f32[8,1], index: 17, kind: input, shape index: {}]   ;;  %s4678_s18 = inlined_call_operand.hbm [shape: f32[8,512], index: 18, kind: output, shape index: {}]  }
   0x1   :  { %4709 = sst [smem:[#allocation17_spill]] %s4660_s0 }
   0x2   :  { %4710 = sst [smem:[#allocation18_spill]] %s4661_s1 }
   0x3   :  { %4711 = sst [smem:[#allocation19_spill]] %s4662_s2 }
   0x4   :  { %4712 = sst [smem:[#allocation20_spill]] %s4663_s3 }
   0x5   :  { %4713 = sst [smem:[#allocation21_spill]] %s4664_s4 }
   0x6   :  { %4714 = sst [smem:[#allocation22_spill]] %s4678_s18 }
   0x7   :  { %23 = vsyncpa [#allocation7], 0 }
   0x8   :  { %25 = vsyncpa [#allocation7 + $0x1], 0  ;;  %s3248_s27 = smov 0   ;;  %s3250_s28 = smov 0  }
   0x9   :  { %s3252_s29 = smov 0   ;;  %s3254_s30 = smov 0  }
   0xa LB: > { %4715 = sst [smem:[#allocation9_spill]] %s3127_s27  ;;  %s3269_s0 = sadd.s32 4294967295, %s3139_s30   ;;  %s3139_s30 = sphi %s3254_s30, %s4744_s30   ;;  %s3135_s29 = sphi %s3252_s29, %s4746_s29   ;;  %s3131_s28 = sphi %s3250_s28, %s4748_s28   ;;  %s3127_s27 = sphi %s3248_s27, %s4747_s27  }
   0xb   : > { %4716 = sst [smem:[#allocation10_spill]] %s3135_s29  ;;  %s2952_s19 = sadd.s32 4294967294, %s3139_s30  }
   0xc   : > { %4717 = sst [smem:[#allocation11_spill]] %s3139_s30  ;;  %s3273_s1 = sadd.s32 1, %s3139_s30  }
   0xd   : > { %4718 = sst [smem:[#allocation12_spill]] %s3269_s0  ;;  %s421_s20 = sadd.s32 1, %s3135_s29 }
   0xe   : > { %4719 = sst [smem:[#allocation13_spill]] %s3273_s1  ;;  %s418_s21 = ssub.s32 %s3139_s30, %s3273_s1 }
   0xf   : > { %p431_p0 = scmp.ne.s32.totalorder %s3135_s29, %s3131_s28  ;;  %p419_p1 = scmp.eq.s32.totalorder %s418_s21, 0 }
  0x10   : > { %p432_p2 = scmp.eq.s32.totalorder %s3269_s0, 1  ;;  %p437_p3 = scmp.ne.s32.totalorder %s3131_s28, %s3127_s27 }
  0x11   : > { %p438_p4 = scmp.eq.s32.totalorder %s2952_s19, 1  ;;  %p2955_p7 = scmp.ge.s32.totalorder %s3139_s30, 1 }
  0x12   : > { %s3284_s22 = scalar_select %p419_p1, %s3135_s29, %s421_s20  }
  0x13   : > { %p3286_p5 = por %p432_p2, %p431_p0  ;;  %p3290_p6 = por %p438_p4, %p437_p3 }
  0x14   : > { %4720 = sst [smem:[#allocation14_spill]] %s3284_s22  ;;  %p516_p8 = scmp.lt.s32.totalorder %s3139_s30, 3 }
  0x15   : > { %s4721_s2 = scalar_select %p3286_p5, 1, 0 }
  0x16   : > { %s4723_s23 = scalar_select %p3290_p6, 1, 0 }
  0x17   : > { %4722 = sst [smem:[#allocation15_spill]] %s4721_s2  ;;  %p517_p9 = pnand %p2955_p7, %p516_p8 }
  0x18   : > { %4724 = sst [smem:[#allocation16_spill]] %s4723_s23  ;;  %s2957_s24 = sshll.u32 (!%p517_p9), %s3269_s0, 1 }
  0x19   : > { %520 = sbr.rel (%p517_p9) target bundleno = 2865 (0xb31), region = 92  ;;  %s4725_s3 = sld [smem:[#allocation20_spill]] (!%p517_p9) }
  0x1a   : > { %p571_p10 = scmp.lt.s32.totalorder (!%p517_p9), %s2957_s24, 3  ;;  %s4726_s22 = sld [smem:[#allocation17_spill]] (!%p517_p9) }
  0x1b   : > { %s4727_s1 = sld [smem:[#allocation19_spill]] (!%p517_p9)  ;;  %s4697_s23 = smov (!%p517_p9), 113  }
  0x1c   : > { %s4689_s20 = smov (!%p517_p9), 127   ;;  %s4687_s21 = smov (!%p517_p9), 1  }
  0x1d   : > { %s4691_s25 = smov (!%p517_p9), 15   ;;  %s4693_s26 = smov (!%p517_p9), 16  }
  0x1e   : > { %v3141_v1 = vmov 0.0   ;;  %v3142_v2 = vmov 0   ;;  %s4750_s24 = smov (!%p571_p10, %s2957_s24), 3  ;;  %vm615_vm0 = vcmask 64512   ;;  %v927_v17 = vld [vmem:[%s4665_s5 + $0x8] sm:$0xff]  ;;  %v729_v20 = vlaneseq  ;;  %s4729_s4 = sld [smem:[#allocation21_spill]] }
  0x1f   : > { %v591_v0 = vld [vmem:[%s4725_s3] sm:$0xff]  ;;  %692 = vmatprep.mubr.f32.mxu0 %v3141_v1  ;;  %3065 = vset.pattern.permute.xlu0 %v3142_v2  ;;  %s2958_s19 = sshll.u32 %s4750_s24, 3  ;;  %s4695_s24 = smov 17   ;;  %v592_v16 = vld [vmem:[%s4725_s3 + $0x8] sm:$0xff]  ;;  %vm944_vm9 = vcmask 588800   ;;  %vm1279_vm10 = vcmask 130048  }
  0x20   : > { %597 = vperm.xlu0 %3065, %v591_v0   ;;  %3066 = vset.pattern.permute.xlu1 %v3142_v2  ;;  %s3304_s29 = scalar_lea.vmem %s4726_s22, %s2958_s19  ;;  %s4699_s22 = smov 112   ;;  %v736_v22 = vshrl.u32 %v729_v20, 7  ;;  %v3370_v24 = vand.u32 127, %v729_v20  ;;  %vm3151_vm11 = vmmov 0   ;;  %vm2058_vm12 = vcmask 261120  }
  0x21   : > { %v586_v3 = vld [vmem:[%s3304_s29 + $0x8] sm:$0xff]  ;;  %v585_v4 = vld [vmem:[%s3304_s29] sm:$0xff]  ;;  %s4685_s19 = smov 111   ;;  %v589_v14 = vld [vmem:[%s4727_s1 + $0x10] sm:$0xff]  ;;  %vm2238_vm13 = vcmask 7168   ;;  %s567_s27 = sand.u32 1, %s3131_s28  }
  0x22   : > { %v587_v5 = vld [vmem:[%s4727_s1] sm:$0xff]  ;;  %658 = vmatprep.subr.mxu0 %v586_v3  ;;  %v588_v6 = vld [vmem:[%s4727_s1 + $0x8] sm:$0xff]  ;;  %v590_v15 = vld [vmem:[%s4727_s1 + $0x18] sm:$0xff]  ;;  %v3375_v26 = vsub.s32 0, %v736_v22  ;;  %v3377_v29 = vsub.s32 1, %v736_v22  ;;  %vm865_vm1 = vcmp.lt.s32.totalorder %v3370_v24, 112 }
  0x23   : > { %659 = vmatpush1.msra.mxu0 %v585_v4  ;;  %vm887_vm2 = vcmp.lt.s32.totalorder %v3370_v24, 111  ;;  %vm843_vm3 = vcmp.lt.s32.totalorder %v3370_v24, 113  ;;  %vm821_vm4 = vcmp.lt.s32.totalorder %v3370_v24, 127  ;;  %vm797_vm5 = vcmp.lt.s32.totalorder %v3370_v24, 1  ;;  %s4736_s1 = smov 111  }
  0x24   : > { %2959 = vmatmul.mubr.msk.f32.vlgmr.msra.gmra.mxu0 %vm615_vm0, %v587_v5  ;;  %vm775_vm6 = vcmp.lt.s32.totalorder %v3370_v24, 15  ;;  %vm753_vm7 = vcmp.lt.s32.totalorder %v3370_v24, 16  ;;  %vm731_vm8 = vcmp.lt.s32.totalorder %v3370_v24, 17 }
  0x25   : > { %698 = vmatprep.mubr.f32.mxu0 %v3141_v1 }
  0x28   : > { %2960 = vmatmul.mubr.msk.f32.gmra.mxu0 %vm615_vm0, %v588_v6 }
  0x29   : > { %704 = vmatprep.mubr.f32.mxu0 %v3141_v1 }
  0x2c   : > { %2961 = vmatmul.mubr.msk.f32.gmra.mxu0 %vm615_vm0, %v589_v14 }
  0x2d   : > { %710 = vmatprep.mubr.f32.mxu0 %v3141_v1 }
  0x30   : > { %2962 = vmatmul.mubr.msk.f32.gmra.mxu0 %vm615_vm0, %v590_v15 }
  0x31   : > { %1018 = vmatprep.mubr.f32.mxu0 %v3141_v1 }
  0x9b   : > { %v598_v7 = vpop.permute.xlu0 %597 }
  0xe4   : > { %v694_v8 = vpop.f32.mrf.mxu0 }
  0xe5   : > { %v695_v9 = vadd.f32 %v694_v8, %v598_v7 }
  0xe6   : > { %v696_v10 = vpop.f32.mrf.mxu0 }
  0xe7   : > { %v3318_v11 = vmax.f32 %v695_v9, 0.0  ;;  %v697_v12 = vadd.f32 %v696_v10, %v598_v7 }
  0xe9   : > { %861 = vrot.lane.b32.xlu1 %v3318_v11, %s4699_s22  ;;  %883 = vrot.lane.b32.xlu0 %v3318_v11, %s4685_s19  ;;  %v3324_v13 = vmax.f32 %v697_v12, 0.0 }
  0xed   : > { %839 = vrot.lane.b32.xlu1 %v3318_v11, %s4697_s23  ;;  %863 = vrot.lane.b32.xlu0 %v3324_v13, %s4699_s22 }
  0xf1   : > { %817 = vrot.lane.b32.xlu1 %v3318_v11, %s4689_s20  ;;  %841 = vrot.lane.b32.xlu0 %v3324_v13, %s4697_s23  ;;  %s4728_s23 = sld [smem:[#allocation18_spill]] }
  0xf5   : > { %885 = vrot.lane.b32.xlu1 %v3324_v13, %s4685_s19  ;;  %819 = vrot.lane.b32.xlu0 %v3324_v13, %s4689_s20  ;;  %s4730_s19 = smov 113   ;;  %s4731_s20 = smov 127  }
  0xf7   : > { %v584_v25 = vld [vmem:[%s4728_s23 + $0x10] sm:$0x3]  ;;  %v583_v30 = vld [vmem:[%s4728_s23 + $0xe] sm:$0x3]  ;;  %v582_v31 = vld [vmem:[%s4728_s23 + $0xc] sm:$0x3] }
  0xf8   : > { %v3388_v32 = vrot.slane %v584_v25, %v3375_v26  ;;  %v3391_v33 = vrot.slane %v584_v25, %v3377_v29  ;;  %v3394_v34 = vrot.slane %v583_v30, %v3375_v26  ;;  %v3398_v37 = vrot.slane %v583_v30, %v3377_v29  ;;  %v581_v41 = vld [vmem:[%s4728_s23 + $0xa] sm:$0x3]  ;;  %v580_v56 = vld [vmem:[%s4728_s23 + $0x6] sm:$0x3]  ;;  %v579_v60 = vld [vmem:[%s4728_s23 + $0x4] sm:$0x3] }
  0xf9   : > { %793 = vrot.lane.b32.xlu1 %v3318_v11, %s4687_s21  ;;  %795 = vrot.lane.b32.xlu0 %v3324_v13, %s4687_s21  ;;  %v3410_v42 = vrot.slane %v582_v31, %v3377_v29  ;;  %v3418_v46 = vrot.slane %v582_v31, %v3375_v26  ;;  %v3426_v52 = vrot.slane %v581_v41, %v3377_v29  ;;  %v578_v5 = vld [vmem:[%s4728_s23 + $0x2] sm:$0x3]  ;;  %v577_v10 = vld [vmem:[%s4728_s23] sm:$0x3]  ;;  %s4732_s21 = smov 1   ;;  %s2956_s23 = sshll.u32 %s567_s27, 4 }
  0xfa   : > { %v3430_v54 = vrot.slane %v581_v41, %v3375_v26  ;;  %v3448_v0 = vrot.slane %v580_v56, %v3377_v29  ;;  %v3452_v3 = vrot.slane %v580_v56, %v3375_v26  ;;  %v3463_v7 = vrot.slane %v579_v60, %v3377_v29  ;;  %s569_s2 = scalar_lea.vmem [#allocation6], %s2956_s23 }
  0xfb   : > { %v3466_v8 = vrot.slane %v579_v60, %v3375_v26  ;;  %v3492_v22 = vrot.slane %v577_v10, %v3375_v26 }
  0xfd   : > { %771 = vrot.lane.b32.xlu1 %v3318_v11, %s4691_s25  ;;  %773 = vrot.lane.b32.xlu0 %v3324_v13, %s4691_s25  ;;  %s4733_s25 = smov 15  }
 0x101   : > { %749 = vrot.lane.b32.xlu1 %v3318_v11, %s4693_s26  ;;  %751 = vrot.lane.b32.xlu0 %v3324_v13, %s4693_s26  ;;  %s4734_s26 = smov 16  }
 0x105   : > { %725 = vrot.lane.b32.xlu1 %v3318_v11, %s4695_s24  ;;  %727 = vrot.lane.b32.xlu0 %v3324_v13, %s4695_s24  ;;  %s4735_s24 = smov 17  }
 0x109   : > { %602 = vperm.xlu0 %3065, %v592_v16   ;;  %936 = vperm.xlu1 %3066, %v927_v17   ;;  %v3478_v17 = vrot.slane %v578_v5, %v3377_v29 }
 0x15b   : > { %v862_v18 = vpop.permute.xlu1 %861  ;;  %v884_v19 = vpop.permute.xlu0 %883 }
 0x15f   : > { %v840_v21 = vpop.permute.xlu1 %839  ;;  %v864_v23 = vpop.permute.xlu0 %863 }
 0x160   : > { %v867_v38 = vsel %vm865_vm1, %v864_v23, %v862_v18  ;;  %v866_v43 = vsel %vm865_vm1, %v862_v18, %v864_v23  ;;  %v3495_v23 = vrot.slane %v577_v10, %v3377_v29 }
 0x161   : > { %v880_v51 = vmul.f32 %v3398_v37, %v867_v38  ;;  %v879_v53 = vmul.f32 %v3394_v34, %v866_v43  ;;  %v906_v38 = vld [vmem:[%s4729_s4 + $0x8] sm:$0xff] }
 0x163   : > { %v818_v27 = vpop.permute.xlu1 %817  ;;  %v842_v28 = vpop.permute.xlu0 %841 }
 0x164   : > { %v845_v47 = vsel %vm843_vm3, %v842_v28, %v840_v21  ;;  %v844_v48 = vsel %vm843_vm3, %v840_v21, %v842_v28 }
 0x165   : > { %v858_v58 = vmul.f32 %v3410_v42, %v845_v47  ;;  %v857_v59 = vmul.f32 %v3418_v46, %v844_v48 }
 0x167   : > { %v886_v35 = vpop.permute.xlu1 %885  ;;  %v820_v36 = vpop.permute.xlu0 %819 }
 0x168   : > { %v888_v39 = vsel %vm887_vm2, %v884_v19, %v886_v35  ;;  %v889_v40 = vsel %vm887_vm2, %v886_v35, %v884_v19  ;;  %v823_v55 = vsel %vm821_vm4, %v820_v36, %v818_v27  ;;  %v822_v57 = vsel %vm821_vm4, %v818_v27, %v820_v36  ;;  %v905_v36 = vld [vmem:[%s4729_s4] sm:$0xff] }
 0x169   : > { %v901_v44 = vmul.f32 %v3388_v32, %v888_v39  ;;  %v902_v45 = vmul.f32 %v3391_v33, %v889_v40  ;;  %v836_v63 = vmul.f32 %v3426_v52, %v823_v55  ;;  %v835_v2 = vmul.f32 %v3430_v54, %v822_v57  ;;  %v700_v39 = vpop.f32.mrf.mxu0 }
 0x16a   : > { %v3482_v19 = vrot.slane %v578_v5, %v3375_v26  ;;  %v593_v5 = vld [vmem:[%s4725_s3 + $0x10] sm:$0xff] }
 0x16b   : > { %v794_v49 = vpop.permute.xlu1 %793  ;;  %968 = vmatprep.subr.mxu0 %v902_v45  ;;  %v796_v50 = vpop.permute.xlu0 %795 }
 0x16c   : > { %969 = vmatpush1.msra.mxu0 %v901_v44  ;;  %v798_v4 = vsel %vm797_vm5, %v794_v49, %v796_v50  ;;  %v799_v6 = vsel %vm797_vm5, %v796_v50, %v794_v49  ;;  %v702_v40 = vpop.f32.mrf.mxu0 }
 0x16d   : > { %970 = vmatprep.subr.mxu0 %v880_v51  ;;  %v812_v16 = vmul.f32 %v3448_v0, %v798_v4  ;;  %v811_v18 = vmul.f32 %v3452_v3, %v799_v6  ;;  %v1262_v4 = vld [vmem:[%s4667_s7 + $0x8] sm:$0xff] }
 0x16e   : > { %971 = vmatpush1.msra.mxu0 %v879_v53  ;;  %v3544_v48 = vpop.f32.mrf.mxu0 }
 0x16f   : > { %v772_v61 = vpop.permute.xlu1 %771  ;;  %972 = vmatprep.subr.mxu0 %v858_v58  ;;  %v774_v62 = vpop.permute.xlu0 %773 }
 0x170   : > { %973 = vmatpush1.msra.mxu0 %v857_v59  ;;  %v776_v9 = vsel %vm775_vm6, %v772_v61, %v774_v62  ;;  %v777_v12 = vsel %vm775_vm6, %v774_v62, %v772_v61  ;;  %v3546_v49 = vpop.f32.mrf.mxu0 }
 0x171   : > { %974 = vmatprep.subr.mxu0 %v836_v63  ;;  %v790_v21 = vmul.f32 %v3463_v7, %v776_v9  ;;  %v789_v25 = vmul.f32 %v3466_v8, %v777_v12  ;;  %v907_v63 = vld [vmem:[%s4729_s4 + $0x10] sm:$0xff]  ;;  %s4737_s4 = smov 112  }
 0x172   : > { %975 = vmatpush1.msra.mxu0 %v835_v2  ;;  %v3548_v50 = vpop.f32.mrf.mxu0  ;;  %v1220_v2 = vld [vmem:[%s4666_s6 + $0x8] sm:$0xff] }
 0x173   : > { %v750_v14 = vpop.permute.xlu1 %749  ;;  %976 = vmatprep.subr.mxu0 %v3324_v13  ;;  %v752_v15 = vpop.permute.xlu0 %751 }
 0x174   : > { %v754_v20 = vsel %vm753_vm7, %v750_v14, %v752_v15  ;;  %977 = vmatpush1.msra.mxu0 %v3318_v11  ;;  %v755_v13 = vsel %vm753_vm7, %v752_v15, %v750_v14  ;;  %v3550_v51 = vpop.f32.mrf.mxu0 }
 0x175   : > { %978 = vmatprep.subr.mxu0 %v812_v16  ;;  %v768_v28 = vmul.f32 %v3478_v17, %v754_v20  ;;  %v767_v30 = vmul.f32 %v3482_v19, %v755_v13 }
 0x176   : > { %979 = vmatpush1.msra.mxu0 %v811_v18 }
 0x177   : > { %v726_v27 = vpop.permute.xlu1 %725  ;;  %980 = vmatprep.subr.mxu0 %v790_v21  ;;  %v728_v11 = vpop.permute.xlu0 %727 }
 0x178   : > { %v732_v31 = vsel %vm731_vm8, %v726_v27, %v728_v11  ;;  %v733_v26 = vsel %vm731_vm8, %v728_v11, %v726_v27  ;;  %981 = vmatpush1.msra.mxu0 %v789_v25 }
 0x179   : > { %v745_v29 = vmul.f32 %v3492_v22, %v733_v26  ;;  %982 = vmatprep.subr.mxu0 %v768_v28  ;;  %v746_v35 = vmul.f32 %v3495_v23, %v732_v31 }
 0x17a   : > { %983 = vmatpush1.msra.mxu0 %v767_v30 }
 0x17b   : > { %984 = vmatprep.subr.mxu0 %v746_v35 }
 0x17c   : > { %985 = vmatpush1.msra.mxu0 %v745_v29 }
 0x17d   : > { %2963 = vmatmul.mubr.msk.f32.vlgmr.msra.gmra.mxu0 %vm944_vm9, %v905_v36 }
 0x17e   : > { %1024 = vmatprep.mubr.f32.mxu0 %v3141_v1 }
 0x181   : > { %2964 = vmatmul.mubr.msk.f32.gmra.mxu0 %vm944_vm9, %v906_v38 }
 0x182   : > { %1030 = vmatprep.mubr.f32.mxu0 %v3141_v1 }
 0x184   : > { %v603_v41 = vpop.permute.xlu0 %602  ;;  %v937_v56 = vpop.permute.xlu1 %936 }
 0x185   : > { %v701_v43 = vadd.f32 %v700_v39, %v603_v41  ;;  %v703_v44 = vadd.f32 %v702_v40, %v603_v41  ;;  %2965 = vmatmul.mubr.msk.f32.gmra.mxu0 %vm944_vm9, %v907_v63 }
 0x186   : > { %2966 = vmatprep.mubr.msk.f32.mxu0 %vm1279_vm10, %v1220_v2 }
 0x187   : > { %v3516_v45 = vmax.f32 %v701_v43, 0.0  ;;  %v3518_v47 = vmax.f32 %v703_v44, 0.0 }
 0x189   : > { %1183 = vrot.lane.b32.xlu0 %v3518_v47, %s4699_s22  ;;  %1179 = vrot.lane.b32.xlu1 %v3516_v45, %s4699_s22 }
 0x18d   : > { %1163 = vrot.lane.b32.xlu0 %v3518_v47, %s4730_s19  ;;  %1159 = vrot.lane.b32.xlu1 %v3516_v45, %s4730_s19 }
 0x191   : > { %1143 = vrot.lane.b32.xlu0 %v3518_v47, %s4731_s20  ;;  %1139 = vrot.lane.b32.xlu1 %v3516_v45, %s4731_s20 }
 0x195   : > { %1119 = vrot.lane.b32.xlu0 %v3518_v47, %s4732_s21  ;;  %1115 = vrot.lane.b32.xlu1 %v3516_v45, %s4732_s21 }
 0x199   : > { %1099 = vrot.lane.b32.xlu0 %v3518_v47, %s4733_s25  ;;  %1095 = vrot.lane.b32.xlu1 %v3516_v45, %s4733_s25 }
 0x19d   : > { %1079 = vrot.lane.b32.xlu0 %v3518_v47, %s4734_s26  ;;  %1075 = vrot.lane.b32.xlu1 %v3516_v45, %s4734_s26 }
 0x1fb   : > { %v1180_v6 = vpop.permute.xlu1 %1179  ;;  %v1184_v9 = vpop.permute.xlu0 %1183 }
 0x1fc   : > { %v1189_v28 = vsel %vm865_vm1, %v1184_v9, %v1180_v6  ;;  %v1187_v26 = vsel %vm865_vm1, %v1180_v6, %v1184_v9 }
 0x1fd   : > { %v1192_v39 = vmul.f32 %v1189_v28, %v3398_v37  ;;  %v1191_v40 = vmul.f32 %v1187_v26, %v3394_v34 }
 0x1ff   : > { %v1160_v10 = vpop.permute.xlu1 %1159  ;;  %v1164_v12 = vpop.permute.xlu0 %1163 }
 0x200   : > { %v1169_v41 = vsel %vm843_vm3, %v1164_v12, %v1160_v10 }
 0x201   : > { %v1172_v63 = vmul.f32 %v1169_v41, %v3410_v42 }
 0x203   : > { %v1140_v14 = vpop.permute.xlu1 %1139  ;;  %v1144_v15 = vpop.permute.xlu0 %1143 }
 0x204   : > { %v1147_v9 = vsel %vm821_vm4, %v1140_v14, %v1144_v15 }
 0x207   : > { %v1116_v16 = vpop.permute.xlu1 %1115  ;;  %v1120_v18 = vpop.permute.xlu0 %1119 }
 0x20b   : > { %v3614_v20 = vpop.permute.xlu1 %1095  ;;  %v3616_v13 = vpop.permute.xlu0 %1099 }
 0x20f   : > { %v3618_v21 = vpop.permute.xlu1 %1075  ;;  %v3620_v25 = vpop.permute.xlu0 %1079 }
 0x23d   : > { %v3552_v53 = vpop.f32.mrf.mxu0 }
 0x23f   : > { %v3554_v55 = vpop.f32.mrf.mxu0 }
 0x241   : > { %v1026_v57 = vpop.f32.mrf.mxu0 }
 0x242   : > { %v1027_v58 = vadd.f32 %v1026_v57, %v937_v56 }
 0x243   : > { %v1028_v59 = vpop.f32.mrf.mxu0 }
 0x244   : > { %v3556_v60 = vmax.f32 %v1027_v58, 0.0  ;;  %v1029_v61 = vadd.f32 %v1028_v59, %v937_v56  ;;  %v1167_v56 = vsel %vm843_vm3, %v1160_v10, %v1164_v12 }
 0x245   : > { %v1171_v2 = vmul.f32 %v1167_v56, %v3418_v46 }
 0x246   : > { %v3558_v62 = vmax.f32 %v1029_v61, 0.0  ;;  %1181 = vrot.lane.b32.xlu1 %v3556_v60, %s4699_s22 }
 0x248   : > { %1185 = vrot.lane.b32.xlu0 %v3558_v62, %s4699_s22  ;;  %s4738_s22 = sld [smem:[#allocation12_spill]] }
 0x24a   : > { %1161 = vrot.lane.b32.xlu1 %v3556_v60, %s4730_s19 }
 0x24c   : > { %1165 = vrot.lane.b32.xlu0 %v3558_v62, %s4730_s19 }
 0x24e   : > { %1141 = vrot.lane.b32.xlu1 %v3556_v60, %s4731_s20  ;;  %s2985_s0 = sshll.u32 %s4738_s22, 8 }
 0x250   : > { %1145 = vrot.lane.b32.xlu0 %v3558_v62, %s4731_s20 }
 0x252   : > { %1055 = vrot.lane.b32.xlu1 %v3516_v45, %s4735_s24 }
 0x254   : > { %1059 = vrot.lane.b32.xlu0 %v3518_v47, %s4735_s24 }
 0x256   : > { %1117 = vrot.lane.b32.xlu1 %v3556_v60, %s4732_s21 }
 0x258   : > { %1121 = vrot.lane.b32.xlu0 %v3558_v62, %s4732_s21 }
 0x25a   : > { %1097 = vrot.lane.b32.xlu1 %v3556_v60, %s4733_s25 }
 0x25c   : > { %1101 = vrot.lane.b32.xlu0 %v3558_v62, %s4733_s25 }
 0x25e   : > { %1077 = vrot.lane.b32.xlu1 %v3556_v60, %s4734_s26 }
 0x260   : > { %1081 = vrot.lane.b32.xlu0 %v3558_v62, %s4734_s26 }
 0x262   : > { %1057 = vrot.lane.b32.xlu1 %v3556_v60, %s4735_s24 }
 0x264   : > { %1061 = vrot.lane.b32.xlu0 %v3558_v62, %s4735_s24 }
 0x266   : > { %1201 = vrot.lane.b32.xlu1 %v3556_v60, %s4736_s1 }
 0x268   : > { %1205 = vrot.lane.b32.xlu0 %v3558_v62, %s4736_s1 }
 0x26a   : > { %1199 = vrot.lane.b32.xlu1 %v3516_v45, %s4736_s1 }
 0x26c   : > { %1203 = vrot.lane.b32.xlu0 %v3518_v47, %s4736_s1 }
 0x26e   : > { %1271 = vperm.xlu1 %3066, %v1262_v4   ;;  %v1149_v4 = vsel %vm821_vm4, %v1144_v15, %v1140_v14  ;;  %v1123_v14 = vsel %vm797_vm5, %v1116_v16, %v1120_v18 }
 0x26f   : > { %v1152_v28 = vmul.f32 %v1149_v4, %v3426_v52 }
 0x270   : > { %607 = vperm.xlu0 %3065, %v593_v5  }
 0x2b8   : > { %v1182_v27 = vpop.permute.xlu1 %1181 }
 0x2ba   : > { %v1186_v11 = vpop.permute.xlu0 %1185 }
 0x2bb   : > { %v1188_v30 = vsel %vm865_vm1, %v1182_v27, %v1186_v11  ;;  %v1190_v31 = vsel %vm865_vm1, %v1186_v11, %v1182_v27 }
 0x2bc   : > { %v1193_v29 = vmul.f32 %v1188_v30, %v3394_v34  ;;  %v1162_v35 = vpop.permute.xlu1 %1161  ;;  %v1194_v36 = vmul.f32 %v1190_v31, %v3398_v37  ;;  %v1151_v30 = vmul.f32 %v1147_v9, %v3430_v54 }
 0x2be   : > { %v1166_v38 = vpop.permute.xlu0 %1165  ;;  %1289 = vmatprep.subr.mxu0 %v1194_v36 }
 0x2bf   : > { %v1168_v43 = vsel %vm843_vm3, %v1162_v35, %v1166_v38  ;;  %v1170_v44 = vsel %vm843_vm3, %v1166_v38, %v1162_v35  ;;  %1290 = vmatpush1.msra.mxu0 %v1193_v29  ;;  %v1125_v35 = vsel %vm797_vm5, %v1120_v18, %v1116_v16 }
 0x2c0   : > { %v1173_v57 = vmul.f32 %v1168_v43, %v3418_v46  ;;  %1291 = vmatprep.subr.mxu0 %v1192_v39  ;;  %v1142_v58 = vpop.permute.xlu1 %1141  ;;  %v1174_v59 = vmul.f32 %v1170_v44, %v3410_v42  ;;  %v1127_v41 = vmul.f32 %v1125_v35, %v3452_v3 }
 0x2c1   : > { %1292 = vmatpush1.msra.mxu0 %v1191_v40  ;;  %v1128_v40 = vmul.f32 %v1123_v14, %v3448_v0 }
 0x2c2   : > { %v1146_v61 = vpop.permute.xlu0 %1145  ;;  %1293 = vmatprep.subr.mxu0 %v1174_v59  ;;  %v1083_v59 = vsel %vm753_vm7, %v3618_v21, %v3620_v25 }
 0x2c3   : > { %v1148_v5 = vsel %vm821_vm4, %v1142_v58, %v1146_v61  ;;  %v1150_v6 = vsel %vm821_vm4, %v1146_v61, %v1142_v58  ;;  %1294 = vmatpush1.msra.mxu0 %v1173_v57  ;;  %v1085_v61 = vsel %vm753_vm7, %v3620_v25, %v3618_v21 }
 0x2c4   : > { %v1153_v10 = vmul.f32 %v1148_v5, %v3430_v54  ;;  %1295 = vmatprep.subr.mxu0 %v1172_v63  ;;  %v1056_v12 = vpop.permute.xlu1 %1055  ;;  %v1154_v27 = vmul.f32 %v1150_v6, %v3426_v52  ;;  %v1088_v6 = vmul.f32 %v1083_v59, %v3478_v17  ;;  %v1087_v9 = vmul.f32 %v1085_v61, %v3482_v19 }
 0x2c5   : > { %1296 = vmatpush1.msra.mxu0 %v1171_v2 }
 0x2c6   : > { %v1060_v11 = vpop.permute.xlu0 %1059  ;;  %1297 = vmatprep.subr.mxu0 %v1154_v27 }
 0x2c7   : > { %1298 = vmatpush1.msra.mxu0 %v1153_v10  ;;  %v1063_v10 = vsel %vm731_vm8, %v1056_v12, %v1060_v11  ;;  %v1065_v25 = vsel %vm731_vm8, %v1060_v11, %v1056_v12 }
 0x2c8   : > { %1299 = vmatprep.subr.mxu0 %v1152_v28  ;;  %v1118_v31 = vpop.permute.xlu1 %1117  ;;  %v1068_v14 = vmul.f32 %v1063_v10, %v3495_v23 }
 0x2c9   : > { %1300 = vmatpush1.msra.mxu0 %v1151_v30 }
 0x2ca   : > { %v1122_v26 = vpop.permute.xlu0 %1121  ;;  %1301 = vmatprep.subr.mxu0 %v3558_v62 }
 0x2cb   : > { %v1124_v15 = vsel %vm797_vm5, %v1118_v31, %v1122_v26  ;;  %v1126_v29 = vsel %vm797_vm5, %v1122_v26, %v1118_v31  ;;  %1302 = vmatpush1.msra.mxu0 %v3556_v60  ;;  %v1103_v60 = vsel %vm775_vm6, %v3614_v20, %v3616_v13 }
 0x2cc   : > { %v1129_v36 = vmul.f32 %v1126_v29, %v3452_v3  ;;  %1303 = vmatprep.subr.mxu0 %v3518_v47  ;;  %v1098_v38 = vpop.permute.xlu1 %1097  ;;  %v1130_v62 = vmul.f32 %v1124_v15, %v3448_v0  ;;  %v1108_v57 = vmul.f32 %v1103_v60, %v3463_v7  ;;  %v1067_v15 = vmul.f32 %v1065_v25, %v3492_v22  ;;  %v1219_v60 = vld [vmem:[%s4666_s6] sm:$0xff] }
 0x2cd   : > { %1304 = vmatpush1.msra.mxu0 %v3516_v45  ;;  %v1105_v45 = vsel %vm775_vm6, %v3616_v13, %v3614_v20 }
 0x2ce   : > { %v1102_v39 = vpop.permute.xlu0 %1101  ;;  %1305 = vmatprep.subr.mxu0 %v1130_v62  ;;  %v1107_v58 = vmul.f32 %v1105_v45, %v3466_v8 }
 0x2cf   : > { %v1104_v16 = vsel %vm775_vm6, %v1098_v38, %v1102_v39  ;;  %v1106_v47 = vsel %vm775_vm6, %v1102_v39, %v1098_v38  ;;  %1306 = vmatpush1.msra.mxu0 %v1129_v36 }
 0x2d0   : > { %v1109_v18 = vmul.f32 %v1106_v47, %v3466_v8  ;;  %1307 = vmatprep.subr.mxu0 %v1128_v40  ;;  %v1078_v43 = vpop.permute.xlu1 %1077  ;;  %v1110_v44 = vmul.f32 %v1104_v16, %v3463_v7  ;;  %v1222_v16 = vld [vmem:[%s4666_s6 + $0x18] sm:$0xff]  ;;  %v1221_v47 = vld [vmem:[%s4666_s6 + $0x10] sm:$0xff] }
 0x2d1   : > { %1308 = vmatpush1.msra.mxu0 %v1127_v41 }
 0x2d2   : > { %v1082_v56 = vpop.permute.xlu0 %1081  ;;  %1309 = vmatprep.subr.mxu0 %v1110_v44 }
 0x2d3   : > { %v1084_v20 = vsel %vm753_vm7, %v1078_v43, %v1082_v56  ;;  %v1086_v13 = vsel %vm753_vm7, %v1082_v56, %v1078_v43  ;;  %1310 = vmatpush1.msra.mxu0 %v1109_v18 }
 0x2d4   : > { %v1089_v63 = vmul.f32 %v1086_v13, %v3482_v19  ;;  %1311 = vmatprep.subr.mxu0 %v1108_v57  ;;  %v1058_v2 = vpop.permute.xlu1 %1057  ;;  %v1090_v4 = vmul.f32 %v1084_v20, %v3478_v17 }
 0x2d5   : > { %1312 = vmatpush1.msra.mxu0 %v1107_v58 }
 0x2d6   : > { %v1062_v5 = vpop.permute.xlu0 %1061  ;;  %1313 = vmatprep.subr.mxu0 %v1090_v4 }
 0x2d7   : > { %v1064_v27 = vsel %vm731_vm8, %v1058_v2, %v1062_v5  ;;  %v1066_v21 = vsel %vm731_vm8, %v1062_v5, %v1058_v2  ;;  %1314 = vmatpush1.msra.mxu0 %v1089_v63  ;;  %v1555_v5 = vld [vmem:[%s4668_s8 + $0x8] sm:$0xff] }
 0x2d8   : > { %v1069_v28 = vmul.f32 %v1066_v21, %v3492_v22  ;;  %1315 = vmatprep.subr.mxu0 %v1088_v6  ;;  %v1202_v30 = vpop.permute.xlu1 %1201  ;;  %v1070_v31 = vmul.f32 %v1064_v27, %v3495_v23  ;;  %2969 = vmatprep.mubr.msk.f32.mxu1 %vm1279_vm10, %v1555_v5  ;;  %v1597_v6 = vld [vmem:[%s4669_s9 + $0x8] sm:$0xff] }
 0x2d9   : > { %1316 = vmatpush1.msra.mxu0 %v1087_v9  ;;  %v594_v9 = vld [vmem:[%s4725_s3 + $0x18] sm:$0xff]  ;;  %s2893_s3 = sshll.u32 %s569_s2, 4  ;;  %s2894_s3 = int_to_ptr.vmem [resolvable:$true] %s2893_s3 }
 0x2da   : > { %v1206_v26 = vpop.permute.xlu0 %1205  ;;  %1317 = vmatprep.subr.mxu0 %v1070_v31 }
 0x2db   : > { %v1208_v29 = vsel %vm887_vm2, %v1202_v30, %v1206_v26  ;;  %v1210_v35 = vsel %vm887_vm2, %v1206_v26, %v1202_v30  ;;  %1318 = vmatpush1.msra.mxu0 %v1069_v28 }
 0x2dc   : > { %v1213_v12 = vmul.f32 %v1208_v29, %v3388_v32  ;;  %1319 = vmatprep.subr.mxu0 %v1068_v14  ;;  %v1214_v11 = vmul.f32 %v1210_v35, %v3391_v33  ;;  %v1200_v36 = vpop.permute.xlu1 %1199 }
 0x2dd   : > { %1320 = vmatpush1.msra.mxu0 %v1067_v15 }
 0x2de   : > { %v1204_v38 = vpop.permute.xlu0 %1203  ;;  %1349 = vmatprep.subr.mxu0 %v1214_v11 }
 0x2df   : > { %v1207_v62 = vsel %vm887_vm2, %v1200_v36, %v1204_v38  ;;  %v1209_v39 = vsel %vm887_vm2, %v1204_v38, %v1200_v36  ;;  %1350 = vmatpush2.msra.mxu0 %v1213_v12 }
 0x2e0   : > { %v1211_v40 = vmul.f32 %v1207_v62, %v3388_v32  ;;  %v1212_v41 = vmul.f32 %v1209_v39, %v3391_v33 }
 0x2e2   : > { %1351 = vmatprep.subr.mxu0 %v1212_v41 }
 0x2e3   : > { %1352 = vmatpush2.msra.mxu0 %v1211_v40 }
 0x2e4   : > { %1354 = vmatmul.mubr.f32.vlgmr.msra.gmra.mxu0 %v1219_v60 }
 0x2e5   : > { %2967 = vmatprep.mubr.msk.f32.mxu0 %vm1279_vm10, %v1222_v16 }
 0x2e8   : > { %1360 = vmatmul.mubr.f32.gmra.mxu0 %v1221_v47 }
 0x2e9   : > { %v1272_v59 = vpop.permute.xlu1 %1271 }
 0x2eb   : > { %v608_v45 = vpop.permute.xlu0 %607 }
 0x2ec   : > { %v707_v18 = vadd.f32 %v3544_v48, %v608_v45  ;;  %v709_v43 = vadd.f32 %v3546_v49, %v608_v45  ;;  %v3770_v48 = vpop.f32.mrf.mxu0 }
 0x2ee   : > { %v3742_v44 = vmax.f32 %v707_v18, 0.0  ;;  %v3744_v56 = vmax.f32 %v709_v43, 0.0  ;;  %v3772_v49 = vpop.f32.mrf.mxu0 }
 0x2f0   : > { %1518 = vrot.lane.b32.xlu0 %v3744_v56, %s4737_s4  ;;  %1514 = vrot.lane.b32.xlu1 %v3742_v44, %s4737_s4 }
 0x2f4   : > { %1498 = vrot.lane.b32.xlu0 %v3744_v56, %s4730_s19  ;;  %1494 = vrot.lane.b32.xlu1 %v3742_v44, %s4730_s19 }
 0x2f8   : > { %1478 = vrot.lane.b32.xlu0 %v3744_v56, %s4731_s20  ;;  %1474 = vrot.lane.b32.xlu1 %v3742_v44, %s4731_s20 }
 0x2fc   : > { %1454 = vrot.lane.b32.xlu0 %v3744_v56, %s4732_s21  ;;  %1450 = vrot.lane.b32.xlu1 %v3742_v44, %s4732_s21 }
 0x300   : > { %1434 = vrot.lane.b32.xlu0 %v3744_v56, %s4733_s25  ;;  %1430 = vrot.lane.b32.xlu1 %v3742_v44, %s4733_s25 }
 0x304   : > { %1414 = vrot.lane.b32.xlu0 %v3744_v56, %s4734_s26  ;;  %1410 = vrot.lane.b32.xlu1 %v3742_v44, %s4734_s26 }
 0x362   : > { %v1515_v10 = vpop.permute.xlu1 %1514  ;;  %v1519_v27 = vpop.permute.xlu0 %1518 }
 0x363   : > { %v1524_v36 = vsel %vm865_vm1, %v1519_v27, %v1515_v10  ;;  %v1522_v39 = vsel %vm865_vm1, %v1515_v10, %v1519_v27 }
 0x364   : > { %v1527_v47 = vmul.f32 %v1524_v36, %v3398_v37 }
 0x366   : > { %v1495_v21 = vpop.permute.xlu1 %1494  ;;  %v1499_v25 = vpop.permute.xlu0 %1498 }
 0x367   : > { %v1504_v45 = vsel %vm843_vm3, %v1499_v25, %v1495_v21 }
 0x36a   : > { %v1475_v28 = vpop.permute.xlu1 %1474  ;;  %v1479_v30 = vpop.permute.xlu0 %1478 }
 0x36e   : > { %v1451_v31 = vpop.permute.xlu1 %1450  ;;  %v1455_v26 = vpop.permute.xlu0 %1454 }
 0x372   : > { %v3832_v14 = vpop.permute.xlu1 %1430  ;;  %v3834_v15 = vpop.permute.xlu0 %1434 }
 0x376   : > { %v3836_v29 = vpop.permute.xlu1 %1410  ;;  %v3838_v35 = vpop.permute.xlu0 %1414 }
 0x3a4   : > { %v3774_v57 = vpop.f32.mrf.mxu0 }
 0x3a6   : > { %v3776_v58 = vpop.f32.mrf.mxu0 }
 0x3a8   : > { %v1361_v20 = vpop.f32.mrf.mxu0 }
 0x3a9   : > { %v1362_v13 = vadd.f32 %v1361_v20, %v1272_v59  ;;  %v1502_v20 = vsel %vm843_vm3, %v1495_v21, %v1499_v25  ;;  %v1482_v25 = vsel %vm821_vm4, %v1475_v28, %v1479_v30 }
 0x3aa   : > { %v1363_v61 = vpop.f32.mrf.mxu0  ;;  %v1506_v21 = vmul.f32 %v1502_v20, %v3418_v46 }
 0x3ab   : > { %v3778_v63 = vmax.f32 %v1362_v13, 0.0  ;;  %v1364_v2 = vadd.f32 %v1363_v61, %v1272_v59  ;;  %v1526_v59 = vmul.f32 %v1522_v39, %v3394_v34  ;;  %v1486_v39 = vmul.f32 %v1482_v25, %v3430_v54 }
 0x3ad   : > { %v3780_v4 = vmax.f32 %v1364_v2, 0.0  ;;  %1516 = vrot.lane.b32.xlu1 %v3778_v63, %s4737_s4 }
 0x3af   : > { %1520 = vrot.lane.b32.xlu0 %v3780_v4, %s4737_s4 }
 0x3b1   : > { %1496 = vrot.lane.b32.xlu1 %v3778_v63, %s4730_s19 }
 0x3b3   : > { %1500 = vrot.lane.b32.xlu0 %v3780_v4, %s4730_s19 }
 0x3b5   : > { %1476 = vrot.lane.b32.xlu1 %v3778_v63, %s4731_s20 }
 0x3b7   : > { %1480 = vrot.lane.b32.xlu0 %v3780_v4, %s4731_s20 }
 0x3b9   : > { %1390 = vrot.lane.b32.xlu1 %v3742_v44, %s4735_s24 }
 0x3bb   : > { %1394 = vrot.lane.b32.xlu0 %v3744_v56, %s4735_s24 }
 0x3bd   : > { %1452 = vrot.lane.b32.xlu1 %v3778_v63, %s4732_s21 }
 0x3bf   : > { %1456 = vrot.lane.b32.xlu0 %v3780_v4, %s4732_s21 }
 0x3c1   : > { %1432 = vrot.lane.b32.xlu1 %v3778_v63, %s4733_s25 }
 0x3c3   : > { %1436 = vrot.lane.b32.xlu0 %v3780_v4, %s4733_s25 }
 0x3c5   : > { %1412 = vrot.lane.b32.xlu1 %v3778_v63, %s4734_s26 }
 0x3c7   : > { %1416 = vrot.lane.b32.xlu0 %v3780_v4, %s4734_s26 }
 0x3c9   : > { %1392 = vrot.lane.b32.xlu1 %v3778_v63, %s4735_s24 }
 0x3cb   : > { %1396 = vrot.lane.b32.xlu0 %v3780_v4, %s4735_s24 }
 0x3cd   : > { %1536 = vrot.lane.b32.xlu1 %v3778_v63, %s4736_s1 }
 0x3cf   : > { %1540 = vrot.lane.b32.xlu0 %v3780_v4, %s4736_s1 }
 0x3d1   : > { %1534 = vrot.lane.b32.xlu1 %v3742_v44, %s4736_s1 }
 0x3d3   : > { %1538 = vrot.lane.b32.xlu0 %v3744_v56, %s4736_s1 }
 0x3d5   : > { %1606 = vperm.xlu1 %3066, %v1597_v6   ;;  %v1507_v6 = vmul.f32 %v1504_v45, %v3410_v42 }
 0x3d7   : > { %612 = vperm.xlu0 %3065, %v594_v9   ;;  %v1484_v9 = vsel %vm821_vm4, %v1479_v30, %v1475_v28  ;;  %v1458_v28 = vsel %vm797_vm5, %v1451_v31, %v1455_v26 }
 0x41f   : > { %v1517_v12 = vpop.permute.xlu1 %1516 }
 0x421   : > { %v1521_v11 = vpop.permute.xlu0 %1520 }
 0x422   : > { %v1525_v38 = vsel %vm865_vm1, %v1521_v11, %v1517_v12  ;;  %v1523_v62 = vsel %vm865_vm1, %v1517_v12, %v1521_v11 }
 0x423   : > { %v1497_v40 = vpop.permute.xlu1 %1496  ;;  %v1529_v41 = vmul.f32 %v1525_v38, %v3398_v37  ;;  %v1528_v60 = vmul.f32 %v1523_v62, %v3394_v34  ;;  %v1487_v62 = vmul.f32 %v1484_v9, %v3426_v52  ;;  %v1420_v9 = vsel %vm753_vm7, %v3838_v35, %v3836_v29 }
 0x425   : > { %v1501_v16 = vpop.permute.xlu0 %1500  ;;  %1623 = vmatprep.subr.mxu1 %v1529_v41 }
 0x426   : > { %v1503_v18 = vsel %vm843_vm3, %v1497_v40, %v1501_v16  ;;  %v1505_v43 = vsel %vm843_vm3, %v1501_v16, %v1497_v40  ;;  %1624 = vmatpush1.msra.mxu1 %v1528_v60  ;;  %v1460_v16 = vsel %vm797_vm5, %v1455_v26, %v1451_v31 }
 0x427   : > { %1625 = vmatprep.subr.mxu1 %v1527_v47  ;;  %v1477_v13 = vpop.permute.xlu1 %1476  ;;  %v1509_v61 = vmul.f32 %v1505_v43, %v3410_v42  ;;  %v1508_v2 = vmul.f32 %v1503_v18, %v3418_v46  ;;  %v1463_v43 = vmul.f32 %v1458_v28, %v3448_v0  ;;  %v1462_v26 = vmul.f32 %v1460_v16, %v3452_v3 }
 0x428   : > { %1626 = vmatpush1.msra.mxu1 %v1526_v59 }
 0x429   : > { %v1481_v5 = vpop.permute.xlu0 %1480  ;;  %1627 = vmatprep.subr.mxu1 %v1509_v61 }
 0x42a   : > { %v1483_v10 = vsel %vm821_vm4, %v1477_v13, %v1481_v5  ;;  %v1485_v27 = vsel %vm821_vm4, %v1481_v5, %v1477_v13  ;;  %1628 = vmatpush1.msra.mxu1 %v1508_v2  ;;  %v1418_v5 = vsel %vm753_vm7, %v3836_v29, %v3838_v35  ;;  %v1422_v35 = vmul.f32 %v1420_v9, %v3482_v19 }
 0x42b   : > { %1629 = vmatprep.subr.mxu1 %v1507_v6  ;;  %v1391_v12 = vpop.permute.xlu1 %1390  ;;  %v1489_v11 = vmul.f32 %v1485_v27, %v3426_v52  ;;  %v1488_v36 = vmul.f32 %v1483_v10, %v3430_v54 }
 0x42c   : > { %1630 = vmatpush1.msra.mxu1 %v1506_v21 }
 0x42d   : > { %v1395_v38 = vpop.permute.xlu0 %1394  ;;  %1631 = vmatprep.subr.mxu1 %v1489_v11  ;;  %v1423_v11 = vmul.f32 %v1418_v5, %v3478_v17 }
 0x42e   : > { %1632 = vmatpush1.msra.mxu1 %v1488_v36  ;;  %v1398_v36 = vsel %vm731_vm8, %v1391_v12, %v1395_v38 }
 0x42f   : > { %1633 = vmatprep.subr.mxu1 %v1487_v62  ;;  %v1453_v40 = vpop.permute.xlu1 %1452 }
 0x430   : > { %1634 = vmatpush1.msra.mxu1 %v1486_v39  ;;  %v1400_v39 = vsel %vm731_vm8, %v1395_v38, %v1391_v12 }
 0x431   : > { %v1457_v41 = vpop.permute.xlu0 %1456  ;;  %1635 = vmatprep.subr.mxu1 %v3780_v4  ;;  %v1402_v12 = vmul.f32 %v1400_v39, %v3492_v22  ;;  %v1598_v39 = vld [vmem:[%s4669_s9 + $0x10] sm:$0xff] }
 0x432   : > { %v1459_v30 = vsel %vm797_vm5, %v1453_v40, %v1457_v41  ;;  %v1461_v60 = vsel %vm797_vm5, %v1457_v41, %v1453_v40  ;;  %1636 = vmatpush1.msra.mxu1 %v3778_v63  ;;  %v1438_v63 = vsel %vm775_vm6, %v3832_v14, %v3834_v15 }
 0x433   : > { %1637 = vmatprep.subr.mxu1 %v3744_v56  ;;  %v1433_v47 = vpop.permute.xlu1 %1432  ;;  %v1465_v45 = vmul.f32 %v1459_v30, %v3448_v0  ;;  %v1464_v4 = vmul.f32 %v1461_v60, %v3452_v3  ;;  %v1443_v2 = vmul.f32 %v1438_v63, %v3463_v7  ;;  %v1403_v60 = vmul.f32 %v1398_v36, %v3495_v23 }
 0x434   : > { %1638 = vmatpush1.msra.mxu1 %v3742_v44  ;;  %v1440_v44 = vsel %vm775_vm6, %v3834_v15, %v3832_v14 }
 0x435   : > { %v1437_v18 = vpop.permute.xlu0 %1436  ;;  %1639 = vmatprep.subr.mxu1 %v1465_v45  ;;  %v1442_v15 = vmul.f32 %v1440_v44, %v3466_v8  ;;  %v1557_v44 = vld [vmem:[%s4668_s8 + $0x18] sm:$0xff] }
 0x436   : > { %v1439_v31 = vsel %vm775_vm6, %v1433_v47, %v1437_v18  ;;  %v1441_v56 = vsel %vm775_vm6, %v1437_v18, %v1433_v47  ;;  %1640 = vmatpush1.msra.mxu1 %v1464_v4 }
 0x437   : > { %1641 = vmatprep.subr.mxu1 %v1463_v43  ;;  %v1413_v59 = vpop.permute.xlu1 %1412  ;;  %v1445_v20 = vmul.f32 %v1439_v31, %v3463_v7  ;;  %v1444_v13 = vmul.f32 %v1441_v56, %v3466_v8 }
 0x438   : > { %1642 = vmatpush1.msra.mxu1 %v1462_v26  ;;  %v1554_v26 = vld [vmem:[%s4668_s8] sm:$0xff] }
 0x439   : > { %v1417_v61 = vpop.permute.xlu0 %1416  ;;  %1643 = vmatprep.subr.mxu1 %v1445_v20 }
 0x43a   : > { %v1419_v6 = vsel %vm753_vm7, %v1413_v59, %v1417_v61  ;;  %v1421_v14 = vsel %vm753_vm7, %v1417_v61, %v1413_v59  ;;  %1644 = vmatpush1.msra.mxu1 %v1444_v13  ;;  %v1556_v59 = vld [vmem:[%s4668_s8 + $0x10] sm:$0xff] }
 0x43b   : > { %1645 = vmatprep.subr.mxu1 %v1443_v2  ;;  %v1393_v10 = vpop.permute.xlu1 %1392  ;;  %v1425_v27 = vmul.f32 %v1419_v6, %v3478_v17  ;;  %v1424_v21 = vmul.f32 %v1421_v14, %v3482_v19  ;;  %v1224_v6 = vld [vmem:[%s4666_s6 + $0x28] sm:$0xff]  ;;  %v1223_v14 = vld [vmem:[%s4666_s6 + $0x20] sm:$0xff] }
 0x43c   : > { %1646 = vmatpush1.msra.mxu1 %v1442_v15  ;;  %2968 = vmatprep.mubr.msk.f32.mxu0 %vm1279_vm10, %v1224_v6 }
 0x43d   : > { %v1397_v25 = vpop.permute.xlu0 %1396  ;;  %1647 = vmatprep.subr.mxu1 %v1425_v27  ;;  %1366 = vmatmul.mubr.f32.gmra.mxu0 %v1223_v14 }
 0x43e   : > { %v1399_v62 = vsel %vm731_vm8, %v1393_v10, %v1397_v25  ;;  %v1401_v29 = vsel %vm731_vm8, %v1397_v25, %v1393_v10  ;;  %1648 = vmatpush1.msra.mxu1 %v1424_v21 }
 0x43f   : > { %1649 = vmatprep.subr.mxu1 %v1423_v11  ;;  %v1537_v40 = vpop.permute.xlu1 %1536  ;;  %v1405_v41 = vmul.f32 %v1399_v62, %v3495_v23  ;;  %v1404_v28 = vmul.f32 %v1401_v29, %v3492_v22  ;;  %v1889_v29 = vld [vmem:[%s4670_s10 + $0x8] sm:$0xff] }
 0x440   : > { %1650 = vmatpush1.msra.mxu1 %v1422_v35  ;;  %2972 = vmatprep.mubr.msk.f32.mxu0 %vm1279_vm10, %v1889_v29  ;;  %v1929_v35 = vld [vmem:[%s4671_s11 + $0x8] sm:$0xff] }
 0x441   : > { %v1541_v30 = vpop.permute.xlu0 %1540  ;;  %1651 = vmatprep.subr.mxu1 %v1405_v41  ;;  %v928_v41 = vld [vmem:[%s4665_s5 + $0x10] sm:$0xff] }
 0x442   : > { %v1543_v16 = vsel %vm887_vm2, %v1537_v40, %v1541_v30  ;;  %v1545_v47 = vsel %vm887_vm2, %v1541_v30, %v1537_v40  ;;  %1652 = vmatpush1.msra.mxu1 %v1404_v28  ;;  %v1263_v40 = vld [vmem:[%s4667_s7 + $0x10] sm:$0xff] }
 0x443   : > { %1653 = vmatprep.subr.mxu1 %v1403_v60  ;;  %v1549_v38 = vmul.f32 %v1545_v47, %v3391_v33  ;;  %v1548_v45 = vmul.f32 %v1543_v16, %v3388_v32  ;;  %v1535_v4 = vpop.permute.xlu1 %1534 }
 0x444   : > { %1654 = vmatpush1.msra.mxu1 %v1402_v12 }
 0x445   : > { %v1539_v18 = vpop.permute.xlu0 %1538  ;;  %1683 = vmatprep.subr.mxu1 %v1549_v38 }
 0x446   : > { %v1542_v43 = vsel %vm887_vm2, %v1535_v4, %v1539_v18  ;;  %v1544_v63 = vsel %vm887_vm2, %v1539_v18, %v1535_v4  ;;  %1684 = vmatpush2.msra.mxu1 %v1548_v45 }
 0x447   : > { %v1547_v31 = vmul.f32 %v1544_v63, %v3391_v33  ;;  %v1546_v56 = vmul.f32 %v1542_v43, %v3388_v32 }
 0x449   : > { %1685 = vmatprep.subr.mxu1 %v1547_v31 }
 0x44a   : > { %1686 = vmatpush2.msra.mxu1 %v1546_v56 }
 0x44b   : > { %1688 = vmatmul.mubr.f32.vlgmr.msra.gmra.mxu1 %v1554_v26 }
 0x44c   : > { %2970 = vmatprep.mubr.msk.f32.mxu1 %vm1279_vm10, %v1557_v44 }
 0x44f   : > { %1694 = vmatmul.mubr.f32.gmra.mxu1 %v1556_v59 }
 0x450   : > { %v1607_v10 = vpop.permute.xlu1 %1606 }
 0x452   : > { %v613_v20 = vpop.permute.xlu0 %612 }
 0x453   : > { %v713_v13 = vadd.f32 %v3548_v50, %v613_v20  ;;  %v715_v61 = vadd.f32 %v3550_v51, %v613_v20  ;;  %v1559_v50 = vld [vmem:[%s4668_s8 + $0x28] sm:$0xff]  ;;  %v1558_v51 = vld [vmem:[%s4668_s8 + $0x20] sm:$0xff] }
 0x454   : > { %2971 = vmatprep.mubr.msk.f32.mxu1 %vm1279_vm10, %v1559_v50 }
 0x455   : > { %v3960_v2 = vmax.f32 %v713_v13, 0.0  ;;  %v3962_v5 = vmax.f32 %v715_v61, 0.0  ;;  %1700 = vmatmul.mubr.f32.gmra.mxu1 %v1558_v51 }
 0x457   : > { %1852 = vrot.lane.b32.xlu0 %v3962_v5, %s4737_s4  ;;  %1848 = vrot.lane.b32.xlu1 %v3960_v2, %s4737_s4 }
 0x45b   : > { %1832 = vrot.lane.b32.xlu0 %v3962_v5, %s4730_s19  ;;  %1828 = vrot.lane.b32.xlu1 %v3960_v2, %s4730_s19 }
 0x45f   : > { %1812 = vrot.lane.b32.xlu0 %v3962_v5, %s4731_s20  ;;  %1808 = vrot.lane.b32.xlu1 %v3960_v2, %s4731_s20 }
 0x463   : > { %1788 = vrot.lane.b32.xlu0 %v3962_v5, %s4732_s21  ;;  %1784 = vrot.lane.b32.xlu1 %v3960_v2, %s4732_s21 }
 0x467   : > { %1768 = vrot.lane.b32.xlu0 %v3962_v5, %s4733_s25  ;;  %1764 = vrot.lane.b32.xlu1 %v3960_v2, %s4733_s25 }
 0x46b   : > { %1748 = vrot.lane.b32.xlu0 %v3962_v5, %s4734_s26  ;;  %1744 = vrot.lane.b32.xlu1 %v3960_v2, %s4734_s26 }
 0x4c9   : > { %v1849_v28 = vpop.permute.xlu1 %1848  ;;  %v1853_v30 = vpop.permute.xlu0 %1852 }
 0x4ca   : > { %v1858_v26 = vsel %vm865_vm1, %v1853_v30, %v1849_v28  ;;  %v1856_v20 = vsel %vm865_vm1, %v1849_v28, %v1853_v30 }
 0x4cb   : > { %v1861_v6 = vmul.f32 %v1858_v26, %v3398_v37  ;;  %v1860_v14 = vmul.f32 %v1856_v20, %v3394_v34 }
 0x4cd   : > { %v1829_v60 = vpop.permute.xlu1 %1828  ;;  %v1833_v16 = vpop.permute.xlu0 %1832 }
 0x4d1   : > { %v1809_v47 = vpop.permute.xlu1 %1808  ;;  %v1813_v12 = vpop.permute.xlu0 %1812 }
 0x4d2   : > { %v1818_v28 = vsel %vm821_vm4, %v1813_v12, %v1809_v47 }
 0x4d5   : > { %v1785_v38 = vpop.permute.xlu1 %1784  ;;  %v1789_v45 = vpop.permute.xlu0 %1788 }
 0x4d9   : > { %v4066_v4 = vpop.permute.xlu1 %1764  ;;  %v4068_v18 = vpop.permute.xlu0 %1768 }
 0x4dd   : > { %v4070_v43 = vpop.permute.xlu1 %1744  ;;  %v4072_v63 = vpop.permute.xlu0 %1748 }
 0x50b   : > { %v4002_v15 = vpop.f32.mrf.mxu1 }
 0x50d   : > { %v4004_v9 = vpop.f32.mrf.mxu1 }
 0x50f   : > { %v1695_v27 = vpop.f32.mrf.mxu1 }
 0x510   : > { %v1696_v21 = vadd.f32 %v1695_v27, %v1607_v10 }
 0x511   : > { %v1697_v25 = vpop.f32.mrf.mxu1 }
 0x512   : > { %v4006_v11 = vmax.f32 %v1696_v21, 0.0  ;;  %v1698_v36 = vadd.f32 %v1697_v25, %v1607_v10  ;;  %v1838_v10 = vsel %vm843_vm3, %v1833_v16, %v1829_v60  ;;  %v1836_v25 = vsel %vm843_vm3, %v1829_v60, %v1833_v16 }
 0x513   : > { %v1816_v16 = vsel %vm821_vm4, %v1809_v47, %v1813_v12  ;;  %v1792_v47 = vsel %vm797_vm5, %v1785_v38, %v1789_v45 }
 0x514   : > { %v4008_v62 = vmax.f32 %v1698_v36, 0.0  ;;  %1850 = vrot.lane.b32.xlu1 %v4006_v11, %s4737_s4  ;;  %v1820_v20 = vmul.f32 %v1816_v16, %v3430_v54 }
 0x516   : > { %1854 = vrot.lane.b32.xlu0 %v4008_v62, %s4737_s4 }
 0x518   : > { %1830 = vrot.lane.b32.xlu1 %v4006_v11, %s4730_s19 }
 0x51a   : > { %1834 = vrot.lane.b32.xlu0 %v4008_v62, %s4730_s19 }
 0x51c   : > { %1810 = vrot.lane.b32.xlu1 %v4006_v11, %s4731_s20 }
 0x51e   : > { %1814 = vrot.lane.b32.xlu0 %v4008_v62, %s4731_s20 }
 0x520   : > { %1724 = vrot.lane.b32.xlu1 %v3960_v2, %s4735_s24 }
 0x522   : > { %1728 = vrot.lane.b32.xlu0 %v3962_v5, %s4735_s24 }
 0x524   : > { %1786 = vrot.lane.b32.xlu1 %v4006_v11, %s4732_s21 }
 0x526   : > { %1790 = vrot.lane.b32.xlu0 %v4008_v62, %s4732_s21 }
 0x528   : > { %1766 = vrot.lane.b32.xlu1 %v4006_v11, %s4733_s25 }
 0x52a   : > { %1770 = vrot.lane.b32.xlu0 %v4008_v62, %s4733_s25 }
 0x52c   : > { %1746 = vrot.lane.b32.xlu1 %v4006_v11, %s4734_s26 }
 0x52e   : > { %1750 = vrot.lane.b32.xlu0 %v4008_v62, %s4734_s26 }
 0x530   : > { %1726 = vrot.lane.b32.xlu1 %v4006_v11, %s4735_s24 }
 0x532   : > { %1730 = vrot.lane.b32.xlu0 %v4008_v62, %s4735_s24 }
 0x534   : > { %1870 = vrot.lane.b32.xlu1 %v4006_v11, %s4736_s1 }
 0x536   : > { %1874 = vrot.lane.b32.xlu0 %v4008_v62, %s4736_s1 }
 0x538   : > { %1868 = vrot.lane.b32.xlu1 %v3960_v2, %s4736_s1 }
 0x53a   : > { %1872 = vrot.lane.b32.xlu0 %v3962_v5, %s4736_s1 }
 0x53c   : > { %1937 = vperm.xlu1 %3066, %v1929_v35  }
 0x53e   : > { %1611 = vperm.xlu0 %3065, %v1598_v39  }
 0x540   : > { %1276 = vperm.xlu1 %3066, %v1263_v40   ;;  %v1841_v40 = vmul.f32 %v1838_v10, %v3410_v42 }
 0x542   : > { %941 = vperm.xlu0 %3065, %v928_v41   ;;  %v1840_v41 = vmul.f32 %v1836_v25, %v3418_v46 }
 0x586   : > { %v1851_v31 = vpop.permute.xlu1 %1850 }
 0x588   : > { %v1855_v56 = vpop.permute.xlu0 %1854 }
 0x589   : > { %v1857_v44 = vsel %vm865_vm1, %v1851_v31, %v1855_v56  ;;  %v1859_v59 = vsel %vm865_vm1, %v1855_v56, %v1851_v31 }
 0x58a   : > { %v1862_v13 = vmul.f32 %v1857_v44, %v3394_v34  ;;  %v1831_v61 = vpop.permute.xlu1 %1830  ;;  %v1863_v50 = vmul.f32 %v1859_v59, %v3398_v37  ;;  %v1821_v59 = vmul.f32 %v1818_v28, %v3426_v52 }
 0x58c   : > { %v1835_v51 = vpop.permute.xlu0 %1834  ;;  %1946 = vmatprep.subr.mxu0 %v1863_v50 }
 0x58d   : > { %v1837_v27 = vsel %vm843_vm3, %v1831_v61, %v1835_v51  ;;  %v1839_v21 = vsel %vm843_vm3, %v1835_v51, %v1831_v61  ;;  %1947 = vmatpush1.msra.mxu0 %v1862_v13  ;;  %v1794_v51 = vsel %vm797_vm5, %v1789_v45, %v1785_v38 }
 0x58e   : > { %v1842_v36 = vmul.f32 %v1837_v27, %v3418_v46  ;;  %v1843_v29 = vmul.f32 %v1839_v21, %v3410_v42  ;;  %1948 = vmatprep.subr.mxu0 %v1861_v6  ;;  %v1811_v35 = vpop.permute.xlu1 %1810  ;;  %v1797_v27 = vmul.f32 %v1792_v47, %v3448_v0  ;;  %v1796_v21 = vmul.f32 %v1794_v51, %v3452_v3 }
 0x58f   : > { %1949 = vmatpush1.msra.mxu0 %v1860_v14 }
 0x590   : > { %v1815_v39 = vpop.permute.xlu0 %1814  ;;  %1950 = vmatprep.subr.mxu0 %v1843_v29 }
 0x591   : > { %v1817_v30 = vsel %vm821_vm4, %v1811_v35, %v1815_v39  ;;  %v1819_v60 = vsel %vm821_vm4, %v1815_v39, %v1811_v35  ;;  %1951 = vmatpush1.msra.mxu0 %v1842_v36 }
 0x592   : > { %v1822_v31 = vmul.f32 %v1817_v30, %v3430_v54  ;;  %v1823_v56 = vmul.f32 %v1819_v60, %v3426_v52  ;;  %1952 = vmatprep.subr.mxu0 %v1841_v40  ;;  %v1725_v26 = vpop.permute.xlu1 %1724  ;;  %v1752_v40 = vsel %vm753_vm7, %v4070_v43, %v4072_v63 }
 0x593   : > { %1953 = vmatpush1.msra.mxu0 %v1840_v41  ;;  %v1754_v41 = vsel %vm753_vm7, %v4072_v63, %v4070_v43 }
 0x594   : > { %v1729_v44 = vpop.permute.xlu0 %1728  ;;  %1954 = vmatprep.subr.mxu0 %v1823_v56  ;;  %v1756_v56 = vmul.f32 %v1754_v41, %v3482_v19 }
 0x595   : > { %1955 = vmatpush1.msra.mxu0 %v1822_v31  ;;  %v1757_v31 = vmul.f32 %v1752_v40, %v3478_v17  ;;  %v1734_v63 = vsel %vm731_vm8, %v1729_v44, %v1725_v26 }
 0x596   : > { %1956 = vmatprep.subr.mxu0 %v1821_v59  ;;  %v1787_v13 = vpop.permute.xlu1 %1786  ;;  %v1732_v59 = vsel %vm731_vm8, %v1725_v26, %v1729_v44  ;;  %v1736_v51 = vmul.f32 %v1734_v63, %v3492_v22 }
 0x597   : > { %1957 = vmatpush1.msra.mxu0 %v1820_v20 }
 0x598   : > { %v1791_v61 = vpop.permute.xlu0 %1790  ;;  %1958 = vmatprep.subr.mxu0 %v4008_v62 }
 0x599   : > { %v1793_v12 = vsel %vm797_vm5, %v1787_v13, %v1791_v61  ;;  %v1795_v50 = vsel %vm797_vm5, %v1791_v61, %v1787_v13  ;;  %1959 = vmatpush1.msra.mxu0 %v4006_v11  ;;  %v1772_v11 = vsel %vm775_vm6, %v4066_v4, %v4068_v18 }
 0x59a   : > { %v1798_v6 = vmul.f32 %v1795_v50, %v3452_v3  ;;  %v1799_v14 = vmul.f32 %v1793_v12, %v3448_v0  ;;  %1960 = vmatprep.subr.mxu0 %v3962_v5  ;;  %v1767_v62 = vpop.permute.xlu1 %1766  ;;  %v1777_v35 = vmul.f32 %v1772_v11, %v3463_v7  ;;  %v1737_v12 = vmul.f32 %v1732_v59, %v3495_v23 }
 0x59b   : > { %1961 = vmatpush1.msra.mxu0 %v3960_v2  ;;  %v1774_v2 = vsel %vm775_vm6, %v4068_v18, %v4066_v4 }
 0x59c   : > { %v1771_v10 = vpop.permute.xlu0 %1770  ;;  %1962 = vmatprep.subr.mxu0 %v1799_v14  ;;  %v1776_v39 = vmul.f32 %v1774_v2, %v3466_v8  ;;  %v1891_v2 = vld [vmem:[%s4670_s10 + $0x18] sm:$0xff] }
 0x59d   : > { %v1773_v38 = vsel %vm775_vm6, %v1767_v62, %v1771_v10  ;;  %v1775_v5 = vsel %vm775_vm6, %v1771_v10, %v1767_v62  ;;  %1963 = vmatpush1.msra.mxu0 %v1798_v6 }
 0x59e   : > { %v1778_v45 = vmul.f32 %v1775_v5, %v3466_v8  ;;  %v1779_v25 = vmul.f32 %v1773_v38, %v3463_v7  ;;  %1964 = vmatprep.subr.mxu0 %v1797_v27  ;;  %v1747_v36 = vpop.permute.xlu1 %1746  ;;  %v1888_v5 = vld [vmem:[%s4670_s10] sm:$0xff] }
 0x59f   : > { %1965 = vmatpush1.msra.mxu0 %v1796_v21 }
 0x5a0   : > { %v1751_v29 = vpop.permute.xlu0 %1750  ;;  %1966 = vmatprep.subr.mxu0 %v1779_v25  ;;  %v1701_v25 = vpop.f32.mrf.mxu1 }
 0x5a1   : > { %v1753_v4 = vsel %vm753_vm7, %v1747_v36, %v1751_v29  ;;  %v1755_v18 = vsel %vm753_vm7, %v1751_v29, %v1747_v36  ;;  %1967 = vmatpush1.msra.mxu0 %v1778_v45  ;;  %v1890_v45 = vld [vmem:[%s4670_s10 + $0x10] sm:$0xff]  ;;  %v1367_v36 = vpop.f32.mrf.mxu0 }
 0x5a2   : > { %v1758_v28 = vmul.f32 %v1755_v18, %v3482_v19  ;;  %v1759_v30 = vmul.f32 %v1753_v4, %v3478_v17  ;;  %1968 = vmatprep.subr.mxu0 %v1777_v35  ;;  %v1727_v60 = vpop.permute.xlu1 %1726  ;;  %v1703_v35 = vpop.f32.mrf.mxu1 }
 0x5a3   : > { %1969 = vmatpush1.msra.mxu0 %v1776_v39  ;;  %v1369_v40 = vpop.f32.mrf.mxu0 }
 0x5a4   : > { %v1731_v16 = vpop.permute.xlu0 %1730  ;;  %1970 = vmatprep.subr.mxu0 %v1759_v30 }
 0x5a5   : > { %v1733_v20 = vsel %vm731_vm8, %v1727_v60, %v1731_v16  ;;  %v1735_v43 = vsel %vm731_vm8, %v1731_v16, %v1727_v60  ;;  %1971 = vmatpush1.msra.mxu0 %v1758_v28 }
 0x5a6   : > { %v1738_v13 = vmul.f32 %v1735_v43, %v3492_v22  ;;  %v1739_v61 = vmul.f32 %v1733_v20, %v3495_v23  ;;  %1972 = vmatprep.subr.mxu0 %v1757_v31  ;;  %v1871_v47 = vpop.permute.xlu1 %1870  ;;  %v1928_v43 = vld [vmem:[%s4671_s11] sm:$0xff] }
 0x5a7   : > { %1973 = vmatpush1.msra.mxu0 %v1756_v56 }
 0x5a8   : > { %v1875_v50 = vpop.permute.xlu0 %1874  ;;  %1974 = vmatprep.subr.mxu0 %v1739_v61 }
 0x5a9   : > { %v1877_v6 = vsel %vm887_vm2, %v1871_v47, %v1875_v50  ;;  %v1879_v14 = vsel %vm887_vm2, %v1875_v50, %v1871_v47  ;;  %1975 = vmatpush1.msra.mxu0 %v1738_v13 }
 0x5aa   : > { %v1882_v26 = vmul.f32 %v1877_v6, %v3388_v32  ;;  %v1883_v44 = vmul.f32 %v1879_v14, %v3391_v33  ;;  %1976 = vmatprep.subr.mxu0 %v1737_v12  ;;  %v1869_v62 = vpop.permute.xlu1 %1868 }
 0x5ab   : > { %1977 = vmatpush1.msra.mxu0 %v1736_v51 }
 0x5ac   : > { %v1873_v10 = vpop.permute.xlu0 %1872  ;;  %2006 = vmatprep.subr.mxu0 %v1883_v44 }
 0x5ad   : > { %v1876_v27 = vsel %vm887_vm2, %v1869_v62, %v1873_v10  ;;  %v1878_v21 = vsel %vm887_vm2, %v1873_v10, %v1869_v62  ;;  %2007 = vmatpush2.msra.mxu0 %v1882_v26 }
 0x5ae   : > { %v1880_v11 = vmul.f32 %v1876_v27, %v3388_v32  ;;  %v1881_v38 = vmul.f32 %v1878_v21, %v3391_v33 }
 0x5b0   : > { %2008 = vmatprep.subr.mxu0 %v1881_v38 }
 0x5b1   : > { %2009 = vmatpush2.msra.mxu0 %v1880_v11  ;;  %v1596_v11 = vld [vmem:[%s4669_s9] sm:$0xff] }
 0x5b2   : > { %2011 = vmatmul.mubr.f32.vlgmr.msra.gmra.mxu0 %v1888_v5  ;;  %2996 = vmatprep.subr.mxu0 %v3141_v1 }
 0x5b3   : > { %2973 = vmatprep.mubr.msk.f32.mxu0 %vm1279_vm10, %v1891_v2 }
 0x5b6   : > { %2017 = vmatmul.mubr.f32.gmra.mxu0 %v1890_v45 }
 0x5b7   : > { %v1938_v29 = vpop.permute.xlu1 %1937  ;;  %3004 = vmatprep.mubr.msk.f32.mxu0 %vm3151_vm11, %v3141_v1 }
 0x5b9   : > { %v1612_v39 = vpop.permute.xlu0 %1611 }
 0x5ba   : > { %v1702_v4 = vadd.f32 %v1701_v25, %v1612_v39  ;;  %v1704_v18 = vadd.f32 %v1703_v35, %v1612_v39  ;;  %v2056_v39 = vld [vmem:[%s4672_s12] sm:$0xff] }
 0x5bb   : > { %v1277_v41 = vpop.permute.xlu1 %1276 }
 0x5bc   : > { %v1710_v28 = vmax.f32 %v1702_v4, 0.0  ;;  %v1711_v30 = vmax.f32 %v1704_v18, 0.0  ;;  %v1368_v60 = vadd.f32 %v1367_v36, %v1277_v41  ;;  %v1370_v16 = vadd.f32 %v1369_v40, %v1277_v41  ;;  %v2133_v40 = vld [vmem:[%s4674_s14] sm:$0xff] }
 0x5bd   : > { %v942_v61 = vpop.permute.xlu0 %941  ;;  %3009 = vmatprep.mubr.msk.f32.mxu1 %vm615_vm0, %v2133_v40  ;;  %v2057_v4 = vld [vmem:[%s4673_s13] sm:$0xff] }
 0x5be   : > { %v1376_v31 = vmax.f32 %v1368_v60, 0.0  ;;  %v1377_v56 = vmax.f32 %v1370_v16, 0.0  ;;  %v2045_v59 = vadd.f32 %v1711_v30, %v1710_v28  ;;  %v1033_v51 = vadd.f32 %v3770_v48, %v942_v61  ;;  %v1261_v48 = vld [vmem:[%s4667_s7] sm:$0xff]  ;;  %v2134_v60 = vld [vmem:[%s4674_s14 + $0x8] sm:$0xff]  ;;  %v2136_v16 = vld [vmem:[%s4674_s14 + $0x18] sm:$0xff] }
 0x5bf   : > { %v1035_v6 = vadd.f32 %v3772_v49, %v942_v61  ;;  %v926_v49 = vld [vmem:[%s4665_s5] sm:$0xff] }
 0x5c0   : > { %2046 = vadd.xlane.f32.xlu0 %v2045_v59  ;;  %v2042_v20 = vadd.f32 %v1377_v56, %v1376_v31  ;;  %v1041_v62 = vmax.f32 %v1033_v51, 0.0  ;;  %v2137_v56 = vld [vmem:[%s4675_s15] sm:$0xff]  ;;  %v2138_v59 = vld [vmem:[%s4675_s15 + $0x8] sm:$0xff] }
 0x5c1   : > { %v1042_v10 = vmax.f32 %v1035_v6, 0.0 }
 0x5c3   : > { %v2039_v21 = vadd.f32 %v1042_v10, %v1041_v62 }
 0x5c4   : > { %2043 = vadd.xlane.f32.xlu0 %v2042_v20 }
 0x5da   : > { %1932 = vperm.xlu0 %3065, %v1928_v43   ;;  %v2140_v43 = vld [vmem:[%s4675_s15 + $0x18] sm:$0xff] }
 0x649   : > { %v2047_v38 = vpop.xlane.xlu0 %2046 }
 0x64a   : > { %v2054_v25 = vmul.f32 0.00390625, %v2047_v38 }
 0x64d   : > { %v2044_v45 = vpop.xlane.xlu0 %2043 }
 0x672   : > { %v4196_v63 = vpop.f32.mrf.mxu0 }
 0x674   : > { %v4198_v13 = vpop.f32.mrf.mxu0 }
 0x676   : > { %v2018_v47 = vpop.f32.mrf.mxu0 }
 0x677   : > { %v2019_v12 = vadd.f32 %v2018_v47, %v1938_v29 }
 0x678   : > { %v2020_v50 = vpop.f32.mrf.mxu0 }
 0x679   : > { %v2021_v14 = vadd.f32 %v2020_v50, %v1938_v29  ;;  %v2025_v26 = vmax.f32 %v2019_v12, 0.0  ;;  %v2053_v29 = vmul.f32 0.00390625, %v2044_v45  ;;  %v2139_v12 = vld [vmem:[%s4675_s15 + $0x10] sm:$0xff] }
 0x67b   : > { %v2026_v44 = vmax.f32 %v2021_v14, 0.0 }
 0x67d   : > { %v2048_v27 = vadd.f32 %v2026_v44, %v2025_v26 }
 0x67f   : > { %2049 = vadd.xlane.f32.xlu1 %v2048_v27 }
 0x683   : > { %2040 = vadd.xlane.f32.xlu1 %v2039_v21 }
 0x694   : > { %1601 = vperm.xlu1 %3066, %v1596_v11  }
 0x698   : > { %1266 = vperm.xlu1 %3066, %v1261_v48  }
 0x69c   : > { %931 = vperm.xlu1 %3066, %v926_v49  }
 0x708   : > { %v2050_v5 = vpop.xlane.xlu1 %2049 }
 0x709   : > { %v2055_v2 = vmul.f32 0.00390625, %v2050_v5 }
 0x70b   : > { %2997 = vmatpush3.msra.mxu0 %v2055_v2 }
 0x70c   : > { %2998 = vmatprep.subr.mxu0 %v3141_v1  ;;  %v2041_v36 = vpop.xlane.xlu1 %2040 }
 0x70d   : > { %2999 = vmatpush3.msra.mxu0 %v2054_v25  ;;  %v2052_v35 = vmul.f32 0.00390625, %v2041_v36 }
 0x70e   : > { %3000 = vmatprep.subr.mxu0 %v3141_v1 }
 0x70f   : > { %3001 = vmatpush3.msra.mxu0 %v2053_v29 }
 0x710   : > { %3002 = vmatprep.subr.mxu0 %v3141_v1 }
 0x711   : > { %3003 = vmatpush3.msra.mxu0 %v2052_v35 }
 0x712   : > { %3005 = vmatmul.mubr.msk.f32.vlgmr.msra.gmra.mxu0 %vm2058_vm12, %v2056_v39 }
 0x713   : > { %2865 = vmatprep.mubr.f32.mxu0 %v3141_v1  ;;  %v2135_v1 = vld [vmem:[%s4674_s14 + $0x10] sm:$0xff] }
 0x7d2   : > { %v2128_v18 = vpop.f32.mrf.mxu0 }
 0x7d3   : > { %v2129_v41 = vadd.f32 %v2128_v18, %v2057_v4 }
 0x7d4   : > { %v3006_v28 = vpop.f32.mrf.mxu0 }
 0x7d5   : > { %v2132_v30 = vmax.f32 %v2129_v41, 0.0 }
 0x7d7   : > { %3007 = vmatprep.subr.mxu1 %v2132_v30 }
 0x7d8   : > { %3008 = vmatpush3.msra.mxu1 %v2132_v30 }
 0x7d9   : > { %3010 = vmatmul.mubr.msk.f32.vlgmr.msra.gmra.mxu1 %vm615_vm0, %v2134_v60 }
 0x7da   : > { %3012 = vmatprep.mubr.msk.f32.mxu1 %vm615_vm0, %v2135_v1 }
 0x7dd   : > { %3013 = vmatmul.mubr.msk.f32.gmra.mxu1 %vm615_vm0, %v2136_v16 }
 0x899   : > { %v3011_v31 = vpop.f32.mrf.mxu1 }
 0x89a   : > { %v2225_v50 = vadd.f32 %v3011_v31, %v2138_v59 }
 0x89b   : > { %v2219_v20 = vpop.f32.mrf.mxu1 }
 0x89c   : > { %v2220_v61 = vadd.f32 %v2219_v20, %v2137_v56  ;;  %v2240_v44 = vsel %vm2238_vm13, %v2225_v50, -inf }
 0x89d   : > { %v3014_v47 = vpop.f32.mrf.mxu1 }
 0x89e   : > { %v2235_v51 = vadd.f32 %v3014_v47, %v2140_v43  ;;  %v2239_v14 = vsel %vm2238_vm13, %v2220_v61, -inf }
 0x89f   : > { %v2229_v6 = vpop.f32.mrf.mxu1  ;;  %v2243_v27 = vmax.f32 %v2239_v14, %v2240_v44 }
 0x8a0   : > { %v2230_v26 = vadd.f32 %v2229_v6, %v2139_v12  ;;  %v2242_v62 = vsel %vm2238_vm13, %v2235_v51, -inf }
 0x8a2   : > { %v2241_v10 = vsel %vm2238_vm13, %v2230_v26, -inf }
 0x8a3   : > { %v2244_v21 = vmax.f32 %v2241_v10, %v2242_v62 }
 0x8a5   : > { %v2245_v11 = vmax.f32 %v2243_v27, %v2244_v21  ;;  %v1602_v27 = vpop.permute.xlu1 %1601  ;;  %v1933_v21 = vpop.permute.xlu0 %1932 }
 0x8a7   : > { %v2246_v48 = vrot.slane %v2245_v11, 4 }
 0x8a9   : > { %v2247_v49 = vmax.f32 %v2245_v11, %v2246_v48  ;;  %v2013_v11 = vadd.f32 %v4196_v63, %v1933_v21  ;;  %v2015_v48 = vadd.f32 %v4198_v13, %v1933_v21 }
 0x8ab   : > { %v2248_v38 = vrot.slane %v2247_v49, 2 }
 0x8ad   : > { %v2249_v5 = vmax.f32 %v2247_v49, %v2248_v38  ;;  %v1267_v49 = vpop.permute.xlu1 %1266  ;;  %v2023_v38 = vmax.f32 %v2013_v11, 0.0 }
 0x8ae   : > { %v1358_v63 = vadd.f32 %v3776_v58, %v1267_v49 }
 0x8af   : > { %v2250_v2 = vrot.slane %v2249_v5, 1 }
 0x8b1   : > { %v2251_v45 = vmax.f32 %v2249_v5, %v2250_v2  ;;  %v2024_v5 = vmax.f32 %v2015_v48, 0.0  ;;  %v1690_v2 = vadd.f32 %v4002_v15, %v1602_v27 }
 0x8b3   : > { %v2252_v25 = vsub.f32 %v2220_v61, %v2251_v45  ;;  %v2253_v36 = vsub.f32 %v2225_v50, %v2251_v45  ;;  %v2254_v29 = vsub.f32 %v2230_v26, %v2251_v45  ;;  %v2255_v35 = vsub.f32 %v2235_v51, %v2251_v45 }
 0x8b4   : > { %v1692_v45 = vadd.f32 %v4004_v9, %v1602_v27 }
 0x8b5   : > { %v2256_v39 = vmul.f32 1.442695, %v2252_v25  ;;  %v2258_v40 = vmul.f32 1.442695, %v2253_v36  ;;  %v2260_v4 = vmul.f32 1.442695, %v2254_v29 }
 0x8b6   : > { %v2262_v18 = vmul.f32 1.442695, %v2255_v35  ;;  %v932_v35 = vpop.permute.xlu1 %931 }
 0x8b7   : > { %3067 = vpow2.f32 %v2256_v39  ;;  %v1706_v39 = vmax.f32 %v1690_v2, 0.0 }
 0x8b8   : > { %3069 = vpow2.f32 %v2258_v40  ;;  %v1707_v40 = vmax.f32 %v1692_v45, 0.0 }
 0x8b9   : > { %3071 = vpow2.f32 %v2260_v4  ;;  %v1356_v4 = vadd.f32 %v3774_v57, %v1267_v49  ;;  %v1023_v57 = vadd.f32 %v3554_v55, %v932_v35  ;;  %v2721_v49 = vld [vmem:[%s4677_s17] sm:$0xff] }
 0x8ba   : > { %3073 = vpow2.f32 %v2262_v18 }
 0x8c4   : > { %v3068_v41 = vpop.eup %3067 }
 0x8c5   : > { %v3070_v28 = vpop.eup %3069  ;;  %v2264_v30 = vsel %vm2238_vm13, %v3068_v41, 0.0 }
 0x8c6   : > { %v3072_v60 = vpop.eup %3071  ;;  %v2265_v1 = vsel %vm2238_vm13, %v3070_v28, 0.0 }
 0x8c7   : > { %v3074_v16 = vpop.eup %3073  ;;  %v2266_v31 = vadd.f32 %v2265_v1, %v2264_v30  ;;  %v2267_v56 = vsel %vm2238_vm13, %v3072_v60, 0.0  ;;  %v1021_v30 = vadd.f32 %v3552_v53, %v932_v35 }
 0x8c8   : > { %v2269_v20 = vsel %vm2238_vm13, %v3074_v16, 0.0 }
 0x8c9   : > { %v2268_v59 = vadd.f32 %v2267_v56, %v2266_v31  ;;  %v1038_v31 = vmax.f32 %v1023_v57, 0.0  ;;  %v2647_v56 = vld [vmem:[%s4676_s16 + $0x8] sm:$0xff] }
 0x8ca   : > { %2794 = vmatprep.mubr.f32.mxu1 %v2647_v56 }
 0x8cb   : > { %v2270_v43 = vadd.f32 %v2269_v20, %v2268_v59 }
 0x8cd   : > { %v2271_v61 = vrot.slane %v2270_v43, 4 }
 0x8cf   : > { %v2272_v47 = vadd.f32 %v2271_v61, %v2270_v43 }
 0x8d1   : > { %v2273_v12 = vrot.slane %v2272_v47, 2 }
 0x8d3   : > { %v2274_v50 = vadd.f32 %v2273_v12, %v2272_v47 }
 0x8d5   : > { %v2275_v51 = vrot.slane %v2274_v50, 1 }
 0x8d7   : > { %v2276_v6 = vadd.f32 %v2275_v51, %v2274_v50 }
 0x8d9   : > { %3075 = vrcp.f32 %v2276_v6 }
 0x8e6   : > { %v3076_v14 = vpop.eup %3075 }
 0x8e7   : > { %v2281_v26 = vmul.f32 %v3076_v14, %v3074_v16  ;;  %v2279_v44 = vmul.f32 %v3076_v14, %v3070_v28  ;;  %v2280_v62 = vmul.f32 %v3076_v14, %v3072_v60  ;;  %v2278_v10 = vmul.f32 %v3076_v14, %v3068_v41 }
 0x8e8   : > { %v1372_v41 = vmax.f32 %v1356_v4, 0.0  ;;  %v1373_v28 = vmax.f32 %v1358_v63, 0.0  ;;  %v1037_v16 = vmax.f32 %v1021_v30, 0.0 }
 0x8e9   : > { %2307 = vperm.xlu0 %3065, %v2281_v26   ;;  %2297 = vperm.xlu1 %3066, %v2279_v44  }
 0x8ed   : > { %2302 = vperm.xlu0 %3065, %v2280_v62  }
 0x8f1   : > { %2292 = vperm.xlu0 %3065, %v2278_v10  }
 0x964   : > { %v2308_v25 = vpop.permute.xlu0 %2307  ;;  %v2298_v18 = vpop.permute.xlu1 %2297 }
 0x965   : > { %v4263_v36 = vmul.f32 %v2308_v25, %v2023_v38  ;;  %v4265_v29 = vmul.f32 %v2308_v25, %v2024_v5  ;;  %v4283_v58 = vmul.f32 %v2298_v18, %v1372_v41  ;;  %v4285_v60 = vmul.f32 %v2298_v18, %v1373_v28 }
 0x967   : > { %2444 = vrot.lane.b32.xlu1 %v4263_v36, %s4732_s21  ;;  %2452 = vrot.lane.b32.xlu0 %v4265_v29, %s4732_s21 }
 0x968   : > { %v2303_v15 = vpop.permute.xlu0 %2302 }
 0x969   : > { %v4273_v9 = vmul.f32 %v2303_v15, %v1706_v39  ;;  %v4275_v13 = vmul.f32 %v2303_v15, %v1707_v40 }
 0x96b   : > { %2450 = vrot.lane.b32.xlu0 %v4275_v13, %s4732_s21  ;;  %2442 = vrot.lane.b32.xlu1 %v4273_v9, %s4732_s21 }
 0x96c   : > { %v2293_v1 = vpop.permute.xlu0 %2292 }
 0x96d   : > { %v4291_v53 = vmul.f32 %v2293_v1, %v1037_v16  ;;  %v4293_v55 = vmul.f32 %v2293_v1, %v1038_v31 }
 0x96f   : > { %2448 = vrot.lane.b32.xlu0 %v4285_v60, %s4732_s21  ;;  %2440 = vrot.lane.b32.xlu1 %v4283_v58, %s4732_s21 }
 0x973   : > { %2446 = vrot.lane.b32.xlu0 %v4293_v55, %s4732_s21  ;;  %2438 = vrot.lane.b32.xlu1 %v4291_v53, %s4732_s21  ;;  %s4740_s21 = sld [smem:[#allocation22_spill]] }
 0x977   : > { %2412 = vrot.lane.b32.xlu0 %v4265_v29, %s4733_s25  ;;  %2404 = vrot.lane.b32.xlu1 %v4263_v36, %s4733_s25 }
 0x97b   : > { %2410 = vrot.lane.b32.xlu0 %v4275_v13, %s4733_s25  ;;  %2402 = vrot.lane.b32.xlu1 %v4273_v9, %s4733_s25 }
 0x97f   : > { %2408 = vrot.lane.b32.xlu0 %v4285_v60, %s4733_s25  ;;  %2400 = vrot.lane.b32.xlu1 %v4283_v58, %s4733_s25 }
 0x983   : > { %2406 = vrot.lane.b32.xlu0 %v4293_v55, %s4733_s25  ;;  %2398 = vrot.lane.b32.xlu1 %v4291_v53, %s4733_s25  ;;  %s2879_s25 = scalar_lea.sflag [#allocation7], %s567_s27 }
 0x987   : > { %2372 = vrot.lane.b32.xlu0 %v4265_v29, %s4734_s26  ;;  %2364 = vrot.lane.b32.xlu1 %v4263_v36, %s4734_s26 }
 0x98b   : > { %2370 = vrot.lane.b32.xlu0 %v4275_v13, %s4734_s26  ;;  %2362 = vrot.lane.b32.xlu1 %v4273_v9, %s4734_s26 }
 0x98f   : > { %2368 = vrot.lane.b32.xlu0 %v4285_v60, %s4734_s26  ;;  %2360 = vrot.lane.b32.xlu1 %v4283_v58, %s4734_s26 }
 0x993   : > { %2366 = vrot.lane.b32.xlu0 %v4293_v55, %s4734_s26  ;;  %2358 = vrot.lane.b32.xlu1 %v4291_v53, %s4734_s26  ;;  %s3079_s26 = scalar_lea.vmem %s2894_s3, 256 }
 0x994   : > { %p3080_p11 = scmp.ne.s32.totalorder %s2894_s3, %s3079_s26 }
 0x996   : > { %p3081_p12 = pnand %p3080_p11, %p3286_p5 }
 0x997   : > { %2332 = vrot.lane.b32.xlu0 %v4265_v29, %s4735_s24  ;;  %2324 = vrot.lane.b32.xlu1 %v4263_v36, %s4735_s24 }
 0x998   : > { %p3082_p13 = pneg %p3081_p12 }
 0x99b   : > { %2330 = vrot.lane.b32.xlu0 %v4275_v13, %s4735_s24  ;;  %2322 = vrot.lane.b32.xlu1 %v4273_v9, %s4735_s24 }
 0x99f   : > { %2328 = vrot.lane.b32.xlu0 %v4285_v60, %s4735_s24  ;;  %2320 = vrot.lane.b32.xlu1 %v4283_v58, %s4735_s24 }
 0x9a3   : > { %2326 = vrot.lane.b32.xlu0 %v4293_v55, %s4735_s24  ;;  %2318 = vrot.lane.b32.xlu1 %v4291_v53, %s4735_s24  ;;  %s3152_s24 = smov [#allocation6]  }
 0x9a7   : > { %2580 = vrot.lane.b32.xlu0 %v4265_v29, %s4737_s4  ;;  %2572 = vrot.lane.b32.xlu1 %v4263_v36, %s4737_s4 }
 0x9ab   : > { %2578 = vrot.lane.b32.xlu0 %v4275_v13, %s4737_s4  ;;  %2570 = vrot.lane.b32.xlu1 %v4273_v9, %s4737_s4 }
 0x9af   : > { %2576 = vrot.lane.b32.xlu0 %v4285_v60, %s4737_s4  ;;  %2568 = vrot.lane.b32.xlu1 %v4283_v58, %s4737_s4 }
 0x9b3   : > { %2574 = vrot.lane.b32.xlu0 %v4293_v55, %s4737_s4  ;;  %2566 = vrot.lane.b32.xlu1 %v4291_v53, %s4737_s4 }
 0x9b7   : > { %2540 = vrot.lane.b32.xlu0 %v4265_v29, %s4730_s19  ;;  %2532 = vrot.lane.b32.xlu1 %v4263_v36, %s4730_s19 }
 0x9bb   : > { %2538 = vrot.lane.b32.xlu0 %v4275_v13, %s4730_s19  ;;  %2530 = vrot.lane.b32.xlu1 %v4273_v9, %s4730_s19 }
 0x9bf   : > { %2536 = vrot.lane.b32.xlu0 %v4285_v60, %s4730_s19  ;;  %2528 = vrot.lane.b32.xlu1 %v4283_v58, %s4730_s19 }
 0x9c3   : > { %2534 = vrot.lane.b32.xlu0 %v4293_v55, %s4730_s19  ;;  %2526 = vrot.lane.b32.xlu1 %v4291_v53, %s4730_s19 }
 0x9c7   : > { %2500 = vrot.lane.b32.xlu0 %v4265_v29, %s4731_s20  ;;  %2492 = vrot.lane.b32.xlu1 %v4263_v36, %s4731_s20 }
 0x9cb   : > { %2498 = vrot.lane.b32.xlu0 %v4275_v13, %s4731_s20  ;;  %2490 = vrot.lane.b32.xlu1 %v4273_v9, %s4731_s20 }
 0x9cf   : > { %2496 = vrot.lane.b32.xlu0 %v4285_v60, %s4731_s20  ;;  %2488 = vrot.lane.b32.xlu1 %v4283_v58, %s4731_s20 }
 0x9d3   : > { %2494 = vrot.lane.b32.xlu0 %v4293_v55, %s4731_s20  ;;  %2486 = vrot.lane.b32.xlu1 %v4291_v53, %s4731_s20  ;;  %s2891_s20 = scalar_lea.hbm %s4740_s21, %s2985_s0 }
 0x9d7   : > { %2620 = vrot.lane.b32.xlu0 %v4265_v29, %s4736_s1  ;;  %2612 = vrot.lane.b32.xlu1 %v4263_v36, %s4736_s1 }
 0x9d9   : > { %v2453_v59 = vpop.permute.xlu0 %2452  ;;  %v2445_v20 = vpop.permute.xlu1 %2444 }
 0x9da   : > { %v2457_v43 = vsel %vm797_vm5, %v2445_v20, %v2453_v59  ;;  %v2461_v61 = vsel %vm797_vm5, %v2453_v59, %v2445_v20 }
 0x9db   : > { %v2468_v47 = vmul.f32 %v2461_v61, %v3452_v3  ;;  %v2469_v12 = vmul.f32 %v2457_v43, %v3448_v0  ;;  %2618 = vrot.lane.b32.xlu0 %v4275_v13, %s4736_s1  ;;  %2610 = vrot.lane.b32.xlu1 %v4273_v9, %s4736_s1 }
 0x9dd   : > { %v2451_v50 = vpop.permute.xlu0 %2450  ;;  %2730 = vmatprep.subr.mxu1 %v2469_v12  ;;  %v2443_v51 = vpop.permute.xlu1 %2442 }
 0x9de   : > { %v2456_v6 = vsel %vm797_vm5, %v2443_v51, %v2451_v50  ;;  %v2460_v14 = vsel %vm797_vm5, %v2451_v50, %v2443_v51  ;;  %2731 = vmatpush1.msra.mxu1 %v2468_v47 }
 0x9df   : > { %v2466_v26 = vmul.f32 %v2460_v14, %v3452_v3  ;;  %v2467_v44 = vmul.f32 %v2456_v6, %v3448_v0  ;;  %2616 = vrot.lane.b32.xlu0 %v4285_v60, %s4736_s1  ;;  %2608 = vrot.lane.b32.xlu1 %v4283_v58, %s4736_s1 }
 0x9e1   : > { %v2449_v62 = vpop.permute.xlu0 %2448  ;;  %2732 = vmatprep.subr.mxu1 %v2467_v44  ;;  %v2441_v10 = vpop.permute.xlu1 %2440 }
 0x9e2   : > { %v2455_v27 = vsel %vm797_vm5, %v2441_v10, %v2449_v62  ;;  %v2459_v21 = vsel %vm797_vm5, %v2449_v62, %v2441_v10  ;;  %2733 = vmatpush1.msra.mxu1 %v2466_v26 }
 0x9e3   : > { %v2464_v11 = vmul.f32 %v2459_v21, %v3452_v3  ;;  %v2465_v48 = vmul.f32 %v2455_v27, %v3448_v0  ;;  %2614 = vrot.lane.b32.xlu0 %v4293_v55, %s4736_s1  ;;  %2606 = vrot.lane.b32.xlu1 %v4291_v53, %s4736_s1  ;;  %s3083_s1 = sshll.u32 %s3152_s24, 4  ;;  %s3084_s1 = int_to_ptr.vmem [resolvable:$false] %s3083_s1 }
 0x9e4   : > { %s3085_s4 = scalar_lea.vmem %s3084_s1, 512  ;;  %p3086_p0 = scmp.lt.s32.totalorder %s2894_s3, %s3084_s1 }
 0x9e5   : > { %v2447_v38 = vpop.permute.xlu0 %2446  ;;  %2734 = vmatprep.subr.mxu1 %v2465_v48  ;;  %v2439_v5 = vpop.permute.xlu1 %2438  ;;  %p3087_p1 = scmp.lt.s32.totalorder %s3085_s4, %s3079_s26 }
 0x9e6   : > { %v2454_v2 = vsel %vm797_vm5, %v2439_v5, %v2447_v38  ;;  %v2458_v45 = vsel %vm797_vm5, %v2447_v38, %v2439_v5  ;;  %2735 = vmatpush1.msra.mxu1 %v2464_v11 }
 0x9e7   : > { %v2462_v25 = vmul.f32 %v2458_v45, %v3452_v3  ;;  %v2463_v35 = vmul.f32 %v2454_v2, %v3448_v0  ;;  %2724 = vperm.xlu1 %3066, %v2721_v49   ;;  %p3088_p2 = por %p3087_p1, %p3086_p0 }
 0x9e9   : > { %v2413_v39 = vpop.permute.xlu0 %2412  ;;  %2736 = vmatprep.subr.mxu1 %v2463_v35  ;;  %v2405_v40 = vpop.permute.xlu1 %2404  ;;  %p3089_p3 = pnand %p3088_p2, %p3082_p13 }
 0x9ea   : > { %v2417_v4 = vsel %vm775_vm6, %v2405_v40, %v2413_v39  ;;  %v2421_v63 = vsel %vm775_vm6, %v2413_v39, %v2405_v40  ;;  %2737 = vmatpush1.msra.mxu1 %v2462_v25 }
 0x9eb   : > { %v2428_v15 = vmul.f32 %v2421_v63, %v3466_v8  ;;  %v2429_v18 = vmul.f32 %v2417_v4, %v3463_v7 }
 0x9ed   : > { %v2411_v41 = vpop.permute.xlu0 %2410  ;;  %2738 = vmatprep.subr.mxu1 %v2429_v18  ;;  %v2403_v3 = vpop.permute.xlu1 %2402 }
 0x9ee   : > { %v2416_v0 = vsel %vm775_vm6, %v2403_v3, %v2411_v41  ;;  %v2420_v28 = vsel %vm775_vm6, %v2411_v41, %v2403_v3  ;;  %2739 = vmatpush1.msra.mxu1 %v2428_v15 }
 0x9ef   : > { %v2426_v30 = vmul.f32 %v2420_v28, %v3466_v8  ;;  %v2427_v57 = vmul.f32 %v2416_v0, %v3463_v7 }
 0x9f1   : > { %v2409_v1 = vpop.permute.xlu0 %2408  ;;  %2740 = vmatprep.subr.mxu1 %v2427_v57  ;;  %v2401_v16 = vpop.permute.xlu1 %2400 }
 0x9f2   : > { %v2415_v31 = vsel %vm775_vm6, %v2401_v16, %v2409_v1  ;;  %v2419_v56 = vsel %vm775_vm6, %v2409_v1, %v2401_v16  ;;  %2741 = vmatpush1.msra.mxu1 %v2426_v30 }
 0x9f3   : > { %v2424_v59 = vmul.f32 %v2419_v56, %v3466_v8  ;;  %v2425_v20 = vmul.f32 %v2415_v31, %v3463_v7 }
 0x9f5   : > { %v2407_v43 = vpop.permute.xlu0 %2406  ;;  %2742 = vmatprep.subr.mxu1 %v2425_v20  ;;  %v2399_v61 = vpop.permute.xlu1 %2398 }
 0x9f6   : > { %v2414_v47 = vsel %vm775_vm6, %v2399_v61, %v2407_v43  ;;  %v2418_v12 = vsel %vm775_vm6, %v2407_v43, %v2399_v61  ;;  %2743 = vmatpush1.msra.mxu1 %v2424_v59 }
 0x9f7   : > { %v2422_v50 = vmul.f32 %v2418_v12, %v3466_v8  ;;  %v2423_v51 = vmul.f32 %v2414_v47, %v3463_v7 }
 0x9f9   : > { %v2373_v6 = vpop.permute.xlu0 %2372  ;;  %2744 = vmatprep.subr.mxu1 %v2423_v51  ;;  %v2365_v14 = vpop.permute.xlu1 %2364 }
 0x9fa   : > { %v2377_v26 = vsel %vm753_vm7, %v2365_v14, %v2373_v6  ;;  %v2381_v44 = vsel %vm753_vm7, %v2373_v6, %v2365_v14  ;;  %2745 = vmatpush1.msra.mxu1 %v2422_v50 }
 0x9fb   : > { %v2388_v62 = vmul.f32 %v2381_v44, %v3482_v19  ;;  %v2389_v10 = vmul.f32 %v2377_v26, %v3478_v17 }
 0x9fd   : > { %v2371_v27 = vpop.permute.xlu0 %2370  ;;  %2746 = vmatprep.subr.mxu1 %v2389_v10  ;;  %v2363_v21 = vpop.permute.xlu1 %2362 }
 0x9fe   : > { %v2376_v7 = vsel %vm753_vm7, %v2363_v21, %v2371_v27  ;;  %v2380_v8 = vsel %vm753_vm7, %v2371_v27, %v2363_v21  ;;  %2747 = vmatpush1.msra.mxu1 %v2388_v62 }
 0x9ff   : > { %v2386_v11 = vmul.f32 %v2380_v8, %v3482_v19  ;;  %v2387_v48 = vmul.f32 %v2376_v7, %v3478_v17 }
 0xa01   : > { %v2369_v49 = vpop.permute.xlu0 %2368  ;;  %2748 = vmatprep.subr.mxu1 %v2387_v48  ;;  %v2361_v38 = vpop.permute.xlu1 %2360 }
 0xa02   : > { %v2375_v5 = vsel %vm753_vm7, %v2361_v38, %v2369_v49  ;;  %v2379_v2 = vsel %vm753_vm7, %v2369_v49, %v2361_v38  ;;  %2749 = vmatpush1.msra.mxu1 %v2386_v11 }
 0xa03   : > { %v2384_v45 = vmul.f32 %v2379_v2, %v3482_v19  ;;  %v2385_v25 = vmul.f32 %v2375_v5, %v3478_v17 }
 0xa05   : > { %v2367_v35 = vpop.permute.xlu0 %2366  ;;  %2750 = vmatprep.subr.mxu1 %v2385_v25  ;;  %v2359_v39 = vpop.permute.xlu1 %2358 }
 0xa06   : > { %v2374_v40 = vsel %vm753_vm7, %v2359_v39, %v2367_v35  ;;  %v2378_v4 = vsel %vm753_vm7, %v2367_v35, %v2359_v39  ;;  %2751 = vmatpush1.msra.mxu1 %v2384_v45 }
 0xa07   : > { %v2382_v63 = vmul.f32 %v2378_v4, %v3482_v19  ;;  %v2383_v15 = vmul.f32 %v2374_v40, %v3478_v17 }
 0xa09   : > { %v2333_v18 = vpop.permute.xlu0 %2332  ;;  %2752 = vmatprep.subr.mxu1 %v2383_v15  ;;  %v2325_v41 = vpop.permute.xlu1 %2324 }
 0xa0a   : > { %v2337_v3 = vsel %vm731_vm8, %v2325_v41, %v2333_v18  ;;  %v2341_v0 = vsel %vm731_vm8, %v2333_v18, %v2325_v41  ;;  %2753 = vmatpush1.msra.mxu1 %v2382_v63 }
 0xa0b   : > { %v2348_v28 = vmul.f32 %v2341_v0, %v3492_v22  ;;  %v2349_v30 = vmul.f32 %v2337_v3, %v3495_v23 }
 0xa0d   : > { %v2331_v57 = vpop.permute.xlu0 %2330  ;;  %2754 = vmatprep.subr.mxu1 %v2349_v30  ;;  %v2323_v1 = vpop.permute.xlu1 %2322 }
 0xa0e   : > { %v2336_v17 = vsel %vm731_vm8, %v2323_v1, %v2331_v57  ;;  %v2340_v19 = vsel %vm731_vm8, %v2331_v57, %v2323_v1  ;;  %2755 = vmatpush1.msra.mxu1 %v2348_v28 }
 0xa0f   : > { %v2346_v16 = vmul.f32 %v2340_v19, %v3492_v22  ;;  %v2347_v31 = vmul.f32 %v2336_v17, %v3495_v23 }
 0xa11   : > { %v2329_v56 = vpop.permute.xlu0 %2328  ;;  %2756 = vmatprep.subr.mxu1 %v2347_v31  ;;  %v2321_v59 = vpop.permute.xlu1 %2320 }
 0xa12   : > { %v2335_v20 = vsel %vm731_vm8, %v2321_v59, %v2329_v56  ;;  %v2339_v43 = vsel %vm731_vm8, %v2329_v56, %v2321_v59  ;;  %2757 = vmatpush1.msra.mxu1 %v2346_v16 }
 0xa13   : > { %v2344_v61 = vmul.f32 %v2339_v43, %v3492_v22  ;;  %v2345_v47 = vmul.f32 %v2335_v20, %v3495_v23 }
 0xa15   : > { %v2327_v12 = vpop.permute.xlu0 %2326  ;;  %2758 = vmatprep.subr.mxu1 %v2345_v47  ;;  %v2319_v50 = vpop.permute.xlu1 %2318 }
 0xa16   : > { %v2334_v51 = vsel %vm731_vm8, %v2319_v50, %v2327_v12  ;;  %v2338_v6 = vsel %vm731_vm8, %v2327_v12, %v2319_v50  ;;  %2759 = vmatpush1.msra.mxu1 %v2344_v61 }
 0xa17   : > { %v2342_v14 = vmul.f32 %v2338_v6, %v3492_v22  ;;  %v2343_v26 = vmul.f32 %v2334_v51, %v3495_v23 }
 0xa19   : > { %v2581_v44 = vpop.permute.xlu0 %2580  ;;  %2760 = vmatprep.subr.mxu1 %v2343_v26  ;;  %v2573_v62 = vpop.permute.xlu1 %2572 }
 0xa1a   : > { %v2585_v10 = vsel %vm865_vm1, %v2573_v62, %v2581_v44  ;;  %v2589_v27 = vsel %vm865_vm1, %v2581_v44, %v2573_v62  ;;  %2761 = vmatpush1.msra.mxu1 %v2342_v14 }
 0xa1b   : > { %v2596_v21 = vmul.f32 %v2585_v10, %v3394_v34  ;;  %v2597_v7 = vmul.f32 %v2589_v27, %v3398_v37 }
 0xa1d   : > { %v2579_v8 = vpop.permute.xlu0 %2578  ;;  %2762 = vmatprep.subr.mxu1 %v2597_v7  ;;  %v2571_v11 = vpop.permute.xlu1 %2570 }
 0xa1e   : > { %v2584_v22 = vsel %vm865_vm1, %v2571_v11, %v2579_v8  ;;  %v2588_v23 = vsel %vm865_vm1, %v2579_v8, %v2571_v11  ;;  %2763 = vmatpush2.msra.mxu1 %v2596_v21 }
 0xa1f   : > { %v2594_v48 = vmul.f32 %v2584_v22, %v3394_v34  ;;  %v2595_v49 = vmul.f32 %v2588_v23, %v3398_v37 }
 0xa21   : > { %v2577_v38 = vpop.permute.xlu0 %2576  ;;  %2764 = vmatprep.subr.mxu1 %v2595_v49  ;;  %v2569_v5 = vpop.permute.xlu1 %2568 }
 0xa22   : > { %v2583_v2 = vsel %vm865_vm1, %v2569_v5, %v2577_v38  ;;  %v2587_v45 = vsel %vm865_vm1, %v2577_v38, %v2569_v5  ;;  %2765 = vmatpush2.msra.mxu1 %v2594_v48 }
 0xa23   : > { %v2592_v25 = vmul.f32 %v2583_v2, %v3394_v34  ;;  %v2593_v35 = vmul.f32 %v2587_v45, %v3398_v37 }
 0xa25   : > { %v2575_v39 = vpop.permute.xlu0 %2574  ;;  %2766 = vmatprep.subr.mxu1 %v2593_v35  ;;  %v2567_v40 = vpop.permute.xlu1 %2566 }
 0xa26   : > { %v2582_v4 = vsel %vm865_vm1, %v2567_v40, %v2575_v39  ;;  %v2586_v63 = vsel %vm865_vm1, %v2575_v39, %v2567_v40  ;;  %2767 = vmatpush2.msra.mxu1 %v2592_v25 }
 0xa27   : > { %v2590_v15 = vmul.f32 %v2582_v4, %v3394_v34  ;;  %v2591_v18 = vmul.f32 %v2586_v63, %v3398_v37 }
 0xa29   : > { %v2541_v41 = vpop.permute.xlu0 %2540  ;;  %2768 = vmatprep.subr.mxu1 %v2591_v18  ;;  %v2533_v3 = vpop.permute.xlu1 %2532 }
 0xa2a   : > { %v2545_v0 = vsel %vm843_vm3, %v2533_v3, %v2541_v41  ;;  %v2549_v28 = vsel %vm843_vm3, %v2541_v41, %v2533_v3  ;;  %2769 = vmatpush2.msra.mxu1 %v2590_v15 }
 0xa2b   : > { %v2556_v30 = vmul.f32 %v2545_v0, %v3418_v46  ;;  %v2557_v57 = vmul.f32 %v2549_v28, %v3410_v42 }
 0xa2d   : > { %v2539_v1 = vpop.permute.xlu0 %2538  ;;  %2770 = vmatprep.subr.mxu1 %v2557_v57  ;;  %v2531_v17 = vpop.permute.xlu1 %2530 }
 0xa2e   : > { %v2544_v34 = vsel %vm843_vm3, %v2531_v17, %v2539_v1  ;;  %v2548_v37 = vsel %vm843_vm3, %v2539_v1, %v2531_v17  ;;  %2771 = vmatpush2.msra.mxu1 %v2556_v30 }
 0xa2f   : > { %v2554_v19 = vmul.f32 %v2544_v34, %v3418_v46  ;;  %v2555_v16 = vmul.f32 %v2548_v37, %v3410_v42 }
 0xa31   : > { %v2537_v31 = vpop.permute.xlu0 %2536  ;;  %2772 = vmatprep.subr.mxu1 %v2555_v16  ;;  %v2529_v56 = vpop.permute.xlu1 %2528 }
 0xa32   : > { %v2543_v59 = vsel %vm843_vm3, %v2529_v56, %v2537_v31  ;;  %v2547_v20 = vsel %vm843_vm3, %v2537_v31, %v2529_v56  ;;  %2773 = vmatpush2.msra.mxu1 %v2554_v19  ;;  %v2648_v31 = vld [vmem:[%s4676_s16 + $0x10] sm:$0xff] }
 0xa33   : > { %v2552_v43 = vmul.f32 %v2543_v59, %v3418_v46  ;;  %v2553_v61 = vmul.f32 %v2547_v20, %v3410_v42 }
 0xa35   : > { %v2535_v47 = vpop.permute.xlu0 %2534  ;;  %2774 = vmatprep.subr.mxu1 %v2553_v61  ;;  %v2527_v12 = vpop.permute.xlu1 %2526 }
 0xa36   : > { %v2542_v50 = vsel %vm843_vm3, %v2527_v12, %v2535_v47  ;;  %v2546_v51 = vsel %vm843_vm3, %v2535_v47, %v2527_v12  ;;  %2775 = vmatpush2.msra.mxu1 %v2552_v43  ;;  %v3077_v47 = vld [vmem:[%s3304_s29] sm:$0xff] }
 0xa37   : > { %v2550_v6 = vmul.f32 %v2542_v50, %v3418_v46  ;;  %v2551_v14 = vmul.f32 %v2546_v51, %v3410_v42 }
 0xa39   : > { %v2501_v26 = vpop.permute.xlu0 %2500  ;;  %2776 = vmatprep.subr.mxu1 %v2551_v14  ;;  %v2493_v44 = vpop.permute.xlu1 %2492 }
 0xa3a   : > { %v2505_v62 = vsel %vm821_vm4, %v2493_v44, %v2501_v26  ;;  %v2509_v10 = vsel %vm821_vm4, %v2501_v26, %v2493_v44  ;;  %2777 = vmatpush2.msra.mxu1 %v2550_v6  ;;  %v3078_v6 = vld [vmem:[%s3304_s29 + $0x8] sm:$0xff] }
 0xa3b   : > { %v2516_v27 = vmul.f32 %v2505_v62, %v3430_v54  ;;  %v2517_v21 = vmul.f32 %v2509_v10, %v3426_v52 }
 0xa3d   : > { %v2499_v7 = vpop.permute.xlu0 %2498  ;;  %2778 = vmatprep.subr.mxu1 %v2517_v21  ;;  %v2491_v8 = vpop.permute.xlu1 %2490 }
 0xa3e   : > { %v2504_v42 = vsel %vm821_vm4, %v2491_v8, %v2499_v7  ;;  %v2508_v46 = vsel %vm821_vm4, %v2499_v7, %v2491_v8  ;;  %2779 = vmatpush2.msra.mxu1 %v2516_v27 }
 0xa3f   : > { %v2514_v11 = vmul.f32 %v2504_v42, %v3430_v54  ;;  %v2515_v22 = vmul.f32 %v2508_v46, %v3426_v52 }
 0xa41   : > { %v2497_v23 = vpop.permute.xlu0 %2496  ;;  %2780 = vmatprep.subr.mxu1 %v2515_v22  ;;  %v2489_v48 = vpop.permute.xlu1 %2488 }
 0xa42   : > { %v2503_v49 = vsel %vm821_vm4, %v2489_v48, %v2497_v23  ;;  %v2507_v38 = vsel %vm821_vm4, %v2497_v23, %v2489_v48  ;;  %2781 = vmatpush2.msra.mxu1 %v2514_v11 }
 0xa43   : > { %v2512_v5 = vmul.f32 %v2503_v49, %v3430_v54  ;;  %v2513_v2 = vmul.f32 %v2507_v38, %v3426_v52 }
 0xa45   : > { %v2495_v45 = vpop.permute.xlu0 %2494  ;;  %2782 = vmatprep.subr.mxu1 %v2513_v2  ;;  %v2487_v25 = vpop.permute.xlu1 %2486 }
 0xa46   : > { %v2502_v35 = vsel %vm821_vm4, %v2487_v25, %v2495_v45  ;;  %v2506_v39 = vsel %vm821_vm4, %v2495_v45, %v2487_v25  ;;  %2783 = vmatpush2.msra.mxu1 %v2512_v5 }
 0xa47   : > { %v2510_v40 = vmul.f32 %v2502_v35, %v3430_v54  ;;  %v2511_v4 = vmul.f32 %v2506_v39, %v3426_v52 }
 0xa49   : > { %v2621_v63 = vpop.permute.xlu0 %2620  ;;  %2784 = vmatprep.subr.mxu1 %v2511_v4  ;;  %v2613_v15 = vpop.permute.xlu1 %2612 }
 0xa4a   : > { %v2625_v18 = vsel %vm887_vm2, %v2613_v15, %v2621_v63  ;;  %v2629_v41 = vsel %vm887_vm2, %v2621_v63, %v2613_v15  ;;  %2785 = vmatpush2.msra.mxu1 %v2510_v40 }
 0xa4b   : > { %v2636_v3 = vmul.f32 %v2625_v18, %v3388_v32  ;;  %v2637_v0 = vmul.f32 %v2629_v41, %v3391_v33  ;;  %2786 = vmatprep.subr.mxu1 %v4265_v29 }
 0xa4c   : > { %2787 = vmatpush2.msra.mxu1 %v4263_v36  ;;  %v2646_v36 = vld [vmem:[%s4676_s16] sm:$0xff] }
 0xa4d   : > { %v2619_v54 = vpop.permute.xlu0 %2618  ;;  %2788 = vmatprep.subr.mxu1 %v4275_v13  ;;  %2825 = vmatprep.subr.mxu0 %v2637_v0  ;;  %v2611_v52 = vpop.permute.xlu1 %2610 }
 0xa4e   : > { %v2624_v28 = vsel %vm887_vm2, %v2611_v52, %v2619_v54  ;;  %v2628_v30 = vsel %vm887_vm2, %v2619_v54, %v2611_v52  ;;  %2789 = vmatpush2.msra.mxu1 %v4273_v9  ;;  %2826 = vmatpush1.msra.mxu0 %v2636_v3 }
 0xa4f   : > { %v2634_v57 = vmul.f32 %v2624_v28, %v3388_v32  ;;  %v2635_v29 = vmul.f32 %v2628_v30, %v3391_v33  ;;  %2790 = vmatprep.subr.mxu1 %v4285_v60 }
 0xa50   : > { %2791 = vmatpush2.msra.mxu1 %v4283_v58 }
 0xa51   : > { %v2617_v13 = vpop.permute.xlu0 %2616  ;;  %2792 = vmatprep.subr.mxu1 %v4293_v55  ;;  %2827 = vmatprep.subr.mxu0 %v2635_v29  ;;  %v2609_v1 = vpop.permute.xlu1 %2608 }
 0xa52   : > { %v2623_v9 = vsel %vm887_vm2, %v2609_v1, %v2617_v13  ;;  %v2627_v17 = vsel %vm887_vm2, %v2617_v13, %v2609_v1  ;;  %2793 = vmatpush2.msra.mxu1 %v4291_v53  ;;  %2828 = vmatpush1.msra.mxu0 %v2634_v57 }
 0xa53   : > { %v2632_v58 = vmul.f32 %v2623_v9, %v3388_v32  ;;  %v2633_v60 = vmul.f32 %v2627_v17, %v3391_v33  ;;  %2795 = vmatmul.mubr.f32.vlgmr.msra.gmra.mxu1 %v2646_v36 }
 0xa55   : > { %v2615_v34 = vpop.permute.xlu0 %2614  ;;  %2829 = vmatprep.subr.mxu0 %v2633_v60  ;;  %v2607_v55 = vpop.permute.xlu1 %2606 }
 0xa56   : > { %v2622_v37 = vsel %vm887_vm2, %v2607_v55, %v2615_v34  ;;  %v2626_v19 = vsel %vm887_vm2, %v2615_v34, %v2607_v55  ;;  %2830 = vmatpush1.msra.mxu0 %v2632_v58 }
 0xa57   : > { %v2630_v16 = vmul.f32 %v2622_v37, %v3388_v32  ;;  %v2631_v53 = vmul.f32 %v2626_v19, %v3391_v33 }
 0xa59   : > { %2831 = vmatprep.subr.mxu0 %v2631_v53 }
 0xa5a   : > { %2832 = vmatpush1.msra.mxu0 %v2630_v16 }
 0xa5b   : > { %2979 = vmatmul.mubr.msk.f32.vlgmr.msra.gmra.mxu0 %vm2058_vm12, %v2648_v31 }
 0xa62   : > { %v2725_v24 = vpop.permute.xlu1 %2724 }
 0xb13   : > { %v2796_v56 = vpop.f32.mrf.mxu1 }
 0xb14   : > { %v2797_v20 = vadd.f32 %v2796_v56, %v2725_v24 }
 0xb15   : > { %v2798_v59 = vpop.f32.mrf.mxu1 }
 0xb16   : > { %v2799_v43 = vadd.f32 %v2798_v59, %v2725_v24 }
 0xb1b   : > { %v2867_v32 = vpop.f32.mrf.mxu0 }
 0xb1c   : > { %v2868_v61 = vadd.f32 %v2867_v32, %v2797_v20 }
 0xb1d   : > { %v2869_v33 = vpop.f32.mrf.mxu0 }
 0xb1e   : > { %v2872_v12 = vadd.f32 %v3077_v47, %v2868_v61  ;;  %v2870_v50 = vadd.f32 %v2869_v33, %v2799_v43 }
 0xb20   : > { %v2874_v51 = vmax.f32 %v2872_v12, 0.0  ;;  %v2873_v14 = vadd.f32 %v3078_v6, %v2870_v50 }
 0xb22   : > { %2876 = vst [vmem:[%s569_s2] sm:$0xff] %v2874_v51  ;;  %v2875_v26 = vmax.f32 %v2873_v14, 0.0 }
 0xb24   : > { %2877 = vst [vmem:[%s569_s2 + $0x8] sm:$0xff] %v2875_v26 }
 0xb25   : > { %3092 = shalt.err (!%p3089_p3)
}
 0xb26   : > { %s3093_s29 = scalar_lea.hbm %s2891_s20, 256  ;;  %s3097_s23 = scalar_lea.hbm %s4740_s21, 512 }
 0xb27   : > { %p3094_p4 = scmp.ne.s32.totalorder %s2891_s20, %s3093_s29  ;;  %p3098_p9 = scmp.lt.s32.totalorder %s2891_s20, %s4740_s21 }
 0xb28   : > { %p3099_p10 = scmp.lt.s32.totalorder %s3097_s23, %s3093_s29 }
 0xb29   : > { %p3095_p7 = pnand %p3094_p4, %p3286_p5 }
 0xb2a   : > { %p3100_p11 = por %p3099_p10, %p3098_p9 }
 0xb2b   : > { %p3096_p8 = pneg %p3095_p7 }
 0xb2d   : > { %p3101_p12 = pnand %p3100_p11, %p3096_p8 }
 0xb2f   : > { %3104 = shalt.err (!%p3101_p12)
}
 0xb30   : > { %3015 = dma.vmem_to_hbm [thread:$0]  (%p3286_p5), %s2894_s3, 256, %s2891_s20, %s2879_s25  }
 0xb31 PF: > { %s4741_s30 = sld [smem:[#allocation11_spill]] }
 0xb32   : > { %s4742_s19 = sld [smem:[#allocation9_spill]] }
 0xb37   : > { %p3021_p13 = scmp.ge.s32.totalorder %s4741_s30, 2 }
 0xb38   : > { %s2905_s24 = sand.u32 1, %s4742_s19  }
 0xb39   : > { %p3018_p0 = pnand %p3021_p13, %p3290_p6  ;;  %s2906_s1 = scalar_lea.sflag [#allocation7], %s2905_s24 }
 0xb3b   : > { %p3019_p1 = pneg %p3018_p0 }
 0xb3d   : > { %3122 = dma.done.wait (%p3019_p1), %s2906_s1, 256  }
 0xb3e   : > { %3124 = vsyncadd (%p3019_p1), %s2906_s1, 4294967040  ;;  %s4744_s30 = sld [smem:[#allocation13_spill]]  ;;  %s4747_s27 = smov %s3131_s28 }
 0xb3f   : > { %s4745_s4 = sld [smem:[#allocation10_spill]] }
 0xb40   : > { %s4746_s29 = sld [smem:[#allocation14_spill]] }
 0xb44   : > { %p28_p2 = scmp.ge.s32.totalorder %s4744_s30, 4  }
 0xb45   : > { %s4748_s28 = smov %s4745_s4 }
 0xb46   :  { %30 = sbr.rel (!%p28_p2) target bundleno = 10 (0xa), region = 127 }
 0xb4b   :  { %2911 = vsyncpa [#allocation7], 1 }
 0xb4c   :  { %2913 = vsyncpa [#allocation7 + $0x1], 1 }

</bundles_post_ra>
